<compile_context>
chip_gen: v7x
topology: tpu7x:2x2x1
jax: 0.10.0
libtpu: 0.0.40
codegen_flags: <defaults>
</compile_context>

<pallas_src>
import functools
import math

import jax
import jax.numpy as jnp
from jax.experimental import pallas as pl
from jax.experimental.pallas import tpu as pltpu


# dot_general dimension numbers (2-D, no batch dims):
_NT = (((1,), (1,)), ((), ()))   # A(m,k) @ B(n,k)^T -> (m,n)   (flash-attn q@k^T pattern)
_NN = (((1,), (0,)), ((), ()))   # A(m,k) @ B(k,n)   -> (m,n)   (standard)
_TN = (((0,), (0,)), ((), ()))   # A(k,m)^T @ B(k,n) -> (m,n)   (splash-attn dq pattern)


def _softplus_beta100(x):
    # torch.nn.Softplus(beta=100): softplus(100*x)/100.
    # Branch-free, numerically stable form: relu(x) + log(1 + exp(-|100x|)) / 100.
    # Agrees with torch's threshold=20 variant to < ~2e-11.
    bx = 100.0 * x
    return jnp.maximum(x, 0.0) + 0.01 * jnp.log(1.0 + jnp.exp(-jnp.abs(bx)))


def _mlp_kernel(x_ref, *refs, n_layers):
    """Fused MLP forward for one batch tile.

    refs = (w0, b0, w1, b1, ..., w_last_T, b_last, o_ref)
      w0, w_i       : PyTorch (out, in) layout
      w_last_T      : pre-transposed on the host to (in, dim_out)
      b0, b_i       : (out, 1);  b_last : (1, dim_out)
    x_ref : (tile_n, dim_in) block of the (N, dim_in) input.
    o_ref : (tile_n, dim_out) block of the (N, dim_out) output.
    Hidden activations are kept in the lane-dense (features, tile_n) layout
    (batch on the 128-lane axis) so softplus uses every lane.
    """
    o_ref = refs[-1]
    dot = functools.partial(
        jax.lax.dot_general,
        preferred_element_type=jnp.float32,
        precision=jax.lax.Precision.HIGHEST,   # true fp32 matmul; MXU has massive slack
    )

    x_blk = x_ref[...].astype(jnp.float32)                         # (tile_n, dim_in)

    # First layer: (n0, dim_in) @ (tile_n, dim_in)^T -> (n0, tile_n).
    h = dot(refs[0][...], x_blk, dimension_numbers=_NT) + refs[1][...]
    h = _softplus_beta100(h)

    # Middle hidden layers: standard (n, n) @ (n, tile_n).
    for i in range(1, n_layers - 1):
        h = dot(refs[2 * i][...], h, dimension_numbers=_NN) + refs[2 * i + 1][...]
        h = _softplus_beta100(h)

    # Last layer: (n, tile_n)^T @ (n, dim_out) -> (tile_n, dim_out), stored straight
    # into the (N, dim_out) output (no external transpose).  Output activation = identity.
    wl_t = refs[2 * (n_layers - 1)][...]
    bl = refs[2 * (n_layers - 1) + 1][...]                         # (1, dim_out)
    out = dot(h, wl_t, dimension_numbers=_TN) + bl
    o_ref[...] = out.astype(o_ref.dtype)


def sphere_init_mlp_forward(x, weights, biases, *, max_tile_n=2048, min_grid_steps=4):
    """Run the SphereInitVanillaMLP forward.

    Args:
      x: (N, dim_in) float32 (torch row-major layout; returned in the same layout).
      weights: list of effective (out_features, in_features) float32 matrices
               (nn.Linear.weight layout, weight_norm already applied).
      biases: list of (out_features,) float32 vectors.
      max_tile_n: largest batch tile (multiple of 128). 2048-4096 is the sweet spot
                  on v5e/v6e for large N.
      min_grid_steps: shrink the tile until the grid has at least this many steps
                      (4 => >= 2 steps per TensorCore on v7x, restoring pipelining).
    Returns:
      (N, dim_out) float32.
    """
    N, dim_in = x.shape
    n_layers = len(weights)
    assert n_layers >= 2, "module always has at least first + last linear"
    dim_out = weights[-1].shape[0]

    tile_n = max(128, max_tile_n - max_tile_n % 128)
    while tile_n > 128 and pl.cdiv(N, tile_n) < min_grid_steps:
        tile_n //= 2
    assert tile_n % 128 == 0

    n_pad = pl.cdiv(N, tile_n) * tile_n
    # Padded rows flow through bias+softplus and are sliced off below: wasted lanes only,
    # never reduced over.  (No pad op is emitted when tile_n divides N.)
    x_p = x if n_pad == N else jnp.pad(x, ((0, n_pad - N), (0, 0)))

    grid = (n_pad // tile_n,)

    in_specs = [pl.BlockSpec((tile_n, dim_in), lambda i: (i, 0))]
    args = [x_p]
    for li, (w, b) in enumerate(zip(weights, biases)):
        is_last = li == n_layers - 1
        if is_last:
            w_arg = w.T                      # (n_in, dim_out): one-time tiny param prep
            b_arg = b.reshape(1, -1)         # (1, dim_out)
        else:
            w_arg = w                        # (n_out, n_in), PyTorch layout
            b_arg = b.reshape(-1, 1)         # (n_out, 1) -> lane-broadcast in kernel
        # Full-array blocks with constant index_map: weights/biases stay VMEM-resident.
        in_specs.append(pl.BlockSpec(w_arg.shape, lambda i: (0, 0)))
        in_specs.append(pl.BlockSpec(b_arg.shape, lambda i: (0, 0)))
        args.append(w_arg)
        args.append(b_arg)

    out_spec = pl.BlockSpec((tile_n, dim_out), lambda i: (i, 0))

    # Advisory scheduling hint (reflects actual kernel I/O incl. padding; no external
    # transpose passes anymore).
    matmul_flops = 2 * n_pad * sum(int(w.shape[0]) * int(w.shape[1]) for w in weights)
    bias_flops = n_pad * sum(int(b.shape[0]) for b in biases)
    hidden_units = sum(int(w.shape[0]) for w in weights[:-1])
    cost = pl.CostEstimate(
        flops=matmul_flops + bias_flops,
        transcendentals=2 * n_pad * hidden_units,     # exp + log per softplus element
        bytes_accessed=4 * (n_pad * (dim_in + dim_out)
                            + sum(int(w.size) for w in weights)
                            + sum(int(b.size) for b in biases)),
    )

    kernel = functools.partial(_mlp_kernel, n_layers=n_layers)

    out = pl.pallas_call(
        kernel,
        out_shape=jax.ShapeDtypeStruct((n_pad, dim_out), jnp.float32),
        grid_spec=pltpu.PrefetchScalarGridSpec(
            num_scalar_prefetch=0,
            grid=grid,
            in_specs=in_specs,
            out_specs=out_spec,
        ),
        compiler_params=pltpu.CompilerParams(
            dimension_semantics=("parallel",),        # independent batch tiles
        ),
        cost_estimate=cost,
    )(*args)

    return out if n_pad == N else out[:N]


def apply_weight_norm(v, g):
    """Effective weight of nn.utils.weight_norm(nn.Linear): W = g * v / ||v||_row."""
    norm = jnp.sqrt(jnp.sum(v * v, axis=1, keepdims=True))
    return v * (g[:, None] / jnp.maximum(norm, 1e-12))


def init_sphere_mlp_params(key, dim_in, dim_out, n_neurons, n_hidden_layers,
                           sphere_init_radius, inside_out):
    """Deterministic params matching SphereInitVanillaMLP.make_linear initialization.

    Returns a list of (weight_v, weight_g, bias) per linear layer; weight shapes follow
    PyTorch nn.Linear: (out_features, in_features).  weight_norm's g is initialized to
    the row norm of v, so the effective weight at init equals v.
    """
    dims = [dim_in] + [n_neurons] * n_hidden_layers + [dim_out]
    params = []
    n_lin = len(dims) - 1
    for i in range(n_lin):
        key, sub = jax.random.split(key)
        fan_in, fan_out = dims[i], dims[i + 1]
        is_first, is_last = i == 0, i == n_lin - 1
        if is_last:
            mean = math.sqrt(math.pi) / math.sqrt(fan_in)
            if inside_out:
                mean = -mean
                bias = jnp.full((fan_out,), sphere_init_radius, jnp.float32)
            else:
                bias = jnp.full((fan_out,), -sphere_init_radius, jnp.float32)
            v = mean + 1e-4 * jax.random.normal(sub, (fan_out, fan_in), jnp.float32)
        elif is_first:
            std = math.sqrt(2.0) / math.sqrt(fan_out)
            k = min(3, fan_in)
            v = jnp.zeros((fan_out, fan_in), jnp.float32)
            v = v.at[:, :k].set(std * jax.random.normal(sub, (fan_out, k), jnp.float32))
            bias = jnp.zeros((fan_out,), jnp.float32)
        else:
            std = math.sqrt(2.0) / math.sqrt(fan_out)
            v = std * jax.random.normal(sub, (fan_out, fan_in), jnp.float32)
            bias = jnp.zeros((fan_out,), jnp.float32)
        g = jnp.sqrt(jnp.sum(v * v, axis=1))          # weight_norm init: g = ||v||_row
        params.append((v, g, bias))
    return params


def _reference_forward(x, weights, biases):
    """Pure-JAX reference: fp32 matmuls + torch's thresholded Softplus(beta=100)."""
    def sp(t):
        bt = 100.0 * t
        return jnp.where(bt > 20.0, t, jnp.log1p(jnp.exp(jnp.minimum(bt, 20.0))) * 0.01)

    h = x
    for i, (w, b) in enumerate(zip(weights, biases)):
        h = jnp.dot(h, w.T, precision=jax.lax.Precision.HIGHEST) + b
        if i < len(weights) - 1:
            h = sp(h)
    return h  # output_activation = identity


if __name__ == "__main__":
    # Config consistent with SphereInitVanillaMLP(dim_in, dim_out, config)
    dim_in, dim_out = 4, 4
    config = {
        "n_neurons": 32,
        "n_hidden_layers": 2,
        "sphere_init_radius": 0.5,
        "inside_out": False,
        "output_activation": None,
    }

    key = jax.random.PRNGKey(0)
    key, kx = jax.random.split(key)

    N = 2048  # points; auto-tiling picks tile_n=512 -> 4 grid steps (>=2 per v7x TC)
    x = jax.random.normal(kx, (N, dim_in), dtype=jnp.float32)

    params = init_sphere_mlp_params(
        key, dim_in, dim_out, config["n_neurons"], config["n_hidden_layers"],
        config["sphere_init_radius"], config["inside_out"])
    weights = [apply_weight_norm(v, g) for (v, g, _) in params]   # host-side weight_norm
    biases = [b for (_, _, b) in params]

    out = sphere_init_mlp_forward(x, weights, biases)
    out = jax.block_until_ready(out)

    ref = _reference_forward(x, weights, biases)
    assert out.shape == (N, dim_out)
    assert jnp.allclose(out, ref, atol=1e-4, rtol=1e-4), "mismatch vs reference"

    print("KERNEL_OK")
</pallas_src>

<mosaic_0001>
module attributes {stable_mosaic.version = 11 : i64} {
  func.func @_mlp_kernel(%arg0: i32, %arg1: memref<512x4xf32, #tpu.memory_space<vmem>>, %arg2: memref<32x4xf32, #tpu.memory_space<vmem>>, %arg3: memref<32x1xf32, #tpu.memory_space<vmem>>, %arg4: memref<32x32xf32, #tpu.memory_space<vmem>>, %arg5: memref<32x1xf32, #tpu.memory_space<vmem>>, %arg6: memref<32x4xf32, #tpu.memory_space<vmem>>, %arg7: memref<1x4xf32, #tpu.memory_space<vmem>>, %arg8: memref<512x4xf32, #tpu.memory_space<vmem>>) attributes {dimension_semantics = [#tpu.dimension_semantics<parallel>], iteration_bounds = array<i64: 4>, scalar_prefetch = 0 : i64, scratch_operands = 0 : i64, tpu.core_type = #tpu.core_type<tc>, window_params = [{transform_indices = @transform_0, window_bounds = array<i64: 512, 4>}, {pipeline_mode = #tpu.pipeline_mode<synchronous>, transform_indices = @transform_1, window_bounds = array<i64: 32, 4>}, {pipeline_mode = #tpu.pipeline_mode<synchronous>, transform_indices = @transform_2, window_bounds = array<i64: 32, 1>}, {pipeline_mode = #tpu.pipeline_mode<synchronous>, transform_indices = @transform_3, window_bounds = array<i64: 32, 32>}, {pipeline_mode = #tpu.pipeline_mode<synchronous>, transform_indices = @transform_4, window_bounds = array<i64: 32, 1>}, {pipeline_mode = #tpu.pipeline_mode<synchronous>, transform_indices = @transform_5, window_bounds = array<i64: 32, 4>}, {pipeline_mode = #tpu.pipeline_mode<synchronous>, transform_indices = @transform_6, window_bounds = array<i64: 1, 4>}, {transform_indices = @transform_7, window_bounds = array<i64: 512, 4>}]} {
    %c0 = arith.constant 0 : index
    %c0_0 = arith.constant 0 : index
    %0 = vector.load %arg1[%c0, %c0_0] : memref<512x4xf32, #tpu.memory_space<vmem>>, vector<512x4xf32>
    %c0_1 = arith.constant 0 : index
    %c0_2 = arith.constant 0 : index
    %1 = vector.load %arg2[%c0_1, %c0_2] : memref<32x4xf32, #tpu.memory_space<vmem>>, vector<32x4xf32>
    %cst = arith.constant dense<0.000000e+00> : vector<32x512xf32>
    %2 = tpu.matmul %1, %0, %cst {dimension_numbers = #tpu.dot_dimension_numbers<[1], [1], [0], [0], [0, 0, 1, 0], [], []>, precision = #tpu.contract_precision<fp32>} : vector<32x4xf32>, vector<512x4xf32>, vector<32x512xf32> -> vector<32x512xf32>
    %c0_3 = arith.constant 0 : index
    %c0_4 = arith.constant 0 : index
    %3 = vector.load %arg3[%c0_3, %c0_4] : memref<32x1xf32, #tpu.memory_space<vmem>>, vector<32x1xf32>
    %4 = vector.broadcast %3 : vector<32x1xf32> to vector<32x512xf32>
    %5 = arith.addf %2, %4 : vector<32x512xf32>
    %cst_5 = arith.constant 1.000000e+02 : f32
    %6 = vector.broadcast %cst_5 : f32 to vector<32x512xf32>
    %7 = arith.mulf %6, %5 : vector<32x512xf32>
    %cst_6 = arith.constant 0.000000e+00 : f32
    %8 = vector.broadcast %cst_6 : f32 to vector<32x512xf32>
    %9 = arith.maximumf %5, %8 : vector<32x512xf32>
    %10 = math.absf %7 : vector<32x512xf32>
    %cst_7 = arith.constant 0.000000e+00 : f32
    %11 = vector.broadcast %cst_7 : f32 to vector<32x512xf32>
    %12 = arith.subf %11, %10 : vector<32x512xf32>
    %13 = math.exp %12 : vector<32x512xf32>
    %cst_8 = arith.constant 1.000000e+00 : f32
    %14 = vector.broadcast %cst_8 : f32 to vector<32x512xf32>
    %15 = arith.addf %14, %13 : vector<32x512xf32>
    %16 = math.log %15 : vector<32x512xf32>
    %cst_9 = arith.constant 0.00999999977 : f32
    %17 = vector.broadcast %cst_9 : f32 to vector<32x512xf32>
    %18 = arith.mulf %17, %16 : vector<32x512xf32>
    %19 = arith.addf %9, %18 : vector<32x512xf32>
    %c0_10 = arith.constant 0 : index
    %c0_11 = arith.constant 0 : index
    %20 = vector.load %arg4[%c0_10, %c0_11] : memref<32x32xf32, #tpu.memory_space<vmem>>, vector<32x32xf32>
    %cst_12 = arith.constant dense<0.000000e+00> : vector<32x512xf32>
    %21 = tpu.matmul %20, %19, %cst_12 {dimension_numbers = #tpu.dot_dimension_numbers<[1], [0], [0], [1], [0, 0, 1, 1], [], []>, precision = #tpu.contract_precision<fp32>} : vector<32x32xf32>, vector<32x512xf32>, vector<32x512xf32> -> vector<32x512xf32>
    %c0_13 = arith.constant 0 : index
    %c0_14 = arith.constant 0 : index
    %22 = vector.load %arg5[%c0_13, %c0_14] : memref<32x1xf32, #tpu.memory_space<vmem>>, vector<32x1xf32>
    %23 = vector.broadcast %22 : vector<32x1xf32> to vector<32x512xf32>
    %24 = arith.addf %21, %23 : vector<32x512xf32>
    %cst_15 = arith.constant 1.000000e+02 : f32
    %25 = vector.broadcast %cst_15 : f32 to vector<32x512xf32>
    %26 = arith.mulf %25, %24 : vector<32x512xf32>
    %cst_16 = arith.constant 0.000000e+00 : f32
    %27 = vector.broadcast %cst_16 : f32 to vector<32x512xf32>
    %28 = arith.maximumf %24, %27 : vector<32x512xf32>
    %29 = math.absf %26 : vector<32x512xf32>
    %cst_17 = arith.constant 0.000000e+00 : f32
    %30 = vector.broadcast %cst_17 : f32 to vector<32x512xf32>
    %31 = arith.subf %30, %29 : vector<32x512xf32>
    %32 = math.exp %31 : vector<32x512xf32>
    %cst_18 = arith.constant 1.000000e+00 : f32
    %33 = vector.broadcast %cst_18 : f32 to vector<32x512xf32>
    %34 = arith.addf %33, %32 : vector<32x512xf32>
    %35 = math.log %34 : vector<32x512xf32>
    %cst_19 = arith.constant 0.00999999977 : f32
    %36 = vector.broadcast %cst_19 : f32 to vector<32x512xf32>
    %37 = arith.mulf %36, %35 : vector<32x512xf32>
    %38 = arith.addf %28, %37 : vector<32x512xf32>
    %c0_20 = arith.constant 0 : index
    %c0_21 = arith.constant 0 : index
    %39 = vector.load %arg6[%c0_20, %c0_21] : memref<32x4xf32, #tpu.memory_space<vmem>>, vector<32x4xf32>
    %c0_22 = arith.constant 0 : index
    %c0_23 = arith.constant 0 : index
    %40 = vector.load %arg7[%c0_22, %c0_23] : memref<1x4xf32, #tpu.memory_space<vmem>>, vector<1x4xf32>
    %cst_24 = arith.constant dense<0.000000e+00> : vector<512x4xf32>
    %41 = tpu.matmul %38, %39, %cst_24 {dimension_numbers = #tpu.dot_dimension_numbers<[0], [0], [1], [1], [0, 1, 1, 1], [], []>, precision = #tpu.contract_precision<fp32>} : vector<32x512xf32>, vector<32x4xf32>, vector<512x4xf32> -> vector<512x4xf32>
    %42 = vector.broadcast %40 : vector<1x4xf32> to vector<512x4xf32>
    %43 = arith.addf %41, %42 : vector<512x4xf32>
    %c0_25 = arith.constant 0 : index
    %c0_26 = arith.constant 0 : index
    %44 = vector.load %arg8[%c0_25, %c0_26] : memref<512x4xf32, #tpu.memory_space<vmem>>, vector<512x4xf32>
    tpu.vector_store %arg8[%c0_25, %c0_26], %43 {strides = array<i32>} : memref<512x4xf32, #tpu.memory_space<vmem>>, vector<512x4xf32>,
    return
  }
  func.func @transform_0(%arg0: i32) -> (i32, i32) {
    %c0_i32 = arith.constant 0 : i32
    %c0_i32_0 = arith.constant 0 : i32
    return %arg0, %c0_i32 : i32, i32
  }
  func.func @transform_1(%arg0: i32) -> (i32, i32) {
    %c0_i32 = arith.constant 0 : i32
    %c0_i32_0 = arith.constant 0 : i32
    %c0_i32_1 = arith.constant 0 : i32
    return %c0_i32, %c0_i32_0 : i32, i32
  }
  func.func @transform_2(%arg0: i32) -> (i32, i32) {
    %c0_i32 = arith.constant 0 : i32
    %c0_i32_0 = arith.constant 0 : i32
    %c0_i32_1 = arith.constant 0 : i32
    return %c0_i32, %c0_i32_0 : i32, i32
  }
  func.func @transform_3(%arg0: i32) -> (i32, i32) {
    %c0_i32 = arith.constant 0 : i32
    %c0_i32_0 = arith.constant 0 : i32
    %c0_i32_1 = arith.constant 0 : i32
    return %c0_i32, %c0_i32_0 : i32, i32
  }
  func.func @transform_4(%arg0: i32) -> (i32, i32) {
    %c0_i32 = arith.constant 0 : i32
    %c0_i32_0 = arith.constant 0 : i32
    %c0_i32_1 = arith.constant 0 : i32
    return %c0_i32, %c0_i32_0 : i32, i32
  }
  func.func @transform_5(%arg0: i32) -> (i32, i32) {
    %c0_i32 = arith.constant 0 : i32
    %c0_i32_0 = arith.constant 0 : i32
    %c0_i32_1 = arith.constant 0 : i32
    return %c0_i32, %c0_i32_0 : i32, i32
  }
  func.func @transform_6(%arg0: i32) -> (i32, i32) {
    %c0_i32 = arith.constant 0 : i32
    %c0_i32_0 = arith.constant 0 : i32
    %c0_i32_1 = arith.constant 0 : i32
    return %c0_i32, %c0_i32_0 : i32, i32
  }
  func.func @transform_7(%arg0: i32) -> (i32, i32) {
    %c0_i32 = arith.constant 0 : i32
    %c0_i32_0 = arith.constant 0 : i32
    return %arg0, %c0_i32 : i32, i32
  }
}

</mosaic_0001>

<bundles_post_ra>
// kernel: tpu_custom_call.1
= control target key start
LH: loop header
LB: loop body
LE: loop exit
PB: predicated region body
PF: predicated region fallthrough
CT: control target
= control target key end

     0   :  { %s10819_s24 = smov 0   ;;  %s13627_s0 = inlined_call_operand.vmem [shape: f32[2048,4], index: 0, kind: input, shape index: {}]   ;;  %s13628_s1 = inlined_call_operand.vmem [shape: f32[32,4], index: 1, kind: input, shape index: {}]   ;;  %s13629_s2 = inlined_call_operand.vmem [shape: f32[32,1], index: 2, kind: input, shape index: {}]   ;;  %s13630_s3 = inlined_call_operand.vmem [shape: f32[32,32], index: 3, kind: input, shape index: {}]   ;;  %s13631_s4 = inlined_call_operand.vmem [shape: f32[32,1], index: 4, kind: input, shape index: {}]   ;;  %s13632_s5 = inlined_call_operand.vmem [shape: f32[32,4], index: 5, kind: input, shape index: {}]   ;;  %s13633_s6 = inlined_call_operand.vmem [shape: f32[1,4], index: 6, kind: input, shape index: {}]   ;;  %s13634_s7 = inlined_call_operand.vmem [shape: f32[2048,4], index: 7, kind: output, shape index: {}]  }
   0x1 LB: > { %s8001_s25 = sadd.s32 4294967295, %s10775_s24   ;;  %p8005_p0 = scmp.ge.s32.totalorder %s10775_s24, 1  ;;  %s10775_s24 = sphi %s10819_s24, %s17_s24  }
   0x2   : > { %p238_p1 = scmp.lt.s32.totalorder %s10775_s24, 5 }
   0x4   : > { %p239_p2 = pnand %p8005_p0, %p238_p1 }
   0x6   : > { %242 = sbr.rel (%p239_p2) target bundleno = 1814 (0x716), region = 48 }
   0xd   : > { %s8006_s26 = sshll.u32 %s8001_s25, 6  ;;  %vm374_vm0 = vcmask 31744   ;;  %v346_v0 = vld [vmem:[%s13628_s1] sm:$0xff]  ;;  %v347_v1 = vld [vmem:[%s13628_s1 + $0x8] sm:$0xff]  ;;  %v348_v2 = vld [vmem:[%s13628_s1 + $0x10] sm:$0xff]  ;;  %vm2787_vm1 = vcmask 261120  }
   0xe   : > { %p271_p3 = scmp.lt.s32.totalorder %s8006_s26, 255  ;;  %v376_v3 = vsel %vm374_vm0, %v346_v0, 0  ;;  %v379_v4 = vsel %vm374_vm0, %v347_v1, 0  ;;  %v382_v5 = vsel %vm374_vm0, %v348_v2, 0  ;;  %v349_v6 = vld [vmem:[%s13628_s1 + $0x18] sm:$0xff] }
   0xf   : > { %v10842_v7 = vand.u32 4294901760, %v376_v3  ;;  %v385_v8 = vsel %vm374_vm0, %v349_v6, 0  ;;  %v10847_v9 = vand.u32 4294901760, %v379_v4  ;;  %v10849_v10 = vand.u32 4294901760, %v382_v5 }
  0x10   : > { %s14533_s26 = smov (!%p271_p3, %s8006_s26), 255  ;;  %v10854_v12 = vand.u32 4294901760, %v385_v8 }
  0x11   : > { %13992 = vst [vmem:[#allocation2_spill] sm:$0xff] %v10842_v7  ;;  %13993 = vst [vmem:[#allocation3_spill] sm:$0xff] %v10847_v9  ;;  %v10852_v11 = vsub.f32 %v376_v3, %v10842_v7  ;;  %s8007_s12 = sshll.u32 %s14533_s26, 3  ;;  %v10871_v17 = vsub.f32 %v379_v4, %v10847_v9  ;;  %v10874_v18 = vsub.f32 %v382_v5, %v10849_v10 }
  0x12   : > { %13994 = vst [vmem:[#allocation4_spill] sm:$0xff] %v10849_v10  ;;  %13996 = vst [vmem:[#allocation6_spill] sm:$0xff] %v10854_v12  ;;  %s10862_s15 = scalar_lea.vmem %s13627_s0, %s8007_s12  ;;  %v10883_v25 = vsub.f32 %v385_v8, %v10854_v12  ;;  %s13431_s11 = scalar_lea.vmem %s13634_s7, %s8007_s12 }
  0x13   : > { %13995 = vst [vmem:[#allocation5_spill] sm:$0xff] %v10852_v11  ;;  %v298_v13 = vld [vmem:[%s10862_s15 + $0x80] sm:$0xff]  ;;  %v299_v14 = vld [vmem:[%s10862_s15 + $0x88] sm:$0xff]  ;;  %v10868_v16 = vand.u32 4294901760, %v10852_v11  ;;  %13998 = vst [vmem:[#allocation8_spill] sm:$0xff] %v10871_v17  ;;  %v10896_v39 = vand.u32 4294901760, %v10871_v17 }
  0x14   : > { %v330_v15 = vld [vmem:[%s10862_s15 + $0x180] sm:$0xff]  ;;  %13999 = vst [vmem:[#allocation9_spill] sm:$0xff] %v10874_v18  ;;  %v436_v19 = vsel %vm374_vm0, %v298_v13, 0  ;;  %v439_v20 = vsel %vm374_vm0, %v299_v14, 0  ;;  %v331_v21 = vld [vmem:[%s10862_s15 + $0x188] sm:$0xff]  ;;  %14000 = vst [vmem:[#allocation10_spill] sm:$0xff] %v10883_v25 }
  0x15   : > { %13997 = vst [vmem:[#allocation7_spill] sm:$0xff] %v10868_v16  ;;  %v532_v22 = vsel %vm374_vm0, %v330_v15, 0  ;;  %v282_v23 = vld [vmem:[%s10862_s15] sm:$0xff]  ;;  %v283_v24 = vld [vmem:[%s10862_s15 + $0x8] sm:$0xff]  ;;  %v628_v26 = vand.u32 4294901760, %v436_v19  ;;  %v631_v27 = vand.u32 4294901760, %v439_v20 }
  0x16   : > { %v535_v28 = vsel %vm374_vm0, %v331_v21, 0  ;;  %v1630_v29 = vand.u32 4294901760, %v532_v22  ;;  %v314_v30 = vld [vmem:[%s10862_s15 + $0x100] sm:$0xff]  ;;  %v315_v31 = vld [vmem:[%s10862_s15 + $0x108] sm:$0xff]  ;;  %v388_v33 = vsel %vm374_vm0, %v282_v23, 0  ;;  %v391_v34 = vsel %vm374_vm0, %v283_v24, 0 }
  0x17   : > { %v1633_v32 = vand.u32 4294901760, %v535_v28  ;;  %v484_v35 = vsel %vm374_vm0, %v314_v30, 0  ;;  %v300_v36 = vld [vmem:[%s10862_s15 + $0x90] sm:$0xff]  ;;  %v301_v37 = vld [vmem:[%s10862_s15 + $0x98] sm:$0xff]  ;;  %v10893_v38 = vpack.c.bf16 %v631_v27, %v628_v26  ;;  %14002 = vst [vmem:[#allocation12_spill] sm:$0xff] %v10896_v39  ;;  %v10899_v40 = vand.u32 4294901760, %v10874_v18 }
  0x18   : > { %v580_v42 = vand.u32 4294901760, %v388_v33  ;;  %v583_v43 = vand.u32 4294901760, %v391_v34  ;;  %v332_v44 = vld [vmem:[%s10862_s15 + $0x190] sm:$0xff]  ;;  %v10905_v45 = vand.u32 4294901760, %v10883_v25  ;;  %v487_v46 = vsel %vm374_vm0, %v315_v31, 0  ;;  %v333_v50 = vld [vmem:[%s10862_s15 + $0x198] sm:$0xff] }
  0x19   : > { %14001 = vst [vmem:[#allocation11_spill] sm:$0xff] %v10893_v38  ;;  %14003 = vst [vmem:[#allocation13_spill] sm:$0xff] %v10899_v40  ;;  %v10901_v41 = vpack.c.bf16 %v1633_v32, %v1630_v29  ;;  %9526 = vmatprep.subr.bf16.mxu0 %v10893_v38  ;;  %v1582_v47 = vand.u32 4294901760, %v484_v35  ;;  %v442_v48 = vsel %vm374_vm0, %v300_v36, 0  ;;  %v445_v49 = vsel %vm374_vm0, %v301_v37, 0  ;;  %v284_v59 = vld [vmem:[%s10862_s15 + $0x10] sm:$0xff] }
  0x1a   : > { %14005 = vst [vmem:[#allocation15_spill] sm:$0xff] %v10905_v45  ;;  %v10912_v51 = vsub.f32 %v436_v19, %v628_v26  ;;  %v10915_v52 = vpack.c.bf16 %v583_v43, %v580_v42  ;;  %v1585_v53 = vand.u32 4294901760, %v487_v46  ;;  %v10919_v55 = vsub.f32 %v439_v20, %v631_v27  ;;  %v285_v60 = vld [vmem:[%s10862_s15 + $0x18] sm:$0xff]  ;;  %v316_v61 = vld [vmem:[%s10862_s15 + $0x110] sm:$0xff]  ;;  %v302_v8 = vld [vmem:[%s10862_s15 + $0xa0] sm:$0xff] }
  0x1b   : > { %14004 = vst [vmem:[#allocation14_spill] sm:$0xff] %v10901_v41  ;;  %9718 = vmatprep.subr.bf16.mxu1 %v10901_v41  ;;  %v634_v56 = vand.u32 4294901760, %v442_v48  ;;  %v637_v57 = vand.u32 4294901760, %v445_v49  ;;  %v538_v58 = vsel %vm374_vm0, %v332_v44, 0  ;;  %v10925_v62 = vsub.f32 %v532_v22, %v1630_v29  ;;  %v317_v6 = vld [vmem:[%s10862_s15 + $0x118] sm:$0xff]  ;;  %v303_v13 = vld [vmem:[%s10862_s15 + $0xa8] sm:$0xff] }
  0x1c   : > { %14006 = vst [vmem:[#allocation16_spill] sm:$0xff] %v10915_v52  ;;  %14007 = vst [vmem:[#allocation17_spill] sm:$0xff] %v10919_v55  ;;  %9528 = vmatpush3.bf16.xpose.msra.mxu0 %v10915_v52  ;;  %v10928_v63 = vpack.c.bf16 %v1585_v53, %v1582_v47  ;;  %v541_v0 = vsel %vm374_vm0, %v333_v50, 0  ;;  %v1636_v1 = vand.u32 4294901760, %v538_v58  ;;  %v10931_v2 = vsub.f32 %v535_v28, %v1633_v32  ;;  %v334_v26 = vld [vmem:[%s10862_s15 + $0x1a0] sm:$0xff]  ;;  %v335_v31 = vld [vmem:[%s10862_s15 + $0x1a8] sm:$0xff] }
  0x1d   : > { %14008 = vst [vmem:[#allocation18_spill] sm:$0xff] %v10925_v62  ;;  %v10933_v3 = vsub.f32 %v388_v33, %v580_v42  ;;  %v10935_v4 = vpack.c.bf16 %v637_v57, %v634_v56  ;;  %v1639_v5 = vand.u32 4294901760, %v541_v0  ;;  %v10940_v14 = vsub.f32 %v391_v34, %v583_v43  ;;  %v286_v44 = vld [vmem:[%s10862_s15 + $0x20] sm:$0xff]  ;;  %v321_v52 = vld [vmem:[%s10862_s15 + $0x138] sm:$0xff]  ;;  %v307_v41 = vld [vmem:[%s10862_s15 + $0xc8] sm:$0xff] }
  0x1e   : > { %14009 = vst [vmem:[#allocation19_spill] sm:$0xff] %v10928_v63  ;;  %14010 = vst [vmem:[#allocation20_spill] sm:$0xff] %v10931_v2  ;;  %9720 = vmatpush3.bf16.xpose.msra.mxu1 %v10928_v63  ;;  %v394_v15 = vsel %vm374_vm0, %v284_v59, 0  ;;  %v397_v19 = vsel %vm374_vm0, %v285_v60, 0  ;;  %v490_v20 = vsel %vm374_vm0, %v316_v61, 0  ;;  %v10946_v21 = vsub.f32 %v484_v35, %v1582_v47  ;;  %v287_v47 = vld [vmem:[%s10862_s15 + $0x28] sm:$0xff] }
  0x1f   : > { %14011 = vst [vmem:[#allocation21_spill] sm:$0xff] %v10933_v3  ;;  %14012 = vst [vmem:[#allocation22_spill] sm:$0xff] %v10935_v4  ;;  %9530 = vmatprep.subr.bf16.mxu0 %v10935_v4  ;;  %v10949_v22 = vpack.c.bf16 %v1639_v5, %v1636_v1  ;;  %v586_v23 = vand.u32 4294901760, %v394_v15  ;;  %v589_v24 = vand.u32 4294901760, %v397_v19  ;;  %v493_v27 = vsel %vm374_vm0, %v317_v6, 0  ;;  %v319_v61 = vld [vmem:[%s10862_s15 + $0x128] sm:$0xff] }
  0x20   : > { %14013 = vst [vmem:[#allocation23_spill] sm:$0xff] %v10940_v14  ;;  %14014 = vst [vmem:[#allocation24_spill] sm:$0xff] %v10946_v21  ;;  %v1588_v28 = vand.u32 4294901760, %v490_v20  ;;  %v448_v29 = vsel %vm374_vm0, %v302_v8, 0  ;;  %v451_v30 = vsel %vm374_vm0, %v303_v13, 0  ;;  %v10956_v32 = vsub.f32 %v487_v46, %v1585_v53  ;;  %v318_v46 = vld [vmem:[%s10862_s15 + $0x120] sm:$0xff] }
  0x21   : > { %14015 = vst [vmem:[#allocation25_spill] sm:$0xff] %v10949_v22  ;;  %v10958_v33 = vsub.f32 %v442_v48, %v634_v56  ;;  %9722 = vmatprep.subr.bf16.mxu1 %v10949_v22  ;;  %v10961_v34 = vpack.c.bf16 %v589_v24, %v586_v23  ;;  %v1591_v35 = vand.u32 4294901760, %v493_v27  ;;  %v10963_v36 = vsub.f32 %v445_v49, %v637_v57  ;;  %v304_v6 = vld [vmem:[%s10862_s15 + $0xb0] sm:$0xff]  ;;  %v305_v8 = vld [vmem:[%s10862_s15 + $0xb8] sm:$0xff]  ;;  %v338_v12 = vld [vmem:[%s10862_s15 + $0x1c0] sm:$0xff] }
  0x22   : > { %14016 = vst [vmem:[#allocation26_spill] sm:$0xff] %v10956_v32  ;;  %v640_v37 = vand.u32 4294901760, %v448_v29  ;;  %v643_v42 = vand.u32 4294901760, %v451_v30  ;;  %v544_v43 = vsel %vm374_vm0, %v334_v26, 0  ;;  %v10969_v50 = vsub.f32 %v538_v58, %v1636_v1  ;;  %v289_v22 = vld [vmem:[%s10862_s15 + $0x38] sm:$0xff]  ;;  %v291_v9 = vld [vmem:[%s10862_s15 + $0x48] sm:$0xff] }
  0x23   : > { %14017 = vst [vmem:[#allocation27_spill] sm:$0xff] %v10958_v33  ;;  %14018 = vst [vmem:[#allocation28_spill] sm:$0xff] %v10961_v34  ;;  %v10971_v48 = vpack.c.bf16 %v1591_v35, %v1588_v28  ;;  %v547_v53 = vsel %vm374_vm0, %v335_v31, 0  ;;  %v1642_v56 = vand.u32 4294901760, %v544_v43  ;;  %v10974_v59 = vsub.f32 %v541_v0, %v1639_v5  ;;  %v336_v31 = vld [vmem:[%s10862_s15 + $0x1b0] sm:$0xff]  ;;  %v323_v45 = vld [vmem:[%s10862_s15 + $0x148] sm:$0xff] }
  0x24   : > { %14019 = vst [vmem:[#allocation29_spill] sm:$0xff] %v10963_v36  ;;  %14020 = vst [vmem:[#allocation30_spill] sm:$0xff] %v10969_v50  ;;  %9532 = vmatpush3.bf16.xpose.msra.mxu0 %v10961_v34  ;;  %v10977_v49 = vsub.f32 %v394_v15, %v586_v23  ;;  %v10979_v57 = vpack.c.bf16 %v643_v42, %v640_v37  ;;  %v1645_v60 = vand.u32 4294901760, %v547_v53  ;;  %v400_v1 = vsel %vm374_vm0, %v286_v44, 0  ;;  %v309_v18 = vld [vmem:[%s10862_s15 + $0xd8] sm:$0xff]  ;;  %v340_v17 = vld [vmem:[%s10862_s15 + $0x1d0] sm:$0xff] }
  0x25   : > { %14021 = vst [vmem:[#allocation31_spill] sm:$0xff] %v10971_v48  ;;  %14022 = vst [vmem:[#allocation32_spill] sm:$0xff] %v10974_v59  ;;  %v10984_v58 = vsub.f32 %v397_v19, %v589_v24  ;;  %v403_v13 = vsel %vm374_vm0, %v287_v47, 0  ;;  %v496_v0 = vsel %vm374_vm0, %v318_v46, 0  ;;  %v10990_v5 = vsub.f32 %v490_v20, %v1588_v28  ;;  %v337_v46 = vld [vmem:[%s10862_s15 + $0x1b8] sm:$0xff] }
  0x26   : > { %14023 = vst [vmem:[#allocation33_spill] sm:$0xff] %v10977_v49  ;;  %14024 = vst [vmem:[#allocation34_spill] sm:$0xff] %v10979_v57  ;;  %9724 = vmatpush3.bf16.xpose.msra.mxu1 %v10971_v48  ;;  %9534 = vmatprep.subr.bf16.mxu0 %v10979_v57  ;;  %v10993_v15 = vpack.c.bf16 %v1645_v60, %v1642_v56  ;;  %v592_v23 = vand.u32 4294901760, %v400_v1  ;;  %v595_v26 = vand.u32 4294901760, %v403_v13  ;;  %v499_v19 = vsel %vm374_vm0, %v319_v61, 0 }
  0x27   : > { %14025 = vst [vmem:[#allocation35_spill] sm:$0xff] %v10984_v58  ;;  %14026 = vst [vmem:[#allocation36_spill] sm:$0xff] %v10990_v5  ;;  %v1594_v24 = vand.u32 4294901760, %v496_v0  ;;  %v454_v44 = vsel %vm374_vm0, %v304_v6, 0  ;;  %v457_v47 = vsel %vm374_vm0, %v305_v8, 0  ;;  %v11000_v20 = vsub.f32 %v493_v27, %v1591_v35  ;;  %v288_v8 = vld [vmem:[%s10862_s15 + $0x30] sm:$0xff] }
  0x28   : > { %14027 = vst [vmem:[#allocation37_spill] sm:$0xff] %v10993_v15  ;;  %v11002_v28 = vsub.f32 %v448_v29, %v640_v37  ;;  %9726 = vmatprep.subr.bf16.mxu1 %v10993_v15  ;;  %v11005_v54 = vpack.c.bf16 %v595_v26, %v592_v23  ;;  %v1597_v48 = vand.u32 4294901760, %v499_v19  ;;  %v11007_v57 = vsub.f32 %v451_v30, %v643_v42  ;;  %v320_v27 = vld [vmem:[%s10862_s15 + $0x130] sm:$0xff] }
  0x29   : > { %14028 = vst [vmem:[#allocation38_spill] sm:$0xff] %v11000_v20  ;;  %v646_v61 = vand.u32 4294901760, %v454_v44  ;;  %v649_v34 = vand.u32 4294901760, %v457_v47  ;;  %v550_v6 = vsel %vm374_vm0, %v336_v31, 0  ;;  %v11013_v35 = vsub.f32 %v544_v43, %v1642_v56  ;;  %v306_v31 = vld [vmem:[%s10862_s15 + $0xc0] sm:$0xff] }
  0x2a   : > { %14029 = vst [vmem:[#allocation39_spill] sm:$0xff] %v11002_v28  ;;  %14030 = vst [vmem:[#allocation40_spill] sm:$0xff] %v11005_v54  ;;  %v11015_v29 = vpack.c.bf16 %v1597_v48, %v1594_v24  ;;  %v553_v37 = vsel %vm374_vm0, %v337_v46, 0  ;;  %v1648_v15 = vand.u32 4294901760, %v550_v6  ;;  %v11018_v63 = vsub.f32 %v547_v53, %v1645_v60 }
  0x2b   : > { %14031 = vst [vmem:[#allocation41_spill] sm:$0xff] %v11007_v57  ;;  %14032 = vst [vmem:[#allocation42_spill] sm:$0xff] %v11013_v35  ;;  %v11020_v30 = vsub.f32 %v400_v1, %v592_v23  ;;  %v11022_v42 = vpack.c.bf16 %v649_v34, %v646_v61  ;;  %v1651_v4 = vand.u32 4294901760, %v553_v37  ;;  %v11028_v43 = vsub.f32 %v403_v13, %v595_v26 }
  0x2c   : > { %14033 = vst [vmem:[#allocation43_spill] sm:$0xff] %v11015_v29  ;;  %14034 = vst [vmem:[#allocation44_spill] sm:$0xff] %v11018_v63  ;;  %9536 = vmatpush3.bf16.xpose.msra.mxu0 %v11005_v54  ;;  %v406_v56 = vsel %vm374_vm0, %v288_v8, 0  ;;  %v409_v46 = vsel %vm374_vm0, %v289_v22, 0  ;;  %v502_v53 = vsel %vm374_vm0, %v320_v27, 0  ;;  %v11033_v60 = vsub.f32 %v496_v0, %v1594_v24  ;;  %v339_v24 = vld [vmem:[%s10862_s15 + $0x1c8] sm:$0xff] }
  0x2d   : > { %14035 = vst [vmem:[#allocation45_spill] sm:$0xff] %v11020_v30  ;;  %14036 = vst [vmem:[#allocation46_spill] sm:$0xff] %v11022_v42  ;;  %9538 = vmatprep.subr.bf16.mxu0 %v11022_v42  ;;  %v11036_v1 = vpack.c.bf16 %v1651_v4, %v1648_v15  ;;  %v598_v23 = vand.u32 4294901760, %v406_v56  ;;  %v601_v38 = vand.u32 4294901760, %v409_v46  ;;  %v505_v13 = vsel %vm374_vm0, %v321_v52, 0 }
  0x2e   : > { %14037 = vst [vmem:[#allocation47_spill] sm:$0xff] %v11028_v43  ;;  %14038 = vst [vmem:[#allocation48_spill] sm:$0xff] %v11033_v60  ;;  %9728 = vmatpush3.bf16.xpose.msra.mxu1 %v11015_v29  ;;  %v1600_v26 = vand.u32 4294901760, %v502_v53  ;;  %v460_v22 = vsel %vm374_vm0, %v306_v31, 0  ;;  %v463_v0 = vsel %vm374_vm0, %v307_v41, 0  ;;  %v11044_v8 = vsub.f32 %v499_v19, %v1597_v48  ;;  %v290_v41 = vld [vmem:[%s10862_s15 + $0x40] sm:$0xff] }
  0x2f   : > { %14039 = vst [vmem:[#allocation49_spill] sm:$0xff] %v11036_v1  ;;  %v11046_v27 = vsub.f32 %v454_v44, %v646_v61  ;;  %v11048_v42 = vsub.f32 %v457_v47, %v649_v34  ;;  %9730 = vmatprep.subr.bf16.mxu1 %v11036_v1  ;;  %v1603_v54 = vand.u32 4294901760, %v505_v13  ;;  %v11051_v29 = vpack.c.bf16 %v601_v38, %v598_v23  ;;  %v322_v48 = vld [vmem:[%s10862_s15 + $0x140] sm:$0xff] }
  0x30   : > { %14040 = vst [vmem:[#allocation50_spill] sm:$0xff] %v11044_v8  ;;  %v652_v52 = vand.u32 4294901760, %v460_v22  ;;  %v655_v10 = vand.u32 4294901760, %v463_v0  ;;  %v556_v31 = vsel %vm374_vm0, %v338_v12, 0  ;;  %v11057_v19 = vsub.f32 %v550_v6, %v1648_v15  ;;  %v308_v12 = vld [vmem:[%s10862_s15 + $0xd0] sm:$0xff] }
  0x31   : > { %14041 = vst [vmem:[#allocation51_spill] sm:$0xff] %v11046_v27  ;;  %14042 = vst [vmem:[#allocation52_spill] sm:$0xff] %v11048_v42  ;;  %v11059_v44 = vsub.f32 %v553_v37, %v1651_v4  ;;  %v559_v34 = vsel %vm374_vm0, %v339_v24, 0  ;;  %v1654_v47 = vand.u32 4294901760, %v556_v31  ;;  %v11062_v61 = vsub.f32 %v406_v56, %v598_v23 }
  0x32   : > { %14043 = vst [vmem:[#allocation53_spill] sm:$0xff] %v11051_v29  ;;  %14044 = vst [vmem:[#allocation54_spill] sm:$0xff] %v11057_v19  ;;  %v11064_v1 = vpack.c.bf16 %v1603_v54, %v1600_v26  ;;  %v11066_v7 = vpack.c.bf16 %v655_v10, %v652_v52  ;;  %v1657_v25 = vand.u32 4294901760, %v559_v34  ;;  %v11071_v40 = vsub.f32 %v409_v46, %v601_v38 }
  0x33   : > { %14045 = vst [vmem:[#allocation55_spill] sm:$0xff] %v11059_v44  ;;  %14046 = vst [vmem:[#allocation56_spill] sm:$0xff] %v11062_v61  ;;  %v412_v4 = vsel %vm374_vm0, %v290_v41, 0  ;;  %v415_v15 = vsel %vm374_vm0, %v291_v9, 0  ;;  %v508_v6 = vsel %vm374_vm0, %v322_v48, 0  ;;  %v11077_v37 = vsub.f32 %v502_v53, %v1600_v26  ;;  %v341_v53 = vld [vmem:[%s10862_s15 + $0x1d8] sm:$0xff] }
  0x34   : > { %14047 = vst [vmem:[#allocation57_spill] sm:$0xff] %v11064_v1  ;;  %14048 = vst [vmem:[#allocation58_spill] sm:$0xff] %v11066_v7  ;;  %9540 = vmatpush3.bf16.xpose.msra.mxu0 %v11051_v29  ;;  %v11079_v56 = vpack.c.bf16 %v1657_v25, %v1654_v47  ;;  %v604_v23 = vand.u32 4294901760, %v412_v4  ;;  %v607_v24 = vand.u32 4294901760, %v415_v15  ;;  %v11082_v39 = vsub.f32 %v505_v13, %v1603_v54  ;;  %v293_v29 = vld [vmem:[%s10862_s15 + $0x58] sm:$0xff] }
  0x35   : > { %14049 = vst [vmem:[#allocation59_spill] sm:$0xff] %v11071_v40  ;;  %14050 = vst [vmem:[#allocation60_spill] sm:$0xff] %v11077_v37  ;;  %9542 = vmatprep.subr.bf16.mxu0 %v11066_v7  ;;  %v511_v38 = vsel %vm374_vm0, %v323_v45, 0  ;;  %v466_v9 = vsel %vm374_vm0, %v308_v12, 0  ;;  %v469_v46 = vsel %vm374_vm0, %v309_v18, 0  ;;  %v11090_v26 = vsub.f32 %v460_v22, %v652_v52  ;;  %v292_v7 = vld [vmem:[%s10862_s15 + $0x50] sm:$0xff] }
  0x36   : > { %14051 = vst [vmem:[#allocation61_spill] sm:$0xff] %v11079_v56  ;;  %14052 = vst [vmem:[#allocation62_spill] sm:$0xff] %v11082_v39  ;;  %9732 = vmatpush3.bf16.xpose.msra.mxu1 %v11064_v1  ;;  %v11092_v41 = vsub.f32 %v463_v0, %v655_v10  ;;  %v1606_v54 = vand.u32 4294901760, %v508_v6  ;;  %v1609_v13 = vand.u32 4294901760, %v511_v38  ;;  %v11095_v48 = vsub.f32 %v556_v31, %v1654_v47  ;;  %v324_v1 = vld [vmem:[%s10862_s15 + $0x150] sm:$0xff]  ;;  %v297_v37 = vld [vmem:[%s10862_s15 + $0x78] sm:$0xff] }
  0x37   : > { %14053 = vst [vmem:[#allocation63_spill] sm:$0xff] %v11090_v26  ;;  %9734 = vmatprep.subr.bf16.mxu1 %v11079_v56  ;;  %v658_v45 = vand.u32 4294901760, %v466_v9  ;;  %v661_v12 = vand.u32 4294901760, %v469_v46  ;;  %v562_v18 = vsel %vm374_vm0, %v340_v17, 0  ;;  %v11101_v22 = vsub.f32 %v559_v34, %v1657_v25  ;;  %v310_v17 = vld [vmem:[%s10862_s15 + $0xe0] sm:$0xff]  ;;  %v311_v26 = vld [vmem:[%s10862_s15 + $0xe8] sm:$0xff] }
  0x38   : > { %14054 = vst [vmem:[#allocation64_spill] sm:$0xff] %v11092_v41  ;;  %14055 = vst [vmem:[#allocation65_spill] sm:$0xff] %v11095_v48  ;;  %v11103_v10 = vpack.c.bf16 %v607_v24, %v604_v23  ;;  %v565_v0 = vsel %vm374_vm0, %v341_v53, 0  ;;  %v1660_v52 = vand.u32 4294901760, %v562_v18  ;;  %v11106_v56 = vsub.f32 %v412_v4, %v604_v23  ;;  %v325_v41 = vld [vmem:[%s10862_s15 + $0x158] sm:$0xff] }
  0x39   : > { %14056 = vst [vmem:[#allocation66_spill] sm:$0xff] %v11101_v22  ;;  %v11108_v31 = vsub.f32 %v415_v15, %v607_v24  ;;  %v11110_v47 = vpack.c.bf16 %v661_v12, %v658_v45  ;;  %v1663_v48 = vand.u32 4294901760, %v565_v0  ;;  %v11115_v39 = vpack.c.bf16 %v1609_v13, %v1606_v54  ;;  %v342_v24 = vld [vmem:[%s10862_s15 + $0x1e0] sm:$0xff] }
  0x3a   : > { %14057 = vst [vmem:[#allocation67_spill] sm:$0xff] %v11103_v10  ;;  %14058 = vst [vmem:[#allocation68_spill] sm:$0xff] %v11106_v56  ;;  %v418_v25 = vsel %vm374_vm0, %v292_v7, 0  ;;  %v421_v34 = vsel %vm374_vm0, %v293_v29, 0  ;;  %v514_v53 = vsel %vm374_vm0, %v324_v1, 0  ;;  %v11120_v22 = vsub.f32 %v508_v6, %v1606_v54  ;;  %v343_v1 = vld [vmem:[%s10862_s15 + $0x1e8] sm:$0xff] }
  0x3b   : > { %14059 = vst [vmem:[#allocation69_spill] sm:$0xff] %v11108_v31  ;;  %14060 = vst [vmem:[#allocation70_spill] sm:$0xff] %v11110_v47  ;;  %v11122_v4 = vpack.c.bf16 %v1663_v48, %v1660_v52  ;;  %v610_v15 = vand.u32 4294901760, %v418_v25  ;;  %v613_v23 = vand.u32 4294901760, %v421_v34  ;;  %v11126_v31 = vsub.f32 %v511_v38, %v1609_v13  ;;  %v294_v38 = vld [vmem:[%s10862_s15 + $0x60] sm:$0xff] }
  0x3c   : > { %14061 = vst [vmem:[#allocation71_spill] sm:$0xff] %v11115_v39  ;;  %14062 = vst [vmem:[#allocation72_spill] sm:$0xff] %v11120_v22  ;;  %9544 = vmatpush3.bf16.xpose.msra.mxu0 %v11103_v10  ;;  %v517_v56 = vsel %vm374_vm0, %v325_v41, 0  ;;  %v472_v7 = vsel %vm374_vm0, %v310_v17, 0  ;;  %v475_v29 = vsel %vm374_vm0, %v311_v26, 0  ;;  %v11133_v6 = vsub.f32 %v466_v9, %v658_v45 }
  0x3d   : > { %14063 = vst [vmem:[#allocation73_spill] sm:$0xff] %v11122_v4  ;;  %14064 = vst [vmem:[#allocation74_spill] sm:$0xff] %v11126_v31  ;;  %9546 = vmatprep.subr.bf16.mxu0 %v11110_v47  ;;  %v11135_v54 = vsub.f32 %v469_v46, %v661_v12  ;;  %v11137_v22 = vsub.f32 %v562_v18, %v1660_v52  ;;  %v1612_v10 = vand.u32 4294901760, %v514_v53  ;;  %v1615_v41 = vand.u32 4294901760, %v517_v56  ;;  %v295_v31 = vld [vmem:[%s10862_s15 + $0x68] sm:$0xff]  ;;  %v326_v47 = vld [vmem:[%s10862_s15 + $0x160] sm:$0xff] }
  0x3e   : > { %14065 = vst [vmem:[#allocation75_spill] sm:$0xff] %v11133_v6  ;;  %9736 = vmatpush3.bf16.xpose.msra.mxu1 %v11115_v39  ;;  %v664_v13 = vand.u32 4294901760, %v472_v7  ;;  %v667_v17 = vand.u32 4294901760, %v475_v29  ;;  %v568_v26 = vsel %vm374_vm0, %v342_v24, 0  ;;  %v11145_v9 = vsub.f32 %v565_v0, %v1663_v48  ;;  %v327_v24 = vld [vmem:[%s10862_s15 + $0x168] sm:$0xff]  ;;  %v313_v6 = vld [vmem:[%s10862_s15 + $0xf8] sm:$0xff] }
  0x3f   : > { %14066 = vst [vmem:[#allocation76_spill] sm:$0xff] %v11135_v54  ;;  %14067 = vst [vmem:[#allocation77_spill] sm:$0xff] %v11137_v22  ;;  %9738 = vmatprep.subr.bf16.mxu1 %v11122_v4  ;;  %v11147_v46 = vpack.c.bf16 %v613_v23, %v610_v15  ;;  %v571_v45 = vsel %vm374_vm0, %v343_v1, 0  ;;  %v1666_v12 = vand.u32 4294901760, %v568_v26  ;;  %v11150_v18 = vsub.f32 %v418_v25, %v610_v15  ;;  %v312_v54 = vld [vmem:[%s10862_s15 + $0xf0] sm:$0xff] }
  0x40   : > { %14068 = vst [vmem:[#allocation78_spill] sm:$0xff] %v11145_v9  ;;  %v11152_v52 = vsub.f32 %v421_v34, %v613_v23  ;;  %v11154_v39 = vsub.f32 %v514_v53, %v1612_v10  ;;  %v1669_v22 = vand.u32 4294901760, %v571_v45  ;;  %v11159_v4 = vpack.c.bf16 %v667_v17, %v664_v13  ;;  %v344_v15 = vld [vmem:[%s10862_s15 + $0x1f0] sm:$0xff] }
  0x41   : > { %14069 = vst [vmem:[#allocation79_spill] sm:$0xff] %v11147_v46  ;;  %14070 = vst [vmem:[#allocation80_spill] sm:$0xff] %v11150_v18  ;;  %v424_v48 = vsel %vm374_vm0, %v294_v38, 0  ;;  %v427_v0 = vsel %vm374_vm0, %v295_v31, 0  ;;  %v520_v1 = vsel %vm374_vm0, %v326_v47, 0  ;;  %v11164_v9 = vpack.c.bf16 %v1615_v41, %v1612_v10  ;;  %v345_v31 = vld [vmem:[%s10862_s15 + $0x1f8] sm:$0xff] }
  0x42   : > { %14071 = vst [vmem:[#allocation81_spill] sm:$0xff] %v11152_v52  ;;  %14072 = vst [vmem:[#allocation82_spill] sm:$0xff] %v11154_v39  ;;  %v11166_v25 = vsub.f32 %v517_v56, %v1615_v41  ;;  %v616_v34 = vand.u32 4294901760, %v424_v48  ;;  %v619_v53 = vand.u32 4294901760, %v427_v0  ;;  %v11169_v23 = vpack.c.bf16 %v1669_v22, %v1666_v12 }
  0x43   : > { %14073 = vst [vmem:[#allocation83_spill] sm:$0xff] %v11159_v4  ;;  %14074 = vst [vmem:[#allocation84_spill] sm:$0xff] %v11164_v9  ;;  %v523_v39 = vsel %vm374_vm0, %v327_v24, 0  ;;  %v478_v52 = vsel %vm374_vm0, %v312_v54, 0  ;;  %v481_v38 = vsel %vm374_vm0, %v313_v6, 0  ;;  %v11176_v10 = vsub.f32 %v472_v7, %v664_v13  ;;  %v296_v6 = vld [vmem:[%s10862_s15 + $0x70] sm:$0xff] }
  0x44   : > { %14075 = vst [vmem:[#allocation85_spill] sm:$0xff] %v11166_v25  ;;  %14076 = vst [vmem:[#allocation86_spill] sm:$0xff] %v11169_v23  ;;  %9548 = vmatpush3.bf16.xpose.msra.mxu0 %v11147_v46  ;;  %v11178_v56 = vsub.f32 %v475_v29, %v667_v17  ;;  %v1618_v47 = vand.u32 4294901760, %v520_v1  ;;  %v1621_v41 = vand.u32 4294901760, %v523_v39  ;;  %v11181_v25 = vsub.f32 %v568_v26, %v1666_v12 }
  0x45   : > { %9550 = vmatprep.subr.bf16.mxu0 %v11159_v4  ;;  %v670_v18 = vand.u32 4294901760, %v478_v52  ;;  %v673_v24 = vand.u32 4294901760, %v481_v38  ;;  %v574_v54 = vsel %vm374_vm0, %v344_v15, 0  ;;  %v11187_v7 = vsub.f32 %v571_v45, %v1669_v22  ;;  %v328_v4 = vld [vmem:[%s10862_s15 + $0x170] sm:$0xff] }
  0x46   : > { %14077 = vst [vmem:[#allocation87_spill] sm:$0xff] %v11178_v56  ;;  %14078 = vst [vmem:[#allocation88_spill] sm:$0xff] %v11181_v25  ;;  %9740 = vmatpush3.bf16.xpose.msra.mxu1 %v11164_v9  ;;  %v11189_v13 = vpack.c.bf16 %v619_v53, %v616_v34  ;;  %v11191_v29 = vsub.f32 %v424_v48, %v616_v34  ;;  %v577_v17 = vsel %vm374_vm0, %v345_v31, 0  ;;  %v1672_v15 = vand.u32 4294901760, %v574_v54  ;;  %v329_v25 = vld [vmem:[%s10862_s15 + $0x178] sm:$0xff] }
  0x47   : > { %14079 = vst [vmem:[#allocation89_spill] sm:$0xff] %v11187_v7  ;;  %9742 = vmatprep.subr.bf16.mxu1 %v11169_v23  ;;  %v11196_v26 = vsub.f32 %v427_v0, %v619_v53  ;;  %v11198_v12 = vsub.f32 %v520_v1, %v1618_v47  ;;  %v1675_v46 = vand.u32 4294901760, %v577_v17  ;;  %v11201_v56 = vpack.c.bf16 %v1621_v41, %v1618_v47 }
  0x48   : > { %14080 = vst [vmem:[#allocation90_spill] sm:$0xff] %v11189_v13  ;;  %14081 = vst [vmem:[#allocation91_spill] sm:$0xff] %v11191_v29  ;;  %v11203_v22 = vsub.f32 %v523_v39, %v1621_v41  ;;  %v430_v45 = vsel %vm374_vm0, %v296_v6, 0  ;;  %v11207_v48 = vsel %vm374_vm0, %v297_v37, 0  ;;  %v11209_v34 = vpack.c.bf16 %v673_v24, %v670_v18 }
  0x49   : > { %14082 = vst [vmem:[#allocation92_spill] sm:$0xff] %v11196_v26  ;;  %14083 = vst [vmem:[#allocation93_spill] sm:$0xff] %v11201_v56  ;;  %v622_v31 = vand.u32 4294901760, %v430_v45  ;;  %v11213_v1 = vsel %vm374_vm0, %v328_v4, 0  ;;  %v11215_v53 = vsub.f32 %v478_v52, %v670_v18  ;;  %v11218_v47 = vsel %vm374_vm0, %v329_v25, 0 }
  0x4a   : > { %14084 = vst [vmem:[#allocation94_spill] sm:$0xff] %v11209_v34  ;;  %v14085_v39 = vsub.f32 %v10852_v11, %v10868_v16  ;;  %v13722_v37 = vand.u32 4294901760, %v10912_v51  ;;  %v11226_v6 = vsub.f32 %v481_v38, %v673_v24  ;;  %v11228_v23 = vpack.c.bf16 %v1675_v46, %v1672_v15 }
  0x4b   : > { %v11230_v0 = vsub.f32 %v574_v54, %v1672_v15  ;;  %v11232_v4 = vsub.f32 %v577_v17, %v1675_v46  ;;  %v13725_v25 = vand.u32 4294901760, %v10919_v55  ;;  %v13730_v38 = vand.u32 4294901760, %v10925_v62 }
  0x4c   : > { %v11223_v41 = vand.u32 4294901760, %v14085_v39  ;;  %14086 = vst [vmem:[#allocation95_spill] sm:$0xff] %v11228_v23  ;;  %9552 = vmatpush3.bf16.xpose.msra.mxu0 %v11189_v13  ;;  %v836_v52 = vsub.f32 %v10912_v51, %v13722_v37  ;;  %v14087_v24 = vand.u32 4294901760, %v11207_v48  ;;  %v13737_v17 = vand.u32 4294901760, %v10931_v2 }
  0x4d   : > { %9554 = vmatprep.subr.bf16.mxu0 %v11209_v34  ;;  %v13738_v15 = vand.u32 4294901760, %v10933_v3  ;;  %v843_v37 = vsub.f32 %v10919_v55, %v13725_v25  ;;  %v13741_v18 = vand.u32 4294901760, %v10940_v14  ;;  %v13747_v25 = vand.u32 4294901760, %v10956_v32 }
  0x4e   : > { %8045 = vmatprep.mubr.f32.mxu0 %v11223_v41  ;;  %v11245_v46 = vpack.c.bf16 %v14087_v24, %v622_v31  ;;  %8285 = vmatprep.mubr.f32.mxu1 %v11223_v41  ;;  %v837_v39 = vand.u32 4294901760, %v836_v52  ;;  %v1838_v24 = vsub.f32 %v10925_v62, %v13730_v38  ;;  %v1845_v54 = vsub.f32 %v10931_v2, %v13737_v17 }
  0x4f   : > { %9744 = vmatpush3.bf16.xpose.msra.mxu1 %v11201_v56  ;;  %v724_v52 = vsub.f32 %v10933_v3, %v13738_v15  ;;  %v13744_v56 = vand.u32 4294901760, %v10946_v21  ;;  %v844_v34 = vand.u32 4294901760, %v843_v37  ;;  %v731_v38 = vsub.f32 %v10940_v14, %v13741_v18 }
  0x50   : > { %14088 = vst [vmem:[#allocation96_spill] sm:$0xff] %v11245_v46  ;;  %9746 = vmatprep.subr.bf16.mxu1 %v11228_v23  ;;  %v1839_v13 = vand.u32 4294901760, %v1838_v24  ;;  %v13752_v23 = vand.u32 4294901760, %v10958_v33  ;;  %v11272_v9 = vsub.f32 %v430_v45, %v622_v31  ;;  %v1846_v16 = vand.u32 4294901760, %v1845_v54 }
  0x51   : > { %v1726_v17 = vsub.f32 %v10946_v21, %v13744_v56  ;;  %v1733_v15 = vsub.f32 %v10956_v32, %v13747_v25  ;;  %v14089_v37 = vand.u32 4294901760, %v11213_v1  ;;  %v14090_v24 = vand.u32 4294901760, %v11218_v47 }
  0x52   : > { %v9557_v18 = vpack.c.bf16 %v844_v34, %v837_v39  ;;  %v850_v45 = vsub.f32 %v10958_v33, %v13752_v23  ;;  %v13751_v31 = vand.u32 4294901760, %v10963_v36  ;;  %v9749_v54 = vpack.c.bf16 %v1846_v16, %v1839_v13 }
  0x53   : > { %v11284_v11 = vpack.c.bf16 %v14090_v24, %v14089_v37  ;;  %v725_v14 = vand.u32 4294901760, %v724_v52  ;;  %v732_v56 = vand.u32 4294901760, %v731_v38  ;;  %v13750_v21 = vand.u32 4294901760, %v10969_v50 }
  0x54   : > { %9556 = vmatpush3.bf16.xpose.msra.mxu0 %v11245_v46  ;;  %v1727_v25 = vand.u32 4294901760, %v1726_v17  ;;  %v1734_v32 = vand.u32 4294901760, %v1733_v15  ;;  %v857_v37 = vsub.f32 %v10963_v36, %v13751_v31  ;;  %v13753_v34 = vand.u32 4294901760, %v10974_v59 }
  0x55   : > { %14091 = vst [vmem:[#allocation97_spill] sm:$0xff] %v11284_v11  ;;  %9558 = vmatprep.subr.bf16.mxu0 %v9557_v18  ;;  %v851_v39 = vand.u32 4294901760, %v850_v45  ;;  %v1852_v16 = vsub.f32 %v10969_v50, %v13750_v21  ;;  %v13756_v13 = vand.u32 4294901760, %v10977_v49  ;;  %v13757_v38 = vand.u32 4294901760, %v10984_v58 }
  0x56   : > { %v858_v17 = vand.u32 4294901760, %v857_v37  ;;  %v1859_v15 = vsub.f32 %v10974_v59, %v13753_v34  ;;  %v13762_v52 = vand.u32 4294901760, %v10990_v5  ;;  %v13765_v18 = vand.u32 4294901760, %v11000_v20 }
  0x57   : > { %9748 = vmatpush3.bf16.xpose.msra.mxu1 %v11284_v11  ;;  %v1853_v24 = vand.u32 4294901760, %v1852_v16  ;;  %v738_v45 = vsub.f32 %v10977_v49, %v13756_v13  ;;  %v745_v21 = vsub.f32 %v10984_v58, %v13757_v38  ;;  %v13769_v37 = vand.u32 4294901760, %v11002_v28 }
  0x58   : > { %9750 = vmatprep.subr.bf16.mxu1 %v9749_v54  ;;  %v9559_v31 = vpack.c.bf16 %v732_v56, %v725_v14  ;;  %v1860_v23 = vand.u32 4294901760, %v1859_v15  ;;  %v1740_v34 = vsub.f32 %v10990_v5, %v13762_v52  ;;  %v1747_v54 = vsub.f32 %v11000_v20, %v13765_v18 }
  0x59   : > { %v9751_v16 = vpack.c.bf16 %v1734_v32, %v1727_v25  ;;  %v9561_v11 = vpack.c.bf16 %v858_v17, %v851_v39  ;;  %v864_v13 = vsub.f32 %v11002_v28, %v13769_v37  ;;  %v13768_v38 = vand.u32 4294901760, %v11007_v57 }
  0x5a   : > { %v9753_v46 = vpack.c.bf16 %v1860_v23, %v1853_v24  ;;  %v739_v58 = vand.u32 4294901760, %v738_v45  ;;  %v746_v14 = vand.u32 4294901760, %v745_v21  ;;  %v13763_v56 = vand.u32 4294901760, %v11013_v35 }
  0x5b   : > { %8046 = vmatmul.mubr.f32.vlgmr.msra.gmra.mrb[0].mxu0 %v11223_v41  ;;  %v1741_v15 = vand.u32 4294901760, %v1740_v34  ;;  %v1748_v52 = vand.u32 4294901760, %v1747_v54  ;;  %v871_v32 = vsub.f32 %v11007_v57, %v13768_v38  ;;  %v13764_v25 = vand.u32 4294901760, %v11018_v63 }
  0x5c   : > { %9560 = vmatpush3.bf16.xpose.msra.mxu0 %v9559_v31  ;;  %v865_v39 = vand.u32 4294901760, %v864_v13  ;;  %v1866_v23 = vsub.f32 %v11013_v35, %v13763_v56  ;;  %v13766_v21 = vand.u32 4294901760, %v11020_v30  ;;  %v13767_v17 = vand.u32 4294901760, %v11028_v43 }
  0x5d   : > { %9562 = vmatprep.subr.bf16.mxu0 %v9561_v11  ;;  %v872_v34 = vand.u32 4294901760, %v871_v32  ;;  %v1873_v24 = vsub.f32 %v11018_v63, %v13764_v25  ;;  %v13770_v45 = vand.u32 4294901760, %v11033_v60  ;;  %v13771_v31 = vand.u32 4294901760, %v11044_v8 }
  0x5e   : > { %8286 = vmatmul.mubr.f32.vlgmr.msra.gmra.mrb[0].mxu1 %v11223_v41  ;;  %v1867_v13 = vand.u32 4294901760, %v1866_v23  ;;  %v752_v54 = vsub.f32 %v11020_v30, %v13766_v21  ;;  %v759_v41 = vsub.f32 %v11028_v43, %v13767_v17  ;;  %v13774_v11 = vand.u32 4294901760, %v11046_v27 }
  0x5f   : > { %9752 = vmatpush3.bf16.xpose.msra.mxu1 %v9751_v16  ;;  %v9563_v32 = vpack.c.bf16 %v746_v14, %v739_v58  ;;  %v1874_v56 = vand.u32 4294901760, %v1873_v24  ;;  %v1754_v25 = vsub.f32 %v11033_v60, %v13770_v45  ;;  %v1761_v16 = vsub.f32 %v11044_v8, %v13771_v31 }
  0x60   : > { %9754 = vmatprep.subr.bf16.mxu1 %v9753_v46  ;;  %v9755_v23 = vpack.c.bf16 %v1748_v52, %v1741_v15  ;;  %v9565_v18 = vpack.c.bf16 %v872_v34, %v865_v39  ;;  %v878_v21 = vsub.f32 %v11046_v27, %v13774_v11  ;;  %v13773_v17 = vand.u32 4294901760, %v11048_v42 }
  0x61   : > { %v9757_v38 = vpack.c.bf16 %v1874_v56, %v1867_v13  ;;  %v753_v46 = vand.u32 4294901760, %v752_v54  ;;  %v760_v58 = vand.u32 4294901760, %v759_v41  ;;  %v13772_v14 = vand.u32 4294901760, %v11057_v19  ;;  %v14092_v54 = vld [vmem:[#allocation60_spill] sm:$0xff] }
  0x62   : > { %v1755_v24 = vand.u32 4294901760, %v1754_v25  ;;  %v1762_v37 = vand.u32 4294901760, %v1761_v16  ;;  %v885_v45 = vsub.f32 %v11048_v42, %v13773_v17  ;;  %v13775_v52 = vand.u32 4294901760, %v11059_v44  ;;  %v14093_v16 = vld [vmem:[#allocation62_spill] sm:$0xff]  ;;  %v14110_v42 = vld [vmem:[#allocation76_spill] sm:$0xff] }
  0x63   : > { %v879_v15 = vand.u32 4294901760, %v878_v21  ;;  %v1880_v39 = vsub.f32 %v11057_v19, %v13772_v14  ;;  %v13776_v34 = vand.u32 4294901760, %v11062_v61  ;;  %v13779_v56 = vand.u32 4294901760, %v11071_v40 }
  0x64   : > { %9564 = vmatpush3.bf16.xpose.msra.mxu0 %v9563_v32  ;;  %v886_v13 = vand.u32 4294901760, %v885_v45  ;;  %v1887_v25 = vsub.f32 %v11059_v44, %v13775_v52  ;;  %v14094_v32 = vld [vmem:[#allocation63_spill] sm:$0xff]  ;;  %v14095_v11 = vand.u32 4294901760, %v11207_v48  ;;  %v14096_v41 = vand.u32 4294901760, %v11213_v1 }
  0x65   : > { %9566 = vmatprep.subr.bf16.mxu0 %v9565_v18  ;;  %v1881_v21 = vand.u32 4294901760, %v1880_v39  ;;  %v766_v14 = vsub.f32 %v11062_v61, %v13776_v34  ;;  %v773_v17 = vsub.f32 %v11071_v40, %v13779_v56  ;;  %v13786_v45 = vand.u32 4294901760, %v14094_v32  ;;  %v14097_v40 = vld [vmem:[#allocation64_spill] sm:$0xff] }
  0x66   : > { %v11383_v52 = vsub.f32 %v11207_v48, %v14095_v11  ;;  %v11388_v18 = vsub.f32 %v11213_v1, %v14096_v41  ;;  %v9567_v39 = vpack.c.bf16 %v760_v58, %v753_v46  ;;  %v1888_v31 = vand.u32 4294901760, %v1887_v25  ;;  %v14100_v46 = vld [vmem:[#allocation65_spill] sm:$0xff]  ;;  %v14102_v41 = vld [vmem:[#allocation68_spill] sm:$0xff] }
  0x67   : > { %9756 = vmatpush3.bf16.xpose.msra.mxu1 %v9755_v23  ;;  %v9759_v34 = vpack.c.bf16 %v1762_v37, %v1755_v24  ;;  %v9569_v61 = vpack.c.bf16 %v886_v13, %v879_v15  ;;  %v892_v56 = vsub.f32 %v14094_v32, %v13786_v45  ;;  %v13789_v44 = vand.u32 4294901760, %v14097_v40  ;;  %v14101_v15 = vld [vmem:[#allocation66_spill] sm:$0xff]  ;;  %v14103_v45 = vld [vmem:[#allocation69_spill] sm:$0xff] }
  0x68   : > { %9758 = vmatprep.subr.bf16.mxu1 %v9757_v38  ;;  %v767_v19 = vand.u32 4294901760, %v766_v14  ;;  %v14098_v48 = vand.u32 4294901760, %v14092_v54  ;;  %v14099_v1 = vand.u32 4294901760, %v14093_v16  ;;  %v13791_v58 = vand.u32 4294901760, %v14100_v46 }
  0x69   : > { %v9761_v38 = vpack.c.bf16 %v1888_v31, %v1881_v21  ;;  %v774_v37 = vand.u32 4294901760, %v773_v17  ;;  %v899_v24 = vsub.f32 %v14097_v40, %v13789_v44  ;;  %v13793_v13 = vand.u32 4294901760, %v14101_v15  ;;  %v14104_v31 = vld [vmem:[#allocation72_spill] sm:$0xff] }
  0x6a   : > { %v1768_v11 = vsub.f32 %v14092_v54, %v14098_v48  ;;  %v1775_v23 = vsub.f32 %v14093_v16, %v14099_v1  ;;  %v893_v25 = vand.u32 4294901760, %v892_v56  ;;  %v1894_v14 = vsub.f32 %v14100_v46, %v13791_v58  ;;  %v14105_v16 = vld [vmem:[#allocation74_spill] sm:$0xff]  ;;  %v14107_v46 = vld [vmem:[#allocation75_spill] sm:$0xff] }
  0x6b   : > { %v13796_v48 = vand.u32 4294901760, %v14102_v41  ;;  %v13802_v32 = vand.u32 4294901760, %v14103_v45  ;;  %v900_v1 = vand.u32 4294901760, %v899_v24  ;;  %v1901_v17 = vsub.f32 %v14101_v15, %v13793_v13 }
  0x6c   : > { %v14106_v40 = vand.u32 4294901760, %v11218_v47  ;;  %9568 = vmatpush3.bf16.xpose.msra.mxu0 %v9567_v39  ;;  %v1769_v21 = vand.u32 4294901760, %v1768_v11  ;;  %v1776_v15 = vand.u32 4294901760, %v1775_v23  ;;  %v14108_v44 = vand.u32 4294901760, %v14104_v31  ;;  %v14111_v11 = vld [vmem:[#allocation77_spill] sm:$0xff] }
  0x6d   : > { %v780_v58 = vsub.f32 %v14102_v41, %v13796_v48  ;;  %v787_v24 = vsub.f32 %v14103_v45, %v13802_v32  ;;  %9570 = vmatprep.subr.bf16.mxu0 %v9569_v61  ;;  %v9571_v39 = vpack.c.bf16 %v774_v37, %v767_v19  ;;  %v9573_v48 = vpack.c.bf16 %v900_v1, %v893_v25  ;;  %v14113_v19 = vld [vmem:[#allocation78_spill] sm:$0xff]  ;;  %v14115_v1 = vld [vmem:[#allocation81_spill] sm:$0xff] }
  0x6e   : > { %v11418_v56 = vsub.f32 %v11218_v47, %v14106_v40  ;;  %v1782_v54 = vsub.f32 %v14104_v31, %v14108_v44  ;;  %v14109_v40 = vand.u32 4294901760, %v14105_v16  ;;  %v1895_v41 = vand.u32 4294901760, %v1894_v14 }
  0x6f   : > { %9760 = vmatpush3.bf16.xpose.msra.mxu1 %v9759_v34  ;;  %v13807_v27 = vand.u32 4294901760, %v14110_v42  ;;  %v1902_v32 = vand.u32 4294901760, %v1901_v17  ;;  %v781_v13 = vand.u32 4294901760, %v780_v58  ;;  %v788_v61 = vand.u32 4294901760, %v787_v24  ;;  %v14114_v58 = vld [vmem:[#allocation80_spill] sm:$0xff]  ;;  %v14116_v24 = vld [vmem:[#allocation82_spill] sm:$0xff] }
  0x70   : > { %v1789_v47 = vsub.f32 %v14105_v16, %v14109_v40  ;;  %9762 = vmatprep.subr.bf16.mxu1 %v9761_v38  ;;  %v13809_v23 = vand.u32 4294901760, %v14111_v11  ;;  %v1783_v45 = vand.u32 4294901760, %v1782_v54  ;;  %v14112_v8 = vand.u32 4294901760, %v14107_v46 }
  0x71   : > { %v913_v34 = vsub.f32 %v14110_v42, %v13807_v27  ;;  %v13811_v37 = vand.u32 4294901760, %v14113_v19  ;;  %v13812_v14 = vand.u32 4294901760, %v14114_v58  ;;  %v13816_v17 = vand.u32 4294901760, %v14115_v1 }
  0x72   : > { %v906_v44 = vsub.f32 %v14107_v46, %v14112_v8  ;;  %v1790_v25 = vand.u32 4294901760, %v1789_v47  ;;  %v1908_v38 = vsub.f32 %v14111_v11, %v13809_v23  ;;  %v9763_v54 = vpack.c.bf16 %v1776_v15, %v1769_v21  ;;  %v14117_v46 = vld [vmem:[#allocation85_spill] sm:$0xff] }
  0x73   : > { %v1915_v8 = vsub.f32 %v14113_v19, %v13811_v37  ;;  %v13819_v40 = vand.u32 4294901760, %v14116_v24  ;;  %v13822_v27 = vand.u32 4294901760, %v14117_v46  ;;  %v9765_v42 = vpack.c.bf16 %v1902_v32, %v1895_v41  ;;  %v14118_v19 = vld [vmem:[#allocation87_spill] sm:$0xff] }
  0x74   : > { %v794_v47 = vsub.f32 %v14114_v58, %v13812_v14  ;;  %v801_v23 = vsub.f32 %v14115_v1, %v13816_v17  ;;  %9572 = vmatpush3.bf16.xpose.msra.mxu0 %v9571_v39  ;;  %v907_v15 = vand.u32 4294901760, %v906_v44  ;;  %v914_v21 = vand.u32 4294901760, %v913_v34  ;;  %v14119_v44 = vld [vmem:[#allocation88_spill] sm:$0xff] }
  0x75   : > { %v1796_v37 = vsub.f32 %v14116_v24, %v13819_v40  ;;  %v1803_v32 = vsub.f32 %v14117_v46, %v13822_v27  ;;  %9574 = vmatprep.subr.bf16.mxu0 %v9573_v48  ;;  %v9575_v41 = vpack.c.bf16 %v788_v61, %v781_v13  ;;  %v9767_v14 = vpack.c.bf16 %v1790_v25, %v1783_v45 }
  0x76   : > { %v1909_v58 = vand.u32 4294901760, %v1908_v38  ;;  %v13825_v16 = vand.u32 4294901760, %v14118_v19  ;;  %v1916_v17 = vand.u32 4294901760, %v1915_v8  ;;  %v795_v11 = vand.u32 4294901760, %v794_v47  ;;  %v14121_v47 = vld [vmem:[#allocation12_spill] sm:$0xff] }
  0x77   : > { %9764 = vmatpush3.bf16.xpose.msra.mxu1 %v9763_v54  ;;  %v802_v39 = vand.u32 4294901760, %v801_v23  ;;  %v13821_v34 = vand.u32 4294901760, %v14119_v44  ;;  %v1797_v1 = vand.u32 4294901760, %v1796_v37  ;;  %v1804_v31 = vand.u32 4294901760, %v1803_v32 }
  0x78   : > { %9766 = vmatprep.subr.bf16.mxu1 %v9765_v42  ;;  %v14120_v40 = vand.u32 4294901760, %v11176_v10  ;;  %v13823_v48 = vand.u32 4294901760, %v11187_v7  ;;  %v9577_v13 = vpack.c.bf16 %v914_v21, %v907_v15  ;;  %v927_v45 = vsub.f32 %v14118_v19, %v13825_v16  ;;  %v14122_v15 = vld [vmem:[#allocation8_spill] sm:$0xff]  ;;  %v14123_v16 = vld [vmem:[#allocation13_spill] sm:$0xff] }
  0x79   : > { %v13824_v61 = vand.u32 4294901760, %v11191_v29  ;;  %v13828_v23 = vand.u32 4294901760, %v11196_v26  ;;  %v1922_v42 = vsub.f32 %v14119_v44, %v13821_v34  ;;  %v13832_v25 = vand.u32 4294901760, %v11198_v12 }
  0x7a   : > { %v920_v24 = vsub.f32 %v11176_v10, %v14120_v40  ;;  %v1929_v37 = vsub.f32 %v11187_v7, %v13823_v48  ;;  %v13831_v38 = vand.u32 4294901760, %v11203_v22  ;;  %v9769_v54 = vpack.c.bf16 %v1916_v17, %v1909_v58 }
  0x7b   : > { %v808_v8 = vsub.f32 %v11191_v29, %v13824_v61  ;;  %v815_v40 = vsub.f32 %v11196_v26, %v13828_v23  ;;  %v690_v21 = vsub.f32 %v14122_v15, %v14121_v47  ;;  %v9579_v32 = vpack.c.bf16 %v802_v39, %v795_v11  ;;  %v14124_v29 = vld [vmem:[#allocation9_spill] sm:$0xff] }
  0x7c   : > { %v9771_v34 = vpack.c.bf16 %v1804_v31, %v1797_v1  ;;  %v921_v27 = vand.u32 4294901760, %v920_v24  ;;  %v1810_v48 = vsub.f32 %v11198_v12, %v13832_v25  ;;  %9576 = vmatpush3.bf16.xpose.msra.mxu0 %v9575_v41  ;;  %v928_v58 = vand.u32 4294901760, %v927_v45 }
  0x7d   : > { %v1817_v17 = vsub.f32 %v11203_v22, %v13831_v38  ;;  %v691_v61 = vand.u32 4294901760, %v690_v21  ;;  %v701_v23 = vsub.f32 %v14124_v29, %v14123_v16  ;;  %9578 = vmatprep.subr.bf16.mxu0 %v9577_v13  ;;  %v1923_v26 = vand.u32 4294901760, %v1922_v42 }
  0x7e   : > { %v1930_v47 = vand.u32 4294901760, %v1929_v37  ;;  %v809_v11 = vand.u32 4294901760, %v808_v8  ;;  %v13834_v31 = vand.u32 4294901760, %v11215_v53  ;;  %v816_v1 = vand.u32 4294901760, %v815_v40 }
  0x7f   : > { %9768 = vmatpush3.bf16.xpose.msra.mxu1 %v9767_v14  ;;  %8047 = vmatprep.mubr.f32.mxu0 %v691_v61  ;;  %v702_v24 = vand.u32 4294901760, %v701_v23  ;;  %v13833_v41 = vand.u32 4294901760, %v11226_v6  ;;  %v13835_v39 = vand.u32 4294901760, %v11230_v0  ;;  %v1811_v45 = vand.u32 4294901760, %v1810_v48  ;;  %v14127_v23 = vld [vmem:[#allocation10_spill] sm:$0xff] }
  0x80   : > { %9770 = vmatprep.subr.bf16.mxu1 %v9769_v54  ;;  %8287 = vmatprep.mubr.f32.mxu1 %v691_v61  ;;  %v934_v13 = vsub.f32 %v11215_v53, %v13834_v31  ;;  %v13836_v42 = vand.u32 4294901760, %v11232_v4  ;;  %v1818_v8 = vand.u32 4294901760, %v1817_v17  ;;  %v9581_v54 = vpack.c.bf16 %v928_v58, %v921_v27  ;;  %v14126_v58 = vld [vmem:[#allocation15_spill] sm:$0xff] }
  0x81   : > { %8048 = vmatmul.mubr.f32.gmra.mrb[2].mxu0 %v691_v61  ;;  %8288 = vmatmul.mubr.f32.gmra.mrb[2].mxu1 %v691_v61  ;;  %v941_v14 = vsub.f32 %v11226_v6, %v13833_v41  ;;  %v1936_v48 = vsub.f32 %v11230_v0, %v13835_v39  ;;  %v13837_v61 = vand.u32 4294901760, %v11418_v56  ;;  %v9773_v17 = vpack.c.bf16 %v1930_v47, %v1923_v26 }
  0x82   : > { %8049 = vmatprep.mubr.f32.mxu0 %v702_v24  ;;  %8289 = vmatprep.mubr.f32.mxu1 %v702_v24  ;;  %v1943_v40 = vsub.f32 %v11232_v4, %v13836_v42  ;;  %v9583_v38 = vpack.c.bf16 %v816_v1, %v809_v11  ;;  %v935_v25 = vand.u32 4294901760, %v934_v13  ;;  %v14125_v39 = vand.u32 4294901760, %v11272_v9  ;;  %v14130_v13 = vld [vmem:[#allocation23_spill] sm:$0xff] }
  0x83   : > { %v942_v41 = vand.u32 4294901760, %v941_v14  ;;  %v1937_v31 = vand.u32 4294901760, %v1936_v48  ;;  %v712_v16 = vsub.f32 %v14127_v23, %v14126_v58  ;;  %v9775_v29 = vpack.c.bf16 %v1818_v8, %v1811_v45  ;;  %v14131_v8 = vld [vmem:[#allocation24_spill] sm:$0xff]  ;;  %v14132_v14 = vld [vmem:[#allocation26_spill] sm:$0xff]  ;;  %v14135_v58 = vld [vmem:[#allocation51_spill] sm:$0xff] }
  0x84   : > { %v1944_v37 = vand.u32 4294901760, %v1943_v40  ;;  %v822_v27 = vsub.f32 %v11272_v9, %v14125_v39  ;;  %9580 = vmatpush3.bf16.xpose.msra.mxu0 %v9579_v32  ;;  %v14128_v42 = vand.u32 4294901760, %v11383_v52  ;;  %v9589_v26 = vpack.c.bf16 %v10919_v55, %v10912_v51 }
  0x85   : > { %8290 = vmatmul.mubr.f32.gmra.mrb[4].mxu1 %v702_v24  ;;  %9582 = vmatprep.subr.bf16.mxu0 %v9581_v54  ;;  %v14129_v47 = vand.u32 4294901760, %v11388_v18  ;;  %v1831_v1 = vsub.f32 %v11418_v56, %v13837_v61  ;;  %v713_v32 = vand.u32 4294901760, %v712_v16  ;;  %v9781_v39 = vpack.c.bf16 %v10931_v2, %v10925_v62 }
  0x86   : > { %v829_v21 = vsub.f32 %v11383_v52, %v14128_v42  ;;  %8050 = vmatmul.mubr.f32.gmra.mrb[4].mxu0 %v702_v24  ;;  %v9585_v45 = vpack.c.bf16 %v942_v41, %v935_v25  ;;  %v9591_v42 = vpack.c.bf16 %v14130_v13, %v10933_v3  ;;  %v9783_v24 = vpack.c.bf16 %v14132_v14, %v14131_v8  ;;  %v14145_v14 = vld [vmem:[#allocation64_spill] sm:$0xff]  ;;  %v14147_v8 = vld [vmem:[#allocation66_spill] sm:$0xff]  ;;  %v14152_v13 = vld [vmem:[#allocation75_spill] sm:$0xff] }
  0x87   : > { %v1824_v11 = vsub.f32 %v11388_v18, %v14129_v47  ;;  %9772 = vmatpush3.bf16.xpose.msra.mxu1 %v9771_v34  ;;  %v9593_v48 = vpack.c.bf16 %v10963_v36, %v10958_v33  ;;  %v9777_v54 = vpack.c.bf16 %v1944_v37, %v1937_v31  ;;  %v823_v40 = vand.u32 4294901760, %v822_v27  ;;  %8051 = vmatprep.mubr.f32.mxu0 %v713_v32  ;;  %v14133_v47 = vld [vmem:[#allocation35_spill] sm:$0xff]  ;;  %v14149_v36 = vld [vmem:[#allocation69_spill] sm:$0xff]  ;;  %v14153_v3 = vld [vmem:[#allocation76_spill] sm:$0xff] }
  0x88   : > { %9774 = vmatprep.subr.bf16.mxu1 %v9773_v17  ;;  %v9785_v16 = vpack.c.bf16 %v10974_v59, %v10969_v50  ;;  %v9595_v34 = vpack.c.bf16 %v14133_v47, %v10977_v49  ;;  %8291 = vmatprep.mubr.f32.mxu1 %v713_v32  ;;  %v9787_v25 = vpack.c.bf16 %v11000_v20, %v10990_v5  ;;  %v830_v37 = vand.u32 4294901760, %v829_v21  ;;  %v14134_v17 = vld [vmem:[#allocation50_spill] sm:$0xff]  ;;  %v14136_v47 = vld [vmem:[#allocation52_spill] sm:$0xff]  ;;  %v14138_v20 = vld [vmem:[#allocation55_spill] sm:$0xff] }
  0x89   : > { %v9597_v41 = vpack.c.bf16 %v11007_v57, %v11002_v28  ;;  %v9789_v61 = vpack.c.bf16 %v11018_v63, %v11013_v35  ;;  %v9599_v31 = vpack.c.bf16 %v11028_v43, %v11020_v30  ;;  %8292 = vmatmul.mubr.f32.gmra.mrb[6].mxu1 %v713_v32  ;;  %v9791_v27 = vpack.c.bf16 %v14134_v17, %v11033_v60  ;;  %v14137_v59 = vld [vmem:[#allocation54_spill] sm:$0xff]  ;;  %v14140_v63 = vld [vmem:[#allocation56_spill] sm:$0xff]  ;;  %v14141_v35 = vld [vmem:[#allocation59_spill] sm:$0xff] }
  0x8a   : > { %8052 = vmatmul.mubr.f32.gmra.mrb[6].mxu0 %v713_v32  ;;  %v9601_v49 = vpack.c.bf16 %v14136_v47, %v14135_v58  ;;  %v9793_v5 = vpack.c.bf16 %v14138_v20, %v14137_v59  ;;  %v1825_v50 = vand.u32 4294901760, %v1824_v11  ;;  %v14139_v57 = vld [vmem:[#allocation2_spill] sm:$0xff]  ;;  %v9603_v43 = vpack.c.bf16 %v14141_v35, %v14140_v63  ;;  %v14142_v21 = vld [vmem:[#allocation60_spill] sm:$0xff]  ;;  %v14144_v28 = vld [vmem:[#allocation63_spill] sm:$0xff] }
  0x8b   : > { %8085 = vmatprep.mubr.f32.mxu0 %v14139_v57  ;;  %8325 = vmatprep.mubr.f32.mxu1 %v14139_v57  ;;  %v14143_v30 = vld [vmem:[#allocation62_spill] sm:$0xff]  ;;  %v9605_v17 = vpack.c.bf16 %v14145_v14, %v14144_v28  ;;  %v14146_v60 = vld [vmem:[#allocation65_spill] sm:$0xff]  ;;  %v14148_v58 = vld [vmem:[#allocation68_spill] sm:$0xff]  ;;  %v9609_v2 = vpack.c.bf16 %v14153_v3, %v14152_v13 }
  0x8c   : > { %v9795_v32 = vpack.c.bf16 %v14143_v30, %v14142_v21  ;;  %v9797_v47 = vpack.c.bf16 %v14147_v8, %v14146_v60  ;;  %v9607_v20 = vpack.c.bf16 %v14149_v36, %v14148_v58  ;;  %v14150_v11 = vld [vmem:[#allocation72_spill] sm:$0xff]  ;;  %v14151_v59 = vld [vmem:[#allocation74_spill] sm:$0xff]  ;;  %9584 = vmatpush3.bf16.xpose.msra.mxu0 %v9583_v38  ;;  %v14154_v35 = vld [vmem:[#allocation77_spill] sm:$0xff]  ;;  %v9613_v8 = vpack.c.bf16 %v14118_v19, %v11176_v10 }
  0x8d   : > { %v9799_v33 = vpack.c.bf16 %v14151_v59, %v14150_v11  ;;  %v14155_v63 = vld [vmem:[#allocation78_spill] sm:$0xff]  ;;  %v14156_v30 = vld [vmem:[#allocation80_spill] sm:$0xff]  ;;  %v14157_v21 = vld [vmem:[#allocation81_spill] sm:$0xff]  ;;  %9586 = vmatprep.subr.bf16.mxu0 %v9585_v45  ;;  %v9805_v59 = vpack.c.bf16 %v11187_v7, %v14119_v44  ;;  %v9807_v38 = vpack.c.bf16 %v11203_v22, %v11198_v12  ;;  %v9619_v45 = vpack.c.bf16 %v11383_v52, %v11272_v9 }
  0x8e   : > { %v9801_v62 = vpack.c.bf16 %v14155_v63, %v14154_v35  ;;  %v9611_v55 = vpack.c.bf16 %v14157_v21, %v14156_v30  ;;  %v14158_v14 = vld [vmem:[#allocation82_spill] sm:$0xff]  ;;  %v14159_v11 = vld [vmem:[#allocation91_spill] sm:$0xff]  ;;  %v14160_v36 = vld [vmem:[#allocation92_spill] sm:$0xff]  ;;  %v9617_v63 = vpack.c.bf16 %v11226_v6, %v11215_v53  ;;  %v1832_v21 = vand.u32 4294901760, %v1831_v1 }
  0x8f   : > { %v9803_v28 = vpack.c.bf16 %v14117_v46, %v14158_v14  ;;  %v9615_v3 = vpack.c.bf16 %v14160_v36, %v14159_v11  ;;  %9776 = vmatpush3.bf16.xpose.msra.mxu1 %v9775_v29  ;;  %v9809_v46 = vpack.c.bf16 %v11232_v4, %v11230_v0  ;;  %v9811_v7 = vpack.c.bf16 %v11418_v56, %v11388_v18  ;;  %v14161_v29 = vld [vmem:[#allocation3_spill] sm:$0xff]  ;;  %v14162_v1 = vld [vmem:[#allocation4_spill] sm:$0xff] }
  0x90   : > { %9778 = vmatprep.subr.bf16.mxu1 %v9777_v54  ;;  %v9587_v44 = vpack.c.bf16 %v830_v37, %v823_v40  ;;  %v9779_v36 = vpack.c.bf16 %v1832_v21, %v1825_v50  ;;  %v14164_v50 = vld [vmem:[#allocation5_spill] sm:$0xff]  ;;  %v14189_v54 = vld [vmem:[#allocation79_spill] sm:$0xff]  ;;  %v14197_v37 = vand.u32 4294901760, %v10912_v51 }
  0x91   : > { %v14190_v40 = vld [vmem:[#allocation83_spill] sm:$0xff] }
  0x92   : > { %v14210_v51 = vld [vmem:[#allocation27_spill] sm:$0xff] }
  0x94   : > { %9588 = vmatpush3.bf16.xpose.msra.mxu0 %v9587_v44  ;;  %v14179_v44 = vld [vmem:[#allocation43_spill] sm:$0xff] }
  0x95   : > { %9590 = vmatprep.subr.bf16.mxu0 %v9589_v26  ;;  %v14182_v26 = vld [vmem:[#allocation58_spill] sm:$0xff] }
  0x97   : > { %9780 = vmatpush3.bf16.xpose.msra.mxu1 %v9779_v36  ;;  %v14163_v36 = vld [vmem:[#allocation6_spill] sm:$0xff] }
  0x98   : > { %9782 = vmatprep.subr.bf16.mxu1 %v9781_v39  ;;  %v14183_v39 = vld [vmem:[#allocation57_spill] sm:$0xff] }
  0x9b   : > { %8086 = vmatmul.mubr.f32.vlgmr.msra.gmra.mrb[0].mxu0 %v14139_v57 }
  0x9c   : > { %9592 = vmatpush3.bf16.xpose.msra.mxu0 %v9591_v42  ;;  %8087 = vmatprep.mubr.f32.mxu0 %v14161_v29  ;;  %v14184_v42 = vld [vmem:[#allocation61_spill] sm:$0xff] }
  0x9d   : > { %9594 = vmatprep.subr.bf16.mxu0 %v9593_v48  ;;  %v14188_v48 = vld [vmem:[#allocation73_spill] sm:$0xff] }
  0x9e   : > { %8326 = vmatmul.mubr.f32.vlgmr.msra.gmra.mrb[0].mxu1 %v14139_v57 }
  0x9f   : > { %9784 = vmatpush3.bf16.xpose.msra.mxu1 %v9783_v24  ;;  %8327 = vmatprep.mubr.f32.mxu1 %v14161_v29  ;;  %v14187_v24 = vld [vmem:[#allocation71_spill] sm:$0xff] }
  0xa0   : > { %9786 = vmatprep.subr.bf16.mxu1 %v9785_v16  ;;  %8088 = vmatmul.mubr.f32.gmra.mrb[2].mxu0 %v14161_v29  ;;  %v14191_v16 = vld [vmem:[#allocation84_spill] sm:$0xff] }
  0xa1   : > { %8089 = vmatprep.mubr.f32.mxu0 %v14162_v1 }
  0xa2   : > { %8328 = vmatmul.mubr.f32.gmra.mrb[2].mxu1 %v14161_v29 }
  0xa3   : > { %8329 = vmatprep.mubr.f32.mxu1 %v14162_v1 }
  0xa4   : > { %8090 = vmatmul.mubr.f32.gmra.mrb[4].mxu0 %v14162_v1 }
  0xa5   : > { %9596 = vmatpush3.bf16.xpose.msra.mxu0 %v9595_v34  ;;  %8091 = vmatprep.mubr.f32.mxu0 %v14163_v36  ;;  %v14193_v34 = vld [vmem:[#allocation90_spill] sm:$0xff] }
  0xa6   : > { %9598 = vmatprep.subr.bf16.mxu0 %v9597_v41  ;;  %8330 = vmatmul.mubr.f32.gmra.mrb[4].mxu1 %v14162_v1  ;;  %v14195_v41 = vld [vmem:[#allocation93_spill] sm:$0xff] }
  0xa7   : > { %9788 = vmatpush3.bf16.xpose.msra.mxu1 %v9787_v25  ;;  %8331 = vmatprep.mubr.f32.mxu1 %v14163_v36  ;;  %v14194_v25 = vld [vmem:[#allocation94_spill] sm:$0xff] }
  0xa8   : > { %9790 = vmatprep.subr.bf16.mxu1 %v9789_v61  ;;  %8092 = vmatmul.mubr.f32.gmra.mrb[6].mxu0 %v14163_v36  ;;  %v14181_v61 = vld [vmem:[#allocation53_spill] sm:$0xff] }
  0xa9   : > { %8125 = vmatprep.mubr.f32.mxu0 %v14164_v50 }
  0xaa   : > { %8332 = vmatmul.mubr.f32.gmra.mrb[6].mxu1 %v14163_v36 }
  0xab   : > { %8365 = vmatprep.mubr.f32.mxu1 %v14164_v50 }
  0xad   : > { %9600 = vmatpush3.bf16.xpose.msra.mxu0 %v9599_v31  ;;  %v14196_v31 = vld [vmem:[#allocation95_spill] sm:$0xff] }
  0xae   : > { %9602 = vmatprep.subr.bf16.mxu0 %v9601_v49  ;;  %v14165_v49 = vld [vmem:[#allocation11_spill] sm:$0xff] }
  0xaf   : > { %9792 = vmatpush3.bf16.xpose.msra.mxu1 %v9791_v27 }
  0xb0   : > { %9794 = vmatprep.subr.bf16.mxu1 %v9793_v5  ;;  %v14166_v5 = vld [vmem:[#allocation14_spill] sm:$0xff] }
  0xb5   : > { %9604 = vmatpush3.bf16.xpose.msra.mxu0 %v9603_v43  ;;  %v14176_v43 = vld [vmem:[#allocation7_spill] sm:$0xff] }
  0xb6   : > { %9606 = vmatprep.subr.bf16.mxu0 %v9605_v17  ;;  %v14198_v17 = vld [vmem:[#allocation17_spill] sm:$0xff] }
  0xb7   : > { %9796 = vmatpush3.bf16.xpose.msra.mxu1 %v9795_v32  ;;  %v14199_v27 = vand.u32 4294901760, %v14198_v17  ;;  %v14200_v32 = vld [vmem:[#allocation18_spill] sm:$0xff]  ;;  %v14212_v17 = vld [vmem:[#allocation29_spill] sm:$0xff] }
  0xb8   : > { %9798 = vmatprep.subr.bf16.mxu1 %v9797_v47  ;;  %v14192_v47 = vld [vmem:[#allocation86_spill] sm:$0xff] }
  0xb9   : > { %v9653_v21 = vpack.c.bf16 %v14199_v27, %v14197_v37  ;;  %v14213_v37 = vand.u32 4294901760, %v14212_v17  ;;  %v14227_v17 = vld [vmem:[#allocation13_spill] sm:$0xff] }
  0xbd   : > { %9608 = vmatpush3.bf16.xpose.msra.mxu0 %v9607_v20  ;;  %v14167_v20 = vld [vmem:[#allocation16_spill] sm:$0xff] }
  0xbe   : > { %9610 = vmatprep.subr.bf16.mxu0 %v9609_v2  ;;  %v14171_v2 = vld [vmem:[#allocation9_spill] sm:$0xff] }
  0xbf   : > { %9800 = vmatpush3.bf16.xpose.msra.mxu1 %v9799_v33  ;;  %v14173_v33 = vld [vmem:[#allocation34_spill] sm:$0xff] }
  0xc0   : > { %9802 = vmatprep.subr.bf16.mxu1 %v9801_v62  ;;  %v14169_v62 = vld [vmem:[#allocation19_spill] sm:$0xff] }
  0xc5   : > { %9612 = vmatpush3.bf16.xpose.msra.mxu0 %v9611_v55  ;;  %v14168_v55 = vld [vmem:[#allocation22_spill] sm:$0xff] }
  0xc6   : > { %9614 = vmatprep.subr.bf16.mxu0 %v9613_v8  ;;  %v14185_v8 = vld [vmem:[#allocation67_spill] sm:$0xff] }
  0xc7   : > { %9804 = vmatpush3.bf16.xpose.msra.mxu1 %v9803_v28  ;;  %v14175_v28 = vld [vmem:[#allocation37_spill] sm:$0xff] }
  0xc8   : > { %9806 = vmatprep.subr.bf16.mxu1 %v9805_v59  ;;  %v14174_v59 = vld [vmem:[#allocation31_spill] sm:$0xff] }
  0xcd   : > { %9616 = vmatpush3.bf16.xpose.msra.mxu0 %v9615_v3  ;;  %v14172_v3 = vld [vmem:[#allocation28_spill] sm:$0xff] }
  0xce   : > { %9618 = vmatprep.subr.bf16.mxu0 %v9617_v63  ;;  %v14170_v63 = vld [vmem:[#allocation25_spill] sm:$0xff] }
  0xcf   : > { %9808 = vmatpush3.bf16.xpose.msra.mxu1 %v9807_v38  ;;  %v14201_v38 = vand.u32 4294901760, %v14200_v32  ;;  %v14214_v32 = vld [vmem:[#allocation24_spill] sm:$0xff] }
  0xd0   : > { %9810 = vmatprep.subr.bf16.mxu1 %v9809_v46  ;;  %v14178_v46 = vld [vmem:[#allocation46_spill] sm:$0xff] }
  0xd5   : > { %9620 = vmatpush3.bf16.xpose.msra.mxu0 %v9619_v45  ;;  %v14202_v45 = vld [vmem:[#allocation20_spill] sm:$0xff] }
  0xd6   : > { %9622 = vmatprep.subr.bf16.mxu0 %v14165_v49 }
  0xd7   : > { %9812 = vmatpush3.bf16.xpose.msra.mxu1 %v9811_v7  ;;  %v14177_v7 = vld [vmem:[#allocation40_spill] sm:$0xff] }
  0xd8   : > { %9814 = vmatprep.subr.bf16.mxu1 %v14166_v5 }
  0xdc   : > { %8126 = vmatmul.mubr.f32.vlgmr.msra.gmra.mrb[0].mxu0 %v14164_v50 }
  0xdd   : > { %9624 = vmatpush3.bf16.xpose.msra.mxu0 %v14167_v20  ;;  %8127 = vmatprep.mubr.f32.mxu0 %v14122_v15 }
  0xde   : > { %8366 = vmatmul.mubr.f32.vlgmr.msra.gmra.mrb[0].mxu1 %v14164_v50  ;;  %9626 = vmatprep.subr.bf16.mxu0 %v14168_v55  ;;  %v14203_v50 = vand.u32 4294901760, %v14202_v45  ;;  %v14216_v45 = vld [vmem:[#allocation26_spill] sm:$0xff] }
  0xdf   : > { %9816 = vmatpush3.bf16.xpose.msra.mxu1 %v14169_v62  ;;  %8367 = vmatprep.mubr.f32.mxu1 %v14122_v15 }
  0xe0   : > { %9818 = vmatprep.subr.bf16.mxu1 %v14170_v63  ;;  %8128 = vmatmul.mubr.f32.gmra.mrb[2].mxu0 %v14122_v15 }
  0xe1   : > { %8129 = vmatprep.mubr.f32.mxu0 %v14171_v2 }
  0xe2   : > { %8368 = vmatmul.mubr.f32.gmra.mrb[2].mxu1 %v14122_v15  ;;  %v14180_v15 = vld [vmem:[#allocation49_spill] sm:$0xff] }
  0xe3   : > { %8369 = vmatprep.mubr.f32.mxu1 %v14171_v2 }
  0xe4   : > { %8130 = vmatmul.mubr.f32.gmra.mrb[4].mxu0 %v14171_v2 }
  0xe5   : > { %9628 = vmatpush3.bf16.xpose.msra.mxu0 %v14172_v3  ;;  %8131 = vmatprep.mubr.f32.mxu0 %v14127_v23 }
  0xe6   : > { %9630 = vmatprep.subr.bf16.mxu0 %v14173_v33  ;;  %8370 = vmatmul.mubr.f32.gmra.mrb[4].mxu1 %v14171_v2  ;;  %v9845_v2 = vpack.c.bf16 %v14203_v50, %v14201_v38  ;;  %v14217_v38 = vand.u32 4294901760, %v14216_v45  ;;  %v14234_v45 = vld [vmem:[#allocation38_spill] sm:$0xff] }
  0xe7   : > { %9820 = vmatpush3.bf16.xpose.msra.mxu1 %v14174_v59  ;;  %8371 = vmatprep.mubr.f32.mxu1 %v14127_v23 }
  0xe8   : > { %9822 = vmatprep.subr.bf16.mxu1 %v14175_v28  ;;  %8132 = vmatmul.mubr.f32.gmra.mrb[6].mxu0 %v14127_v23 }
  0xe9   : > { %8165 = vmatprep.mubr.f32.mxu0 %v14176_v43 }
  0xea   : > { %8372 = vmatmul.mubr.f32.gmra.mrb[6].mxu1 %v14127_v23  ;;  %v14186_v23 = vld [vmem:[#allocation70_spill] sm:$0xff] }
  0xeb   : > { %8405 = vmatprep.mubr.f32.mxu1 %v14176_v43 }
  0xed   : > { %9632 = vmatpush3.bf16.xpose.msra.mxu0 %v14177_v7 }
  0xee   : > { %9634 = vmatprep.subr.bf16.mxu0 %v14178_v46 }
  0xef   : > { %9824 = vmatpush3.bf16.xpose.msra.mxu1 %v14179_v44 }
  0xf0   : > { %9826 = vmatprep.subr.bf16.mxu1 %v14180_v15 }
  0xf5   : > { %9636 = vmatpush3.bf16.xpose.msra.mxu0 %v14181_v61 }
  0xf6   : > { %9638 = vmatprep.subr.bf16.mxu0 %v14182_v26 }
  0xf7   : > { %9828 = vmatpush3.bf16.xpose.msra.mxu1 %v14183_v39 }
  0xf8   : > { %9830 = vmatprep.subr.bf16.mxu1 %v14184_v42 }
  0xfd   : > { %9640 = vmatpush3.bf16.xpose.msra.mxu0 %v14185_v8 }
  0xfe   : > { %9642 = vmatprep.subr.bf16.mxu0 %v14186_v23 }
  0xff   : > { %9832 = vmatpush3.bf16.xpose.msra.mxu1 %v14187_v24 }
 0x100   : > { %9834 = vmatprep.subr.bf16.mxu1 %v14188_v48  ;;  %v14215_v48 = vand.u32 4294901760, %v14214_v32 }
 0x102   : > { %v9847_v50 = vpack.c.bf16 %v14217_v38, %v14215_v48  ;;  %v14223_v48 = vld [vmem:[#allocation33_spill] sm:$0xff]  ;;  %v14235_v38 = vand.u32 4294901760, %v14234_v45  ;;  %v352_v45 = vld [vmem:[%s13629_s2 + $0x10] sm:$0xff] }
 0x105   : > { %9644 = vmatpush3.bf16.xpose.msra.mxu0 %v14189_v54  ;;  %v14211_v54 = vand.u32 4294901760, %v14210_v51 }
 0x106   : > { %9646 = vmatprep.subr.bf16.mxu0 %v14190_v40 }
 0x107   : > { %9836 = vmatpush3.bf16.xpose.msra.mxu1 %v14191_v16  ;;  %v14204_v16 = vld [vmem:[#allocation96_spill] sm:$0xff]  ;;  %v9657_v27 = vpack.c.bf16 %v14213_v37, %v14211_v54  ;;  %v14224_v54 = vand.u32 4294901760, %v14223_v48 }
 0x108   : > { %9838 = vmatprep.subr.bf16.mxu1 %v14192_v47  ;;  %v14208_v47 = vld [vmem:[#allocation23_spill] sm:$0xff] }
 0x10d   : > { %9648 = vmatpush3.bf16.xpose.msra.mxu0 %v14193_v34  ;;  %v14205_v34 = vld [vmem:[#allocation97_spill] sm:$0xff] }
 0x10e   : > { %9650 = vmatprep.subr.bf16.mxu0 %v14194_v25  ;;  %v14206_v25 = vld [vmem:[#allocation21_spill] sm:$0xff] }
 0x10f   : > { %9840 = vmatpush3.bf16.xpose.msra.mxu1 %v14195_v41  ;;  %v14207_v41 = vand.u32 4294901760, %v14206_v25 }
 0x110   : > { %9842 = vmatprep.subr.bf16.mxu1 %v14196_v31  ;;  %v14209_v31 = vand.u32 4294901760, %v14208_v47  ;;  %v14222_v47 = vld [vmem:[#allocation12_spill] sm:$0xff] }
 0x112   : > { %v9655_v40 = vpack.c.bf16 %v14209_v31, %v14207_v41  ;;  %v14225_v41 = vld [vmem:[#allocation35_spill] sm:$0xff] }
 0x113   : > { %v14226_v31 = vand.u32 4294901760, %v14225_v41  ;;  %v14240_v41 = vld [vmem:[#allocation15_spill] sm:$0xff] }
 0x115   : > { %9652 = vmatpush3.bf16.xpose.msra.mxu0 %v14204_v16  ;;  %v9659_v51 = vpack.c.bf16 %v14226_v31, %v14224_v54 }
 0x116   : > { %9654 = vmatprep.subr.bf16.mxu0 %v9653_v21  ;;  %v14218_v21 = vld [vmem:[#allocation30_spill] sm:$0xff] }
 0x117   : > { %9844 = vmatpush3.bf16.xpose.msra.mxu1 %v14205_v34  ;;  %v14219_v34 = vand.u32 4294901760, %v14218_v21  ;;  %v14236_v21 = vld [vmem:[#allocation42_spill] sm:$0xff] }
 0x118   : > { %9846 = vmatprep.subr.bf16.mxu1 %v9845_v2  ;;  %v14220_v2 = vld [vmem:[#allocation32_spill] sm:$0xff] }
 0x119   : > { %v14221_v16 = vand.u32 4294901760, %v14220_v2  ;;  %v14237_v2 = vand.u32 4294901760, %v14236_v21  ;;  %v14251_v21 = vld [vmem:[#allocation50_spill] sm:$0xff] }
 0x11b   : > { %v9849_v25 = vpack.c.bf16 %v14221_v16, %v14219_v34  ;;  %v14228_v16 = vld [vmem:[#allocation39_spill] sm:$0xff]  ;;  %v14230_v34 = vld [vmem:[#allocation41_spill] sm:$0xff] }
 0x11c   : > { %8166 = vmatmul.mubr.f32.vlgmr.msra.gmra.mrb[0].mxu0 %v14176_v43  ;;  %v14231_v37 = vand.u32 4294901760, %v14230_v34 }
 0x11d   : > { %9656 = vmatpush3.bf16.xpose.msra.mxu0 %v9655_v40  ;;  %8167 = vmatprep.mubr.f32.mxu0 %v14222_v47  ;;  %v14229_v40 = vand.u32 4294901760, %v14228_v16  ;;  %v14243_v16 = vld [vmem:[#allocation47_spill] sm:$0xff] }
 0x11e   : > { %8406 = vmatmul.mubr.f32.vlgmr.msra.gmra.mrb[0].mxu1 %v14176_v43  ;;  %9658 = vmatprep.subr.bf16.mxu0 %v9657_v27  ;;  %v14232_v43 = vld [vmem:[#allocation36_spill] sm:$0xff] }
 0x11f   : > { %9848 = vmatpush3.bf16.xpose.msra.mxu1 %v9847_v50  ;;  %8407 = vmatprep.mubr.f32.mxu1 %v14222_v47  ;;  %v9661_v32 = vpack.c.bf16 %v14231_v37, %v14229_v40  ;;  %v14233_v27 = vand.u32 4294901760, %v14232_v43  ;;  %v14244_v40 = vand.u32 4294901760, %v14243_v16  ;;  %v14245_v37 = vld [vmem:[#allocation51_spill] sm:$0xff]  ;;  %v14247_v43 = vld [vmem:[#allocation52_spill] sm:$0xff] }
 0x120   : > { %9850 = vmatprep.subr.bf16.mxu1 %v9849_v25  ;;  %8168 = vmatmul.mubr.f32.gmra.mrb[2].mxu0 %v14222_v47  ;;  %v14238_v25 = vld [vmem:[#allocation44_spill] sm:$0xff] }
 0x121   : > { %8169 = vmatprep.mubr.f32.mxu0 %v14227_v17  ;;  %v9851_v50 = vpack.c.bf16 %v14235_v38, %v14233_v27  ;;  %v14239_v48 = vand.u32 4294901760, %v14238_v25  ;;  %v14248_v27 = vand.u32 4294901760, %v14247_v43  ;;  %v14249_v38 = vld [vmem:[#allocation48_spill] sm:$0xff] }
 0x122   : > { %8408 = vmatmul.mubr.f32.gmra.mrb[2].mxu1 %v14222_v47  ;;  %v14241_v47 = vld [vmem:[#allocation45_spill] sm:$0xff] }
 0x123   : > { %8409 = vmatprep.mubr.f32.mxu1 %v14227_v17  ;;  %v9853_v54 = vpack.c.bf16 %v14239_v48, %v14237_v2  ;;  %v14242_v31 = vand.u32 4294901760, %v14241_v47  ;;  %v14252_v2 = vand.u32 4294901760, %v14251_v21  ;;  %v10777_v48 = vmov 0  }
 0x124   : > { %8170 = vmatmul.mubr.f32.gmra.mrb[4].mxu0 %v14227_v17  ;;  %10639 = vset.pattern.permute.xlu0 %v10777_v48 }
 0x125   : > { %9660 = vmatpush3.bf16.xpose.msra.mxu0 %v9659_v51  ;;  %8171 = vmatprep.mubr.f32.mxu0 %v14240_v41  ;;  %v9663_v34 = vpack.c.bf16 %v14244_v40, %v14242_v31  ;;  %v14246_v51 = vand.u32 4294901760, %v14245_v37  ;;  %v351_v40 = vld [vmem:[%s13629_s2 + $0x8] sm:$0xff]  ;;  %v353_v37 = vld [vmem:[%s13629_s2 + $0x18] sm:$0xff] }
 0x126   : > { %9662 = vmatprep.subr.bf16.mxu0 %v9661_v32  ;;  %8410 = vmatmul.mubr.f32.gmra.mrb[4].mxu1 %v14227_v17  ;;  %v350_v17 = vld [vmem:[%s13629_s2] sm:$0xff] }
 0x127   : > { %9852 = vmatpush3.bf16.xpose.msra.mxu1 %v9851_v50  ;;  %8411 = vmatprep.mubr.f32.mxu1 %v14240_v41  ;;  %v9665_v32 = vpack.c.bf16 %v14248_v27, %v14246_v51  ;;  %v14250_v50 = vand.u32 4294901760, %v14249_v38  ;;  %v14257_v51 = vld [vmem:[#allocation56_spill] sm:$0xff]  ;;  %v14259_v27 = vld [vmem:[#allocation59_spill] sm:$0xff] }
 0x128   : > { %9854 = vmatprep.subr.bf16.mxu1 %v9853_v54  ;;  %8172 = vmatmul.mubr.f32.gmra.mrb[6].mxu0 %v14240_v41  ;;  %v14253_v54 = vld [vmem:[#allocation54_spill] sm:$0xff]  ;;  %v14258_v43 = vand.u32 4294901760, %v14257_v51  ;;  %v14260_v38 = vand.u32 4294901760, %v14259_v27  ;;  %v2766_v27 = vld [vmem:[%s13631_s4 + $0x18] sm:$0xff] }
 0x129   : > { %8205 = vmatprep.mubr.f32.mxu0 %v14139_v57  ;;  %v9855_v25 = vpack.c.bf16 %v14252_v2, %v14250_v50  ;;  %v14254_v47 = vand.u32 4294901760, %v14253_v54  ;;  %356 = vperm.xlu0 %10639, %v350_v17   ;;  %v14261_v50 = vld [vmem:[#allocation63_spill] sm:$0xff] }
 0x12a   : > { %8412 = vmatmul.mubr.f32.gmra.mrb[6].mxu1 %v14240_v41  ;;  %v14255_v41 = vld [vmem:[#allocation55_spill] sm:$0xff]  ;;  %10640 = vset.pattern.permute.xlu1 %v10777_v48  ;;  %v9667_v17 = vpack.c.bf16 %v14260_v38, %v14258_v43  ;;  %v14265_v48 = vld [vmem:[#allocation60_spill] sm:$0xff]  ;;  %v14273_v38 = vld [vmem:[#allocation69_spill] sm:$0xff] }
 0x12b   : > { %8445 = vmatprep.mubr.f32.mxu1 %v14139_v57  ;;  %v14256_v31 = vand.u32 4294901760, %v14255_v41  ;;  %366 = vperm.xlu1 %10640, %v352_v45   ;;  %v14262_v45 = vand.u32 4294901760, %v14261_v50  ;;  %v14266_v54 = vand.u32 4294901760, %v14265_v48  ;;  %v14274_v50 = vand.u32 4294901760, %v14273_v38  ;;  %v14280_v48 = vld [vmem:[#allocation74_spill] sm:$0xff] }
 0x12c   : > { %v14290_v38 = vand.u32 4294901760, %v14158_v14  ;;  %v14301_v14 = vand.u32 4294901760, %v11226_v6 }
 0x12d   : > { %v9857_v16 = vpack.c.bf16 %v14256_v31, %v14254_v47  ;;  %9664 = vmatpush3.bf16.xpose.msra.mxu0 %v9663_v34  ;;  %361 = vperm.xlu0 %10639, %v351_v40   ;;  %v2763_v34 = vld [vmem:[%s13631_s4] sm:$0xff] }
 0x12e   : > { %9666 = vmatprep.subr.bf16.mxu0 %v9665_v32  ;;  %v14263_v32 = vld [vmem:[#allocation64_spill] sm:$0xff]  ;;  %v14267_v47 = vld [vmem:[#allocation62_spill] sm:$0xff] }
 0x12f   : > { %9856 = vmatpush3.bf16.xpose.msra.mxu1 %v9855_v25  ;;  %371 = vperm.xlu1 %10640, %v353_v37   ;;  %v14264_v21 = vand.u32 4294901760, %v14263_v32  ;;  %v2764_v25 = vld [vmem:[%s13631_s4 + $0x8] sm:$0xff]  ;;  %v14268_v41 = vand.u32 4294901760, %v14267_v47  ;;  %v14270_v40 = vld [vmem:[#allocation66_spill] sm:$0xff]  ;;  %v2765_v37 = vld [vmem:[%s13631_s4 + $0x10] sm:$0xff] }
 0x130   : > { %9858 = vmatprep.subr.bf16.mxu1 %v9857_v16  ;;  %v14269_v16 = vand.u32 4294901760, %v14146_v60  ;;  %v14271_v51 = vand.u32 4294901760, %v14270_v40  ;;  %v14272_v60 = vand.u32 4294901760, %v14148_v58  ;;  %v14285_v58 = vand.u32 4294901760, %v14156_v30 }
 0x131   : > { %v9669_v2 = vpack.c.bf16 %v14264_v21, %v14262_v45  ;;  %v9859_v31 = vpack.c.bf16 %v14268_v41, %v14266_v54  ;;  %2769 = vperm.xlu0 %10639, %v2763_v34   ;;  %v14276_v34 = vld [vmem:[#allocation76_spill] sm:$0xff]  ;;  %v14281_v54 = vand.u32 4294901760, %v14280_v48  ;;  %v14282_v41 = vand.u32 4294901760, %v14154_v35  ;;  %v14291_v35 = vld [vmem:[#allocation85_spill] sm:$0xff] }
 0x132   : > { %v9861_v43 = vpack.c.bf16 %v14271_v51, %v14269_v16  ;;  %v9671_v45 = vpack.c.bf16 %v14274_v50, %v14272_v60  ;;  %v14277_v32 = vand.u32 4294901760, %v14276_v34  ;;  %v14292_v50 = vand.u32 4294901760, %v14291_v35  ;;  %v14293_v34 = vld [vmem:[#allocation88_spill] sm:$0xff] }
 0x133   : > { %2774 = vperm.xlu1 %10640, %v2764_v25   ;;  %v14278_v25 = vld [vmem:[#allocation72_spill] sm:$0xff]  ;;  %v14297_v30 = vand.u32 4294901760, %v14159_v11  ;;  %v14300_v48 = vand.u32 4294901760, %v11215_v53  ;;  %v14306_v11 = vand.u32 4294901760, %v11272_v9  ;;  %v14307_v53 = vand.u32 4294901760, %v11383_v52  ;;  %v14310_v9 = vld [vmem:[#allocation73_spill] sm:$0xff] }
 0x134   : > { %v14313_v52 = vld [vmem:[#allocation84_spill] sm:$0xff] }
 0x135   : > { %9668 = vmatpush3.bf16.xpose.msra.mxu0 %v9667_v17  ;;  %2779 = vperm.xlu0 %10639, %v2765_v37   ;;  %v14275_v17 = vand.u32 4294901760, %v14152_v13  ;;  %v14286_v13 = vld [vmem:[#allocation81_spill] sm:$0xff]  ;;  %v14288_v37 = vand.u32 4294901760, %v11176_v10  ;;  %v14298_v10 = vld [vmem:[#allocation92_spill] sm:$0xff]  ;;  %v9683_v6 = vpack.c.bf16 %v14307_v53, %v14306_v11 }
 0x136   : > { %9670 = vmatprep.subr.bf16.mxu0 %v9669_v2  ;;  %v14279_v2 = vand.u32 4294901760, %v14278_v25  ;;  %v14287_v51 = vand.u32 4294901760, %v14286_v13  ;;  %v14308_v13 = vand.u32 4294901760, %v11388_v18  ;;  %v14314_v18 = vld [vmem:[#allocation86_spill] sm:$0xff] }
 0x137   : > { %9860 = vmatpush3.bf16.xpose.msra.mxu1 %v9859_v31  ;;  %2784 = vperm.xlu1 %10640, %v2766_v27   ;;  %v9673_v21 = vpack.c.bf16 %v14277_v32, %v14275_v17  ;;  %v14283_v31 = vld [vmem:[#allocation78_spill] sm:$0xff]  ;;  %v14289_v27 = vand.u32 4294901760, %v14118_v19  ;;  %v9867_v17 = vpack.c.bf16 %v14292_v50, %v14290_v38  ;;  %v14295_v32 = vld [vmem:[#allocation89_spill] sm:$0xff] }
 0x138   : > { %9862 = vmatprep.subr.bf16.mxu1 %v9861_v43  ;;  %v9863_v47 = vpack.c.bf16 %v14281_v54, %v14279_v2  ;;  %v14284_v16 = vand.u32 4294901760, %v14283_v31  ;;  %v9675_v43 = vpack.c.bf16 %v14287_v51, %v14285_v58  ;;  %v14299_v2 = vand.u32 4294901760, %v14298_v10 }
 0x139   : > { %v9677_v60 = vpack.c.bf16 %v14289_v27, %v14288_v37  ;;  %v9681_v54 = vpack.c.bf16 %v14301_v14, %v14300_v48 }
 0x13a   : > { %v9865_v40 = vpack.c.bf16 %v14284_v16, %v14282_v41  ;;  %v9679_v19 = vpack.c.bf16 %v14299_v2, %v14297_v30  ;;  %v14303_v41 = vand.u32 4294901760, %v11203_v22  ;;  %v14304_v16 = vand.u32 4294901760, %v11230_v0  ;;  %v14311_v0 = vld [vmem:[#allocation79_spill] sm:$0xff] }
 0x13d   : > { %9672 = vmatpush3.bf16.xpose.msra.mxu0 %v9671_v45  ;;  %v14294_v45 = vand.u32 4294901760, %v14293_v34 }
 0x13e   : > { %9674 = vmatprep.subr.bf16.mxu0 %v9673_v21  ;;  %v14296_v21 = vand.u32 4294901760, %v14295_v32 }
 0x13f   : > { %9864 = vmatpush3.bf16.xpose.msra.mxu1 %v9863_v47  ;;  %v14302_v47 = vand.u32 4294901760, %v11198_v12  ;;  %v14309_v12 = vand.u32 4294901760, %v11418_v56  ;;  %v14315_v56 = vld [vmem:[#allocation90_spill] sm:$0xff] }
 0x140   : > { %9866 = vmatprep.subr.bf16.mxu1 %v9865_v40  ;;  %v9869_v25 = vpack.c.bf16 %v14296_v21, %v14294_v45  ;;  %v14305_v40 = vand.u32 4294901760, %v11232_v4  ;;  %v14312_v4 = vld [vmem:[#allocation83_spill] sm:$0xff] }
 0x141   : > { %v9871_v31 = vpack.c.bf16 %v14303_v41, %v14302_v47  ;;  %v9875_v22 = vpack.c.bf16 %v14309_v12, %v14308_v13 }
 0x142   : > { %v9873_v58 = vpack.c.bf16 %v14305_v40, %v14304_v16 }
 0x145   : > { %9676 = vmatpush3.bf16.xpose.msra.mxu0 %v9675_v43 }
 0x146   : > { %9678 = vmatprep.subr.bf16.mxu0 %v9677_v60 }
 0x147   : > { %9868 = vmatpush3.bf16.xpose.msra.mxu1 %v9867_v17 }
 0x148   : > { %9870 = vmatprep.subr.bf16.mxu1 %v9869_v25 }
 0x14d   : > { %9680 = vmatpush3.bf16.xpose.msra.mxu0 %v9679_v19 }
 0x14e   : > { %9682 = vmatprep.subr.bf16.mxu0 %v9681_v54 }
 0x14f   : > { %9872 = vmatpush3.bf16.xpose.msra.mxu1 %v9871_v31 }
 0x150   : > { %9874 = vmatprep.subr.bf16.mxu1 %v9873_v58 }
 0x155   : > { %9684 = vmatpush3.bf16.xpose.msra.mxu0 %v9683_v6 }
 0x156   : > { %9686 = vmatprep.subr.bf16.mxu0 %v14165_v49  ;;  %v14316_v49 = vld [vmem:[#allocation94_spill] sm:$0xff] }
 0x157   : > { %9876 = vmatpush3.bf16.xpose.msra.mxu1 %v9875_v22 }
 0x158   : > { %9878 = vmatprep.subr.bf16.mxu1 %v14166_v5  ;;  %v14317_v5 = vld [vmem:[#allocation93_spill] sm:$0xff] }
 0x15c   : > { %8206 = vmatmul.mubr.f32.vlgmr.msra.gmra.mrb[0].mxu0 %v14139_v57 }
 0x15d   : > { %9688 = vmatpush3.bf16.xpose.msra.mxu0 %v14167_v20  ;;  %8207 = vmatprep.mubr.f32.mxu0 %v14161_v29  ;;  %v14318_v20 = vld [vmem:[#allocation95_spill] sm:$0xff] }
 0x15e   : > { %8446 = vmatmul.mubr.f32.vlgmr.msra.gmra.mrb[0].mxu1 %v14139_v57  ;;  %9690 = vmatprep.subr.bf16.mxu0 %v14168_v55  ;;  %v14319_v55 = vld [vmem:[#allocation96_spill] sm:$0xff] }
 0x15f   : > { %9880 = vmatpush3.bf16.xpose.msra.mxu1 %v14169_v62  ;;  %8447 = vmatprep.mubr.f32.mxu1 %v14161_v29  ;;  %v14320_v62 = vld [vmem:[#allocation97_spill] sm:$0xff] }
 0x160   : > { %9882 = vmatprep.subr.bf16.mxu1 %v14170_v63  ;;  %8208 = vmatmul.mubr.f32.gmra.mrb[2].mxu0 %v14161_v29 }
 0x161   : > { %8209 = vmatprep.mubr.f32.mxu0 %v14162_v1 }
 0x162   : > { %8448 = vmatmul.mubr.f32.gmra.mrb[2].mxu1 %v14161_v29 }
 0x163   : > { %8449 = vmatprep.mubr.f32.mxu1 %v14162_v1 }
 0x164   : > { %8210 = vmatmul.mubr.f32.gmra.mrb[4].mxu0 %v14162_v1 }
 0x165   : > { %9692 = vmatpush3.bf16.xpose.msra.mxu0 %v14172_v3  ;;  %8211 = vmatprep.mubr.f32.mxu0 %v14163_v36 }
 0x166   : > { %9694 = vmatprep.subr.bf16.mxu0 %v14173_v33  ;;  %8450 = vmatmul.mubr.f32.gmra.mrb[4].mxu1 %v14162_v1 }
 0x167   : > { %9884 = vmatpush3.bf16.xpose.msra.mxu1 %v14174_v59  ;;  %8451 = vmatprep.mubr.f32.mxu1 %v14163_v36 }
 0x168   : > { %9886 = vmatprep.subr.bf16.mxu1 %v14175_v28  ;;  %8212 = vmatmul.mubr.f32.gmra.mrb[6].mxu0 %v14163_v36 }
 0x169   : > { %8245 = vmatprep.mubr.f32.mxu0 %v14139_v57 }
 0x16a   : > { %8452 = vmatmul.mubr.f32.gmra.mrb[6].mxu1 %v14163_v36 }
 0x16b   : > { %8485 = vmatprep.mubr.f32.mxu1 %v14139_v57 }
 0x16d   : > { %9696 = vmatpush3.bf16.xpose.msra.mxu0 %v14177_v7  ;;  %v2761_v7 = vld [vmem:[%s13630_s3 + $0x10] sm:$0xff] }
 0x16e   : > { %9698 = vmatprep.subr.bf16.mxu0 %v14178_v46 }
 0x16f   : > { %9888 = vmatpush3.bf16.xpose.msra.mxu1 %v14179_v44 }
 0x170   : > { %9890 = vmatprep.subr.bf16.mxu1 %v14180_v15  ;;  %v2795_v15 = vsel %vm2787_vm1, %v2761_v7, 0 }
 0x175   : > { %9700 = vmatpush3.bf16.xpose.msra.mxu0 %v14181_v61 }
 0x176   : > { %9702 = vmatprep.subr.bf16.mxu0 %v14182_v26 }
 0x177   : > { %9892 = vmatpush3.bf16.xpose.msra.mxu1 %v14183_v39 }
 0x178   : > { %9894 = vmatprep.subr.bf16.mxu1 %v14184_v42  ;;  %v2762_v42 = vld [vmem:[%s13630_s3 + $0x18] sm:$0xff] }
 0x179   : > { %v2798_v35 = vsel %vm2787_vm1, %v2762_v42, 0 }
 0x17a   : > { %v11955_v47 = vand.u32 4294901760, %v2798_v35 }
 0x17d   : > { %9704 = vmatpush3.bf16.xpose.msra.mxu0 %v14185_v8 }
 0x17e   : > { %9706 = vmatprep.subr.bf16.mxu0 %v14186_v23 }
 0x17f   : > { %9896 = vmatpush3.bf16.xpose.msra.mxu1 %v14187_v24  ;;  %v11931_v24 = vand.u32 4294901760, %v2795_v15 }
 0x180   : > { %9898 = vmatprep.subr.bf16.mxu1 %v14310_v9 }
 0x181   : > { %v11950_v2 = vsub.f32 %v2795_v15, %v11931_v24 }
 0x185   : > { %9708 = vmatpush3.bf16.xpose.msra.mxu0 %v14311_v0 }
 0x186   : > { %9710 = vmatprep.subr.bf16.mxu0 %v14312_v4  ;;  %v11964_v4 = vand.u32 4294901760, %v11950_v2 }
 0x187   : > { %9900 = vmatpush3.bf16.xpose.msra.mxu1 %v14313_v52 }
 0x188   : > { %9902 = vmatprep.subr.bf16.mxu1 %v14314_v18 }
 0x18d   : > { %9712 = vmatpush3.bf16.xpose.msra.mxu0 %v14315_v56 }
 0x18e   : > { %9714 = vmatprep.subr.bf16.mxu0 %v14316_v49 }
 0x18f   : > { %9904 = vmatpush3.bf16.xpose.msra.mxu1 %v14317_v5 }
 0x190   : > { %9906 = vmatprep.subr.bf16.mxu1 %v14318_v20  ;;  %v11968_v20 = vsub.f32 %v2798_v35, %v11955_v47 }
 0x195   : > { %9716 = vmatpush3.bf16.xpose.msra.mxu0 %v14319_v55 }
 0x197   : > { %9908 = vmatpush3.bf16.xpose.msra.mxu1 %v14320_v62 }
 0x19c   : > { %8246 = vmatmul.mubr.f32.vlgmr.msra.gmra.mrb[0].mxu0 %v14139_v57 }
 0x19d   : > { %8247 = vmatprep.mubr.f32.mxu0 %v14161_v29 }
 0x19e   : > { %8486 = vmatmul.mubr.f32.vlgmr.msra.gmra.mrb[0].mxu1 %v14139_v57  ;;  %v13859_v57 = vmov 0.0  }
 0x19f   : > { %8487 = vmatprep.mubr.f32.mxu1 %v14161_v29 }
 0x1a0   : > { %8248 = vmatmul.mubr.f32.gmra.mrb[2].mxu0 %v14161_v29 }
 0x1a1   : > { %8249 = vmatprep.mubr.f32.mxu0 %v14162_v1 }
 0x1a2   : > { %8488 = vmatmul.mubr.f32.gmra.mrb[2].mxu1 %v14161_v29  ;;  %v2759_v29 = vld [vmem:[%s13630_s3] sm:$0xff] }
 0x1a3   : > { %8489 = vmatprep.mubr.f32.mxu1 %v14162_v1  ;;  %v2789_v63 = vsel %vm2787_vm1, %v2759_v29, 0 }
 0x1a4   : > { %8250 = vmatmul.mubr.f32.gmra.mrb[4].mxu0 %v14162_v1  ;;  %v11903_v3 = vand.u32 4294901760, %v2789_v63 }
 0x1a5   : > { %8251 = vmatprep.mubr.f32.mxu0 %v14163_v36 }
 0x1a6   : > { %8490 = vmatmul.mubr.f32.gmra.mrb[4].mxu1 %v14162_v1  ;;  %v2760_v1 = vld [vmem:[%s13630_s3 + $0x8] sm:$0xff]  ;;  %v11909_v59 = vsub.f32 %v2789_v63, %v11903_v3 }
 0x1a7   : > { %8491 = vmatprep.mubr.f32.mxu1 %v14163_v36 }
 0x1a8   : > { %8252 = vmatmul.mubr.f32.gmra.mrb[6].mxu0 %v14163_v36  ;;  %v11918_v46 = vand.u32 4294901760, %v11909_v59  ;;  %v357_v44 = vpop.permute.xlu0 %356 }
 0x1a9   : > { %2872 = vmatprep.mubr.f32.mxu0 %v13859_v57 }
 0x1aa   : > { %8492 = vmatmul.mubr.f32.gmra.mrb[6].mxu1 %v14163_v36  ;;  %v2792_v36 = vsel %vm2787_vm1, %v2760_v1, 0  ;;  %v2876_v39 = vsub.f32 %v11909_v59, %v11918_v46  ;;  %v367_v52 = vpop.permute.xlu1 %366 }
 0x1ab   : > { %3562 = vmatprep.mubr.f32.mxu1 %v13859_v57  ;;  %v11906_v33 = vand.u32 4294901760, %v2792_v36 }
 0x1ac   : > { %v362_v50 = vpop.permute.xlu0 %361  ;;  %v11944_v32 = vand.u32 4294901760, %v2876_v39 }
 0x1ad   : > { %v11912_v28 = vsub.f32 %v2792_v36, %v11906_v33 }
 0x1af   : > { %v11922_v61 = vand.u32 4294901760, %v11912_v28 }
 0x1b1   : > { %v2887_v38 = vsub.f32 %v11912_v28, %v11922_v61 }
 0x1b3   : > { %v11958_v58 = vand.u32 4294901760, %v2887_v38 }
 0x26f   : > { %v1555_v26 = vpop.f32.mrb[0].mxu0 }
 0x270   : > { %v11929_v8 = vadd.f32 %v1555_v26, %v357_v44  ;;  %v1557_v23 = vpop.f32.mrb[1].mxu0 }
 0x271   : > { %v2557_v51 = vpop.f32.mrb[0].mxu1  ;;  %v11933_v43 = vadd.f32 %v1557_v23, %v357_v44 }
 0x272   : > { %v2583_v37 = vmul.f32 100.0, %v11929_v8  ;;  %v11936_v27 = vadd.f32 %v2557_v51, %v357_v44  ;;  %v2559_v60 = vpop.f32.mrb[1].mxu1 }
 0x273   : > { %v2584_v17 = vmul.f32 100.0, %v11933_v43  ;;  %v11942_v34 = vadd.f32 %v2559_v60, %v357_v44  ;;  %v1562_v45 = vpop.f32.mrb[2].mxu0 }
 0x274   : > { %v2615_v21 = vand.u32 2147483647, %v2583_v37  ;;  %v2585_v25 = vmul.f32 100.0, %v11936_v27  ;;  %v11947_v30 = vadd.f32 %v1562_v45, %v362_v50  ;;  %v1564_v10 = vpop.f32.mrb[3].mxu0  ;;  %v11981_v45 = vand.u32 4294901760, %v11968_v20 }
 0x275   : > { %v2616_v19 = vand.u32 2147483647, %v2584_v17  ;;  %v2586_v48 = vmul.f32 100.0, %v11942_v34  ;;  %v2564_v14 = vpop.f32.mrb[2].mxu1  ;;  %v11953_v54 = vadd.f32 %v1564_v10, %v362_v50 }
 0x276   : > { %v2631_v41 = vsub.f32 0.0, %v2615_v21  ;;  %v2617_v31 = vand.u32 2147483647, %v2585_v25  ;;  %v2587_v16 = vmul.f32 100.0, %v11947_v30  ;;  %v2566_v40 = vpop.f32.mrb[3].mxu1  ;;  %v11960_v6 = vadd.f32 %v2564_v14, %v362_v50  ;;  %v372_v21 = vpop.permute.xlu1 %371 }
 0x277   : > { %v2632_v11 = vsub.f32 0.0, %v2616_v19  ;;  %v2618_v53 = vand.u32 2147483647, %v2586_v48  ;;  %v2588_v13 = vmul.f32 100.0, %v11953_v54  ;;  %v1569_v12 = vpop.f32.mrb[4].mxu0  ;;  %v11970_v7 = vadd.f32 %v2566_v40, %v362_v50 }
 0x278   : > { %v2647_v22 = vmul.f32 1.442695, %v2631_v41  ;;  %v2633_v9 = vsub.f32 0.0, %v2617_v31  ;;  %v2619_v0 = vand.u32 2147483647, %v2587_v16  ;;  %v2589_v49 = vmul.f32 100.0, %v11960_v6 }
 0x279   : > { %v2649_v18 = vmul.f32 1.442695, %v2632_v11  ;;  %v2634_v56 = vsub.f32 0.0, %v2618_v53  ;;  %v2571_v5 = vpop.f32.mrb[4].mxu1  ;;  %v2620_v29 = vand.u32 2147483647, %v2588_v13  ;;  %v11972_v42 = vadd.f32 %v1569_v12, %v367_v52 }
 0x27a   : > { %10641 = vpow2.f32 %v2647_v22  ;;  %v2651_v55 = vmul.f32 1.442695, %v2633_v9  ;;  %v2635_v62 = vsub.f32 0.0, %v2619_v0  ;;  %v1571_v63 = vpop.f32.mrb[5].mxu0  ;;  %v2621_v36 = vand.u32 2147483647, %v2589_v49 }
 0x27b   : > { %10643 = vpow2.f32 %v2649_v18  ;;  %v2653_v1 = vmul.f32 1.442695, %v2634_v56  ;;  %v2573_v44 = vpop.f32.mrb[5].mxu1  ;;  %v1576_v15 = vpop.f32.mrb[6].mxu0  ;;  %v2636_v39 = vsub.f32 0.0, %v2620_v29  ;;  %v2590_v37 = vmul.f32 100.0, %v11970_v7 }
 0x27c   : > { %10645 = vpow2.f32 %v2651_v55  ;;  %v2655_v26 = vmul.f32 1.442695, %v2635_v62  ;;  %v11974_v23 = vpop.f32.mrb[7].mxu0  ;;  %v2637_v51 = vsub.f32 0.0, %v2621_v36  ;;  %v2591_v50 = vmul.f32 100.0, %v11972_v42 }
 0x27d   : > { %10647 = vpow2.f32 %v2653_v1  ;;  %v2578_v60 = vpop.f32.mrb[6].mxu1  ;;  %v2657_v35 = vmul.f32 1.442695, %v2636_v39  ;;  %v2622_v10 = vand.u32 2147483647, %v2590_v37  ;;  %v11983_v19 = vadd.f32 %v2571_v5, %v367_v52 }
 0x27e   : > { %10649 = vpow2.f32 %v2655_v26  ;;  %v2580_v17 = vpop.f32.mrb[7].mxu1  ;;  %v2659_v25 = vmul.f32 1.442695, %v2637_v51  ;;  %v11985_v48 = vadd.f32 %v1571_v63, %v367_v52  ;;  %v2623_v14 = vand.u32 2147483647, %v2591_v50 }
 0x27f   : > { %10651 = vpow2.f32 %v2657_v35  ;;  %v11987_v41 = vadd.f32 %v2573_v44, %v367_v52  ;;  %v11989_v31 = vadd.f32 %v1576_v15, %v372_v21  ;;  %v2599_v16 = vmax.f32 %v11929_v8, 0.0 }
 0x280   : > { %10653 = vpow2.f32 %v2659_v25  ;;  %v2638_v40 = vsub.f32 0.0, %v2622_v10  ;;  %v2593_v11 = vmul.f32 100.0, %v11983_v19  ;;  %v2600_v53 = vmax.f32 %v11933_v43, 0.0 }
 0x281   : > { %v2639_v13 = vsub.f32 0.0, %v2623_v14  ;;  %v2592_v12 = vmul.f32 100.0, %v11985_v48  ;;  %v2594_v22 = vmul.f32 100.0, %v11987_v41  ;;  %v2601_v9 = vmax.f32 %v11936_v27, 0.0 }
 0x282   : > { %v2661_v0 = vmul.f32 1.442695, %v2638_v40  ;;  %v2625_v52 = vand.u32 2147483647, %v2593_v11  ;;  %v2595_v18 = vmul.f32 100.0, %v11989_v31  ;;  %v12000_v36 = vadd.f32 %v2578_v60, %v372_v21 }
 0x283   : > { %v2663_v49 = vmul.f32 1.442695, %v2639_v13  ;;  %v2624_v5 = vand.u32 2147483647, %v2592_v12  ;;  %v2626_v55 = vand.u32 2147483647, %v2594_v22 }
 0x284   : > { %v10642_v56 = vpop.eup %10641  ;;  %10655 = vpow2.f32 %v2661_v0  ;;  %v2641_v1 = vsub.f32 0.0, %v2625_v52  ;;  %v2602_v26 = vmax.f32 %v11942_v34, 0.0  ;;  %v2603_v39 = vmax.f32 %v11947_v30, 0.0 }
 0x285   : > { %v10644_v29 = vpop.eup %10643  ;;  %v2679_v63 = vadd.f32 1.0, %v10642_v56  ;;  %10657 = vpow2.f32 %v2663_v49  ;;  %v2640_v35 = vsub.f32 0.0, %v2624_v5  ;;  %v2627_v50 = vand.u32 2147483647, %v2595_v18 }
 0x286   : > { %v10646_v44 = vpop.eup %10645  ;;  %v2680_v15 = vadd.f32 1.0, %v10644_v29  ;;  %v2667_v14 = vmul.f32 1.442695, %v2641_v1  ;;  %v2642_v40 = vsub.f32 0.0, %v2626_v55  ;;  %v2597_v13 = vmul.f32 100.0, %v12000_v36 }
 0x287   : > { %v10648_v51 = vpop.eup %10647  ;;  %10659 = vlog2.f32 %v2679_v63  ;;  %v2681_v37 = vadd.f32 1.0, %v10646_v44  ;;  %v2643_v11 = vsub.f32 0.0, %v2627_v50  ;;  %v2604_v22 = vmax.f32 %v11953_v54, 0.0 }
 0x288   : > { %v10650_v25 = vpop.eup %10649  ;;  %10661 = vlog2.f32 %v2680_v15  ;;  %v2682_v10 = vadd.f32 1.0, %v10648_v51  ;;  %v12007_v0 = vadd.f32 %v11974_v23, %v372_v21  ;;  %v12009_v52 = vadd.f32 %v2580_v17, %v372_v21 }
 0x289   : > { %10663 = vlog2.f32 %v2681_v37  ;;  %v2683_v60 = vadd.f32 1.0, %v10650_v25  ;;  %v10652_v12 = vpop.eup %10651  ;;  %v2665_v49 = vmul.f32 1.442695, %v2640_v35  ;;  %v2629_v5 = vand.u32 2147483647, %v2597_v13 }
 0x28a   : > { %10665 = vlog2.f32 %v2682_v10  ;;  %v10654_v18 = vpop.eup %10653  ;;  %v2684_v56 = vadd.f32 1.0, %v10652_v12  ;;  %v2669_v29 = vmul.f32 1.442695, %v2642_v40  ;;  %v2596_v63 = vmul.f32 100.0, %v12007_v0 }
 0x28b   : > { %10667 = vlog2.f32 %v2683_v60  ;;  %v2685_v55 = vadd.f32 1.0, %v10654_v18  ;;  %v2671_v1 = vmul.f32 1.442695, %v2643_v11  ;;  %v2645_v44 = vsub.f32 0.0, %v2629_v5 }
 0x28c   : > { %10669 = vpow2.f32 %v2667_v14  ;;  %v2598_v15 = vmul.f32 100.0, %v12009_v52  ;;  %v2605_v23 = vmax.f32 %v11960_v6, 0.0  ;;  %v2606_v17 = vmax.f32 %v11970_v7, 0.0 }
 0x28d   : > { %10671 = vlog2.f32 %v2684_v56  ;;  %v2628_v21 = vand.u32 2147483647, %v2596_v63  ;;  %v2607_v37 = vmax.f32 %v11972_v42, 0.0  ;;  %v2609_v35 = vmax.f32 %v11983_v19, 0.0 }
 0x28e   : > { %10673 = vlog2.f32 %v2685_v55  ;;  %v10656_v51 = vpop.eup %10655  ;;  %v2630_v50 = vand.u32 2147483647, %v2598_v15  ;;  %v2675_v14 = vmul.f32 1.442695, %v2645_v44  ;;  %v2608_v13 = vmax.f32 %v11985_v48, 0.0 }
 0x28f   : > { %10675 = vpow2.f32 %v2665_v49  ;;  %v10658_v25 = vpop.eup %10657  ;;  %v2686_v10 = vadd.f32 1.0, %v10656_v51  ;;  %v2644_v40 = vsub.f32 0.0, %v2628_v21  ;;  %v2610_v5 = vmax.f32 %v11987_v41, 0.0 }
 0x290   : > { %10677 = vpow2.f32 %v2669_v29  ;;  %v2687_v11 = vadd.f32 1.0, %v10658_v25  ;;  %v2646_v12 = vsub.f32 0.0, %v2630_v50  ;;  %v2611_v15 = vmax.f32 %v11989_v31, 0.0 }
 0x291   : > { %v10660_v60 = vpop.eup %10659  ;;  %10679 = vpow2.f32 %v2671_v1  ;;  %v2673_v55 = vmul.f32 1.442695, %v2644_v40 }
 0x292   : > { %v10662_v18 = vpop.eup %10661  ;;  %v2696_v56 = vmul.f32 0.6931472, %v10660_v60  ;;  %10681 = vlog2.f32 %v2686_v10  ;;  %v2677_v29 = vmul.f32 1.442695, %v2646_v12 }
 0x293   : > { %v10664_v63 = vpop.eup %10663  ;;  %v2698_v49 = vmul.f32 0.6931472, %v10662_v18  ;;  %10683 = vlog2.f32 %v2687_v11 }
 0x294   : > { %v10666_v44 = vpop.eup %10665  ;;  %v2727_v21 = vmul.f32 0.01, %v2696_v56  ;;  %v2700_v51 = vmul.f32 0.6931472, %v10664_v63  ;;  %10685 = vpow2.f32 %v2675_v14 }
 0x295   : > { %v10668_v1 = vpop.eup %10667  ;;  %v2728_v50 = vmul.f32 0.01, %v2698_v49  ;;  %v2702_v62 = vmul.f32 0.6931472, %v10666_v44  ;;  %10687 = vpow2.f32 %v2673_v55 }
 0x296   : > { %v10670_v60 = vpop.eup %10669  ;;  %v12024_v40 = vadd.f32 %v2727_v21, %v2599_v16  ;;  %v2729_v11 = vmul.f32 0.01, %v2700_v51  ;;  %v2704_v18 = vmul.f32 0.6931472, %v10668_v1  ;;  %10689 = vpow2.f32 %v2677_v29 }
 0x297   : > { %v10672_v12 = vpop.eup %10671  ;;  %v2744_v56 = vadd.f32 %v2728_v50, %v2600_v53  ;;  %v2730_v63 = vmul.f32 0.01, %v2702_v62  ;;  %v2689_v14 = vadd.f32 1.0, %v10670_v60 }
 0x298   : > { %v10674_v44 = vpop.eup %10673  ;;  %v2802_v38 = vand.u32 4294901760, %v12024_v40  ;;  %v2745_v55 = vadd.f32 %v2729_v11, %v2601_v9  ;;  %v2731_v8 = vmul.f32 0.01, %v2704_v18  ;;  %v2706_v16 = vmul.f32 0.6931472, %v10672_v12 }
 0x299   : > { %v10676_v21 = vpop.eup %10675  ;;  %v2746_v29 = vadd.f32 %v2730_v63, %v2602_v26  ;;  %v2708_v51 = vmul.f32 0.6931472, %v10674_v44  ;;  %10691 = vlog2.f32 %v2689_v14  ;;  %v2800_v43 = vand.u32 4294901760, %v2744_v56 }
 0x29a   : > { %v10678_v53 = vpop.eup %10677  ;;  %v12035_v62 = vsub.f32 %v12024_v40, %v2802_v38  ;;  %v3492_v1 = vand.u32 4294901760, %v2745_v55  ;;  %v2747_v50 = vadd.f32 %v2731_v8, %v2603_v39  ;;  %v2732_v60 = vmul.f32 0.01, %v2706_v16 }
 0x29b   : > { %v10680_v27 = vpop.eup %10679  ;;  %v2733_v9 = vmul.f32 0.01, %v2708_v51  ;;  %v2688_v11 = vadd.f32 1.0, %v10676_v21  ;;  %v2690_v18 = vadd.f32 1.0, %v10678_v53  ;;  %v12039_v12 = vsub.f32 %v2744_v56, %v2800_v43 }
 0x29c   : > { %v10682_v34 = vpop.eup %10681  ;;  %v13862_v26 = vand.u32 4294901760, %v12035_v62  ;;  %v12042_v63 = vsub.f32 %v2745_v55, %v3492_v1  ;;  %v2806_v14 = vand.u32 4294901760, %v2747_v50  ;;  %v2748_v40 = vadd.f32 %v2732_v60, %v2604_v22 }
 0x29d   : > { %v10684_v44 = vpop.eup %10683  ;;  %v2749_v30 = vadd.f32 %v2733_v9, %v2605_v23  ;;  %v2710_v39 = vmul.f32 0.6931472, %v10682_v34  ;;  %10693 = vlog2.f32 %v2688_v11  ;;  %v2691_v8 = vadd.f32 1.0, %v10680_v27 }
 0x29e   : > { %v10686_v16 = vpop.eup %10685  ;;  %v12049_v21 = vsub.f32 %v2747_v50, %v2806_v14  ;;  %v2712_v51 = vmul.f32 0.6931472, %v10684_v44  ;;  %10695 = vlog2.f32 %v2690_v18  ;;  %v2804_v9 = vand.u32 4294901760, %v2748_v40 }
 0x29f   : > { %v10688_v55 = vpop.eup %10687  ;;  %v3496_v53 = vand.u32 4294901760, %v2749_v30  ;;  %v2734_v57 = vmul.f32 0.01, %v2710_v39  ;;  %10697 = vlog2.f32 %v2691_v8  ;;  %v2693_v54 = vadd.f32 1.0, %v10686_v16 }
 0x2a0   : > { %v10690_v22 = vpop.eup %10689  ;;  %v13861_v60 = vand.u32 4294901760, %v12049_v21  ;;  %v2735_v6 = vmul.f32 0.01, %v2712_v51  ;;  %v2692_v23 = vadd.f32 1.0, %v10688_v55  ;;  %v12060_v34 = vpack.c.bf16 %v2804_v9, %v2800_v43 }
 0x2a1   : > { %v12052_v11 = vsub.f32 %v2749_v30, %v3496_v53  ;;  %v2750_v27 = vadd.f32 %v2734_v57, %v2606_v17  ;;  %10699 = vlog2.f32 %v2693_v54  ;;  %v2694_v50 = vadd.f32 1.0, %v10690_v22 }
 0x2a2   : > { %v12058_v18 = vadd.f32 %v2735_v6, %v2607_v37  ;;  %10701 = vlog2.f32 %v2692_v23  ;;  %v12062_v44 = vsub.f32 %v2748_v40, %v2804_v9  ;;  %v3490_v30 = vand.u32 4294901760, %v2746_v29  ;;  %9910 = vmatprep.subr.bf16.mxu0 %v12060_v34 }
 0x2a3   : > { %v10692_v39 = vpop.eup %10691  ;;  %10703 = vlog2.f32 %v2694_v50  ;;  %v3494_v16 = vand.u32 4294901760, %v2750_v27  ;;  %v12067_v17 = vpack.c.bf16 %v2806_v14, %v2802_v38  ;;  %v12069_v42 = vpack.c.bf16 %v3496_v53, %v3492_v1 }
 0x2a4   : > { %v13864_v7 = vand.u32 4294901760, %v12058_v18  ;;  %v2716_v57 = vmul.f32 0.6931472, %v10692_v39  ;;  %v12073_v43 = vsub.f32 %v2746_v29, %v3490_v30  ;;  %v13863_v51 = vand.u32 4294901760, %v12039_v12 }
 0x2a5   : > { %v12071_v37 = vpack.c.bf16 %v3494_v16, %v3490_v30  ;;  %v12075_v40 = vsub.f32 %v2750_v27, %v3494_v16  ;;  %9912 = vmatpush1.bf16.msra.mxu0 %v12067_v17  ;;  %v13865_v38 = vand.u32 4294901760, %v12062_v44  ;;  %v2926_v1 = vsub.f32 %v12035_v62, %v13862_v26 }
 0x2a6   : > { %v12081_v55 = vsub.f32 %v12058_v18, %v13864_v7  ;;  %v2737_v54 = vmul.f32 0.01, %v2716_v57  ;;  %v2920_v14 = vsub.f32 %v12039_v12, %v13863_v51  ;;  %v13866_v53 = vand.u32 4294901760, %v12073_v43 }
 0x2a7   : > { %v10694_v29 = vpop.eup %10693  ;;  %9958 = vmatprep.subr.bf16.mxu1 %v12071_v37  ;;  %v13867_v22 = vand.u32 4294901760, %v12075_v40  ;;  %v2938_v6 = vsub.f32 %v12049_v21, %v13861_v60  ;;  %v2932_v39 = vsub.f32 %v12062_v44, %v13865_v38  ;;  %v2927_v38 = vand.u32 4294901760, %v2926_v1 }
 0x2a8   : > { %v10696_v23 = vpop.eup %10695  ;;  %v2753_v27 = vadd.f32 %v2737_v54, %v2609_v35  ;;  %v2714_v50 = vmul.f32 0.6931472, %v10694_v29  ;;  %9960 = vmatpush1.bf16.msra.mxu1 %v12069_v42  ;;  %v2921_v57 = vand.u32 4294901760, %v2920_v14  ;;  %v3610_v60 = vsub.f32 %v12073_v43, %v13866_v53 }
 0x2a9   : > { %v10698_v30 = vpop.eup %10697  ;;  %v2718_v16 = vmul.f32 0.6931472, %v10696_v23  ;;  %v3622_v26 = vsub.f32 %v12075_v40, %v13867_v22  ;;  %v2933_v29 = vand.u32 4294901760, %v2932_v39 }
 0x2aa   : > { %v3500_v19 = vand.u32 4294901760, %v2753_v27  ;;  %v2736_v35 = vmul.f32 0.01, %v2714_v50  ;;  %v2720_v54 = vmul.f32 0.6931472, %v10698_v30  ;;  %v3611_v8 = vand.u32 4294901760, %v3610_v60 }
 0x2ab   : > { %v10700_v51 = vpop.eup %10699  ;;  %v2738_v9 = vmul.f32 0.01, %v2718_v16  ;;  %v3623_v7 = vand.u32 4294901760, %v3622_v26  ;;  %v9917_v30 = vpack.c.bf16 %v2933_v29, %v2921_v57 }
 0x2ac   : > { %v10702_v49 = vpop.eup %10701  ;;  %v12110_v23 = vsub.f32 %v2753_v27, %v3500_v19  ;;  %v2752_v14 = vadd.f32 %v2736_v35, %v2608_v13  ;;  %v2739_v53 = vmul.f32 0.01, %v2720_v54  ;;  %v2724_v10 = vmul.f32 0.6931472, %v10700_v51 }
 0x2ad   : > { %v10704_v56 = vpop.eup %10703  ;;  %v2754_v22 = vadd.f32 %v2738_v9, %v2610_v5  ;;  %v2722_v50 = vmul.f32 0.6931472, %v10702_v49  ;;  %v9965_v39 = vpack.c.bf16 %v3623_v7, %v3611_v8  ;;  %v2939_v13 = vand.u32 4294901760, %v2938_v6 }
 0x2ae   : > { %v13868_v16 = vand.u32 4294901760, %v12110_v23  ;;  %v2755_v26 = vadd.f32 %v2739_v53, %v2611_v15  ;;  %v2741_v60 = vmul.f32 0.01, %v2724_v10  ;;  %v2726_v1 = vmul.f32 0.6931472, %v10704_v56 }
 0x2af   : > { %v2740_v27 = vmul.f32 0.01, %v2722_v50  ;;  %v2808_v25 = vand.u32 4294901760, %v2752_v14  ;;  %v3498_v48 = vand.u32 4294901760, %v2754_v22  ;;  %v14321_v51 = vmax.f32 %v12000_v36, 0.0 }
 0x2b0   : > { %v2814_v35 = vand.u32 4294901760, %v2755_v26  ;;  %v2742_v41 = vmul.f32 0.01, %v2726_v1  ;;  %v14322_v5 = vand.u32 4294901760, %v12042_v63  ;;  %v14323_v8 = vmax.f32 %v12007_v0, 0.0 }
 0x2b1   : > { %v2757_v54 = vadd.f32 %v2741_v60, %v14321_v51  ;;  %v12126_v31 = vsub.f32 %v2752_v14, %v2808_v25  ;;  %v12128_v15 = vsub.f32 %v2754_v22, %v3498_v48  ;;  %v9919_v10 = vpack.c.bf16 %v2939_v13, %v2927_v38 }
 0x2b2   : > { %v3616_v49 = vsub.f32 %v12042_v63, %v14322_v5  ;;  %v2756_v7 = vadd.f32 %v2740_v27, %v14323_v8  ;;  %v12130_v56 = vsub.f32 %v2755_v26, %v2814_v35  ;;  %v14324_v6 = vmax.f32 %v12009_v52, 0.0 }
 0x2b3   : > { %v3504_v53 = vand.u32 4294901760, %v2757_v54  ;;  %v14325_v9 = vand.u32 4294901760, %v12058_v18  ;;  %v14326_v0 = vand.u32 4294901760, %v12052_v11  ;;  %v2943_v22 = vand.u32 4294901760, %v12126_v31 }
 0x2b4   : > { %v2758_v36 = vadd.f32 %v2742_v41, %v14324_v6  ;;  %v2812_v29 = vand.u32 4294901760, %v2756_v7  ;;  %v3617_v50 = vand.u32 4294901760, %v3616_v49  ;;  %v13869_v38 = vand.u32 4294901760, %v12130_v56 }
 0x2b5   : > { %v12136_v57 = vpack.c.bf16 %v2814_v35, %v14325_v9  ;;  %v3628_v14 = vsub.f32 %v12052_v11, %v14326_v0  ;;  %v12143_v26 = vsub.f32 %v2757_v54, %v3504_v53  ;;  %v12145_v1 = vpack.c.bf16 %v3504_v53, %v3500_v19 }
 0x2b6   : > { %v3502_v60 = vand.u32 4294901760, %v2758_v36  ;;  %v12147_v52 = vpack.c.bf16 %v2812_v29, %v2808_v25  ;;  %v12149_v18 = vsub.f32 %v2756_v7, %v2812_v29  ;;  %v2944_v13 = vsub.f32 %v12126_v31, %v2943_v22 }
 0x2b7   : > { %v3629_v27 = vand.u32 4294901760, %v3628_v14  ;;  %v3651_v35 = vand.u32 4294901760, %v12143_v26  ;;  %v3633_v54 = vand.u32 4294901760, %v12128_v15  ;;  %v14327_v49 = vand.u32 4294901760, %v12081_v55 }
 0x2b8   : > { %v12155_v51 = vpack.c.bf16 %v3502_v60, %v3498_v48  ;;  %v12157_v41 = vsub.f32 %v2758_v36, %v3502_v60  ;;  %9914 = vmatprep.subr.bf16.mxu0 %v12147_v52  ;;  %v2945_v25 = vand.u32 4294901760, %v2944_v13  ;;  %v2955_v5 = vand.u32 4294901760, %v12149_v18 }
 0x2b9   : > { %v9967_v19 = vpack.c.bf16 %v3629_v27, %v3617_v50  ;;  %v2950_v8 = vsub.f32 %v12081_v55, %v14327_v49  ;;  %9916 = vmatpush1.bf16.msra.mxu0 %v12136_v57  ;;  %v3634_v48 = vsub.f32 %v12128_v15, %v3633_v54  ;;  %v2962_v53 = vsub.f32 %v12130_v56, %v13869_v38 }
 0x2ba   : > { %9962 = vmatprep.subr.bf16.mxu1 %v12155_v51  ;;  %v3645_v7 = vand.u32 4294901760, %v12157_v41  ;;  %v3640_v6 = vsub.f32 %v12110_v23, %v13868_v16  ;;  %9918 = vmatprep.subr.bf16.mxu0 %v9917_v30  ;;  %v2956_v36 = vsub.f32 %v12149_v18, %v2955_v5  ;;  %v3652_v29 = vsub.f32 %v12143_v26, %v3651_v35 }
 0x2bb   : > { %9964 = vmatpush1.bf16.msra.mxu1 %v12145_v1  ;;  %v2951_v9 = vand.u32 4294901760, %v2950_v8  ;;  %v9925_v50 = vpack.c.bf16 %v12062_v44, %v12039_v12  ;;  %v3635_v0 = vand.u32 4294901760, %v3634_v48  ;;  %v2963_v60 = vand.u32 4294901760, %v2962_v53 }
 0x2bc   : > { %9966 = vmatprep.subr.bf16.mxu1 %v9965_v39  ;;  %v3646_v14 = vsub.f32 %v12157_v41, %v3645_v7  ;;  %v3641_v27 = vand.u32 4294901760, %v3640_v6  ;;  %2878 = vmatmul.mubr.f32.vlgmr.msra.gmra.mrb[8].mxu0 %v11944_v32  ;;  %v2957_v13 = vand.u32 4294901760, %v2956_v36  ;;  %v3653_v49 = vand.u32 4294901760, %v3652_v29 }
 0x2bd   : > { %v9973_v30 = vpack.c.bf16 %v12075_v40, %v12073_v43  ;;  %v9927_v8 = vpack.c.bf16 %v12049_v21, %v12035_v62  ;;  %9920 = vmatpush1.bf16.msra.mxu0 %v9919_v10  ;;  %v9923_v39 = vpack.c.bf16 %v2963_v60, %v2951_v9  ;;  %v9975_v48 = vpack.c.bf16 %v12052_v11, %v12042_v63 }
 0x2be   : > { %3568 = vmatmul.mubr.f32.vlgmr.msra.gmra.mrb[8].mxu1 %v11944_v32  ;;  %v3647_v16 = vand.u32 4294901760, %v3646_v14  ;;  %v9929_v53 = vpack.c.bf16 %v12149_v18, %v12126_v31  ;;  %v14328_v6 = vmov 0.0   ;;  %v9921_v36 = vpack.c.bf16 %v2957_v13, %v2945_v25 }
 0x2bf   : > { %9968 = vmatpush1.bf16.msra.mxu1 %v9967_v19  ;;  %2883 = vmatprep.mubr.f32.mxu0 %v14328_v6  ;;  %v9971_v29 = vpack.c.bf16 %v3653_v49, %v3641_v27  ;;  %v9977_v38 = vpack.c.bf16 %v12157_v41, %v12128_v15  ;;  %v9931_v10 = vpack.c.bf16 %v12130_v56, %v12081_v55  ;;  %v14329_v14 = vand.u32 4294901760, %v12039_v12 }
 0x2c0   : > { %3573 = vmatprep.mubr.f32.mxu1 %v14328_v6  ;;  %v9969_v32 = vpack.c.bf16 %v3647_v16, %v3635_v0  ;;  %v9979_v9 = vpack.c.bf16 %v12143_v26, %v12110_v23  ;;  %v14330_v18 = vand.u32 4294901760, %v12062_v44  ;;  %2889 = vmatmul.mubr.f32.gmra.mrb[10].mxu0 %v11958_v58  ;;  %v14331_v15 = vand.u32 4294901760, %v12073_v43 }
 0x2c1   : > { %9922 = vmatprep.subr.bf16.mxu0 %v9921_v36  ;;  %v14332_v41 = vand.u32 4294901760, %v12075_v40  ;;  %v14333_v25 = vand.u32 4294901760, %v12035_v62  ;;  %v14334_v0 = vand.u32 4294901760, %v12049_v21  ;;  %v14335_v12 = vand.u32 4294901760, %v12042_v63  ;;  %2894 = vmatprep.mubr.f32.mxu0 %v14328_v6 }
 0x2c2   : > { %v12203_v19 = vpack.c.bf16 %v14330_v18, %v14329_v14  ;;  %v14336_v44 = vand.u32 4294901760, %v12052_v11  ;;  %3579 = vmatmul.mubr.f32.gmra.mrb[10].mxu1 %v11958_v58  ;;  %9970 = vmatprep.subr.bf16.mxu1 %v9969_v32  ;;  %v14337_v43 = vsub.f32 %v11950_v2, %v11964_v4  ;;  %v12228_v62 = vpack.c.bf16 %v2955_v5, %v2943_v22 }
 0x2c3   : > { %v9989_v16 = vpack.c.bf16 %v14332_v41, %v14331_v15  ;;  %v12214_v60 = vpack.c.bf16 %v14334_v0, %v14333_v25  ;;  %v12230_v21 = vpack.c.bf16 %v3645_v7, %v3633_v54  ;;  %v14338_v27 = vand.u32 4294901760, %v12081_v55  ;;  %9924 = vmatpush1.bf16.msra.mxu0 %v9923_v39  ;;  %9972 = vmatpush1.bf16.msra.mxu1 %v9971_v29 }
 0x2c4   : > { %v12220_v26 = vpack.c.bf16 %v14336_v44, %v14335_v12  ;;  %v2899_v40 = vand.u32 4294901760, %v14337_v43  ;;  %v14339_v63 = vand.u32 4294901760, %v12130_v56  ;;  %v14340_v58 = vand.u32 4294901760, %v12110_v23  ;;  %9926 = vmatprep.subr.bf16.mxu0 %v9925_v50  ;;  %9974 = vmatprep.subr.bf16.mxu1 %v9973_v30 }
 0x2c5   : > { %3584 = vmatprep.mubr.f32.mxu1 %v14328_v6  ;;  %v14341_v55 = vsub.f32 %v11968_v20, %v11981_v45 }
 0x2c6   : > { %v12236_v11 = vpack.c.bf16 %v14339_v63, %v14338_v27  ;;  %v12240_v13 = vpack.c.bf16 %v3651_v35, %v14340_v58  ;;  %2900 = vmatmul.mubr.f32.gmra.mrb[12].mxu0 %v2899_v40  ;;  %3590 = vmatmul.mubr.f32.gmra.mrb[12].mxu1 %v2899_v40 }
 0x2c7   : > { %v2910_v31 = vand.u32 4294901760, %v14341_v55  ;;  %2905 = vmatprep.mubr.f32.mxu0 %v14328_v6  ;;  %3595 = vmatprep.mubr.f32.mxu1 %v14328_v6 }
 0x2ca   : > { %2911 = vmatmul.mubr.f32.gmra.mrb[14].mxu0 %v2910_v31  ;;  %3601 = vmatmul.mubr.f32.gmra.mrb[14].mxu1 %v2910_v31 }
 0x2cb   : > { %3021 = vmatprep.mubr.f32.mxu0 %v14328_v6  ;;  %3711 = vmatprep.mubr.f32.mxu1 %v14328_v6 }
 0x2ce   : > { %3023 = vmatmul.mubr.f32.vlgmr.msra.gmra.mrb[8].mxu0 %v11903_v3  ;;  %3713 = vmatmul.mubr.f32.vlgmr.msra.gmra.mrb[8].mxu1 %v11903_v3 }
 0x2cf   : > { %9928 = vmatpush1.bf16.msra.mxu0 %v9927_v8  ;;  %9976 = vmatpush1.bf16.msra.mxu1 %v9975_v48 }
 0x2d0   : > { %9930 = vmatprep.subr.bf16.mxu0 %v9929_v53  ;;  %9978 = vmatprep.subr.bf16.mxu1 %v9977_v38 }
 0x2d1   : > { %3028 = vmatprep.mubr.f32.mxu0 %v14328_v6  ;;  %3718 = vmatprep.mubr.f32.mxu1 %v14328_v6 }
 0x2d2   : > { %3030 = vmatmul.mubr.f32.gmra.mrb[10].mxu0 %v11906_v33  ;;  %3720 = vmatmul.mubr.f32.gmra.mrb[10].mxu1 %v11906_v33 }
 0x2d3   : > { %9932 = vmatpush1.bf16.msra.mxu0 %v9931_v10  ;;  %9980 = vmatpush1.bf16.msra.mxu1 %v9979_v9 }
 0x2d4   : > { %9934 = vmatprep.subr.bf16.mxu0 %v12060_v34  ;;  %9982 = vmatprep.subr.bf16.mxu1 %v12071_v37 }
 0x2d5   : > { %3035 = vmatprep.mubr.f32.mxu0 %v14328_v6  ;;  %3725 = vmatprep.mubr.f32.mxu1 %v14328_v6 }
 0x2d6   : > { %3037 = vmatmul.mubr.f32.gmra.mrb[12].mxu0 %v11931_v24  ;;  %3727 = vmatmul.mubr.f32.gmra.mrb[12].mxu1 %v11931_v24 }
 0x2d7   : > { %3042 = vmatprep.mubr.f32.mxu0 %v14328_v6  ;;  %3732 = vmatprep.mubr.f32.mxu1 %v14328_v6 }
 0x2da   : > { %3044 = vmatmul.mubr.f32.gmra.mrb[14].mxu0 %v11955_v47  ;;  %3734 = vmatmul.mubr.f32.gmra.mrb[14].mxu1 %v11955_v47 }
 0x2db   : > { %3130 = vmatprep.mubr.f32.mxu0 %v14328_v6  ;;  %3820 = vmatprep.mubr.f32.mxu1 %v14328_v6 }
 0x2de   : > { %3133 = vmatmul.mubr.f32.vlgmr.msra.gmra.mrb[8].mxu0 %v11909_v59  ;;  %3823 = vmatmul.mubr.f32.vlgmr.msra.gmra.mrb[8].mxu1 %v11909_v59 }
 0x2df   : > { %9936 = vmatpush1.bf16.msra.mxu0 %v12067_v17  ;;  %9984 = vmatpush1.bf16.msra.mxu1 %v12069_v42 }
 0x2e0   : > { %9938 = vmatprep.subr.bf16.mxu0 %v12147_v52  ;;  %9986 = vmatprep.subr.bf16.mxu1 %v12155_v51 }
 0x2e1   : > { %3138 = vmatprep.mubr.f32.mxu0 %v14328_v6  ;;  %3828 = vmatprep.mubr.f32.mxu1 %v14328_v6 }
 0x2e2   : > { %3141 = vmatmul.mubr.f32.gmra.mrb[10].mxu0 %v11912_v28  ;;  %3831 = vmatmul.mubr.f32.gmra.mrb[10].mxu1 %v11912_v28 }
 0x2e3   : > { %9940 = vmatpush1.bf16.msra.mxu0 %v12136_v57  ;;  %9988 = vmatpush1.bf16.msra.mxu1 %v12145_v1 }
 0x2e4   : > { %9942 = vmatprep.subr.bf16.mxu0 %v12203_v19  ;;  %9990 = vmatprep.subr.bf16.mxu1 %v9989_v16 }
 0x2e5   : > { %3146 = vmatprep.mubr.f32.mxu0 %v14328_v6  ;;  %3836 = vmatprep.mubr.f32.mxu1 %v14328_v6 }
 0x2e6   : > { %3149 = vmatmul.mubr.f32.gmra.mrb[12].mxu0 %v11950_v2  ;;  %3839 = vmatmul.mubr.f32.gmra.mrb[12].mxu1 %v11950_v2  ;;  %v12364_v2 = vpop.permute.xlu1 %2774 }
 0x2e7   : > { %3154 = vmatprep.mubr.f32.mxu0 %v14328_v6  ;;  %3844 = vmatprep.mubr.f32.mxu1 %v14328_v6 }
 0x2ea   : > { %3157 = vmatmul.mubr.f32.gmra.mrb[14].mxu0 %v11968_v20  ;;  %3847 = vmatmul.mubr.f32.gmra.mrb[14].mxu1 %v11968_v20  ;;  %v12397_v18 = vpop.permute.xlu1 %2784 }
 0x2eb   : > { %3235 = vmatprep.mubr.f32.mxu0 %v14328_v6  ;;  %3925 = vmatprep.mubr.f32.mxu1 %v14328_v6 }
 0x2ee   : > { %3239 = vmatmul.mubr.f32.vlgmr.msra.gmra.mrb[8].mxu0 %v11918_v46  ;;  %3929 = vmatmul.mubr.f32.vlgmr.msra.gmra.mrb[8].mxu1 %v11918_v46 }
 0x2ef   : > { %9944 = vmatpush1.bf16.msra.mxu0 %v12214_v60  ;;  %9992 = vmatpush1.bf16.msra.mxu1 %v12220_v26 }
 0x2f0   : > { %9946 = vmatprep.subr.bf16.mxu0 %v12228_v62  ;;  %9994 = vmatprep.subr.bf16.mxu1 %v12230_v21 }
 0x2f1   : > { %3244 = vmatprep.mubr.f32.mxu0 %v14328_v6  ;;  %3934 = vmatprep.mubr.f32.mxu1 %v14328_v6 }
 0x2f2   : > { %3248 = vmatmul.mubr.f32.gmra.mrb[10].mxu0 %v11922_v61  ;;  %3938 = vmatmul.mubr.f32.gmra.mrb[10].mxu1 %v11922_v61 }
 0x2f3   : > { %9948 = vmatpush1.bf16.msra.mxu0 %v12236_v11  ;;  %9996 = vmatpush1.bf16.msra.mxu1 %v12240_v13 }
 0x2f4   : > { %9950 = vmatprep.subr.bf16.mxu0 %v12060_v34  ;;  %9998 = vmatprep.subr.bf16.mxu1 %v12071_v37 }
 0x2f5   : > { %3253 = vmatprep.mubr.f32.mxu0 %v14328_v6  ;;  %3943 = vmatprep.mubr.f32.mxu1 %v14328_v6 }
 0x2f6   : > { %3257 = vmatmul.mubr.f32.gmra.mrb[12].mxu0 %v11964_v4  ;;  %3947 = vmatmul.mubr.f32.gmra.mrb[12].mxu1 %v11964_v4 }
 0x2f7   : > { %3262 = vmatprep.mubr.f32.mxu0 %v14328_v6  ;;  %3952 = vmatprep.mubr.f32.mxu1 %v14328_v6 }
 0x2fa   : > { %3266 = vmatmul.mubr.f32.gmra.mrb[14].mxu0 %v11981_v45  ;;  %3956 = vmatmul.mubr.f32.gmra.mrb[14].mxu1 %v11981_v45 }
 0x2fb   : > { %3360 = vmatprep.mubr.f32.mxu0 %v14328_v6  ;;  %4050 = vmatprep.mubr.f32.mxu1 %v14328_v6 }
 0x2fe   : > { %3362 = vmatmul.mubr.f32.vlgmr.msra.gmra.mrb[8].mxu0 %v11903_v3  ;;  %4052 = vmatmul.mubr.f32.vlgmr.msra.gmra.mrb[8].mxu1 %v11903_v3 }
 0x2ff   : > { %9952 = vmatpush1.bf16.msra.mxu0 %v12067_v17  ;;  %10000 = vmatpush1.bf16.msra.mxu1 %v12069_v42 }
 0x300   : > { %9954 = vmatprep.subr.bf16.mxu0 %v12147_v52  ;;  %10002 = vmatprep.subr.bf16.mxu1 %v12155_v51 }
 0x301   : > { %3367 = vmatprep.mubr.f32.mxu0 %v14328_v6  ;;  %4057 = vmatprep.mubr.f32.mxu1 %v14328_v6 }
 0x302   : > { %3369 = vmatmul.mubr.f32.gmra.mrb[10].mxu0 %v11906_v33  ;;  %4059 = vmatmul.mubr.f32.gmra.mrb[10].mxu1 %v11906_v33 }
 0x303   : > { %9956 = vmatpush1.bf16.msra.mxu0 %v12136_v57  ;;  %10004 = vmatpush1.bf16.msra.mxu1 %v12145_v1 }
 0x304   : > { %3374 = vmatprep.mubr.f32.mxu0 %v14328_v6  ;;  %4064 = vmatprep.mubr.f32.mxu1 %v14328_v6 }
 0x306   : > { %3376 = vmatmul.mubr.f32.gmra.mrb[12].mxu0 %v11931_v24  ;;  %4066 = vmatmul.mubr.f32.gmra.mrb[12].mxu1 %v11931_v24 }
 0x307   : > { %3381 = vmatprep.mubr.f32.mxu0 %v14328_v6  ;;  %4071 = vmatprep.mubr.f32.mxu1 %v14328_v6 }
 0x30a   : > { %3383 = vmatmul.mubr.f32.gmra.mrb[14].mxu0 %v11955_v47  ;;  %4073 = vmatmul.mubr.f32.gmra.mrb[14].mxu1 %v11955_v47 }
 0x30b   : > { %3461 = vmatprep.mubr.f32.mxu0 %v14328_v6  ;;  %4151 = vmatprep.mubr.f32.mxu1 %v14328_v6 }
 0x30e   : > { %3463 = vmatmul.mubr.f32.vlgmr.msra.gmra.mrb[8].mxu0 %v11903_v3  ;;  %4153 = vmatmul.mubr.f32.vlgmr.msra.gmra.mrb[8].mxu1 %v11903_v3  ;;  %v12352_v3 = vpop.permute.xlu0 %2769 }
 0x30f   : > { %3468 = vmatprep.mubr.f32.mxu0 %v14328_v6  ;;  %4158 = vmatprep.mubr.f32.mxu1 %v14328_v6 }
 0x312   : > { %3470 = vmatmul.mubr.f32.gmra.mrb[10].mxu0 %v11906_v33  ;;  %4160 = vmatmul.mubr.f32.gmra.mrb[10].mxu1 %v11906_v33  ;;  %v12375_v56 = vpop.permute.xlu0 %2779 }
 0x313   : > { %3475 = vmatprep.mubr.f32.mxu0 %v14328_v6  ;;  %4165 = vmatprep.mubr.f32.mxu1 %v14328_v6 }
 0x316   : > { %3477 = vmatmul.mubr.f32.gmra.mrb[12].mxu0 %v11931_v24  ;;  %4167 = vmatmul.mubr.f32.gmra.mrb[12].mxu1 %v11931_v24 }
 0x317   : > { %3482 = vmatprep.mubr.f32.mxu0 %v14328_v6  ;;  %4172 = vmatprep.mubr.f32.mxu1 %v14328_v6 }
 0x31a   : > { %3484 = vmatmul.mubr.f32.gmra.mrb[14].mxu0 %v11955_v47  ;;  %4174 = vmatmul.mubr.f32.gmra.mrb[14].mxu1 %v11955_v47 }
 0x3e1   : > { %v3464_v59 = vpop.f32.mrb[8].mxu0  ;;  %v12354_v33 = vpop.f32.mrb[8].mxu1 }
 0x3e2   : > { %v12357_v28 = vadd.f32 %v3464_v59, %v12352_v3  ;;  %v3466_v46 = vpop.f32.mrb[9].mxu0  ;;  %v12359_v61 = vpop.f32.mrb[9].mxu1 }
 0x3e3   : > { %v12362_v24 = vadd.f32 %v3466_v46, %v12352_v3 }
 0x3e4   : > { %v4180_v4 = vmul.f32 100.0, %v12357_v28 }
 0x3e5   : > { %v4181_v47 = vmul.f32 100.0, %v12362_v24  ;;  %v3471_v20 = vpop.f32.mrb[10].mxu0  ;;  %v12368_v45 = vpop.f32.mrb[10].mxu1 }
 0x3e6   : > { %v4212_v34 = vand.u32 2147483647, %v4180_v4  ;;  %v12371_v17 = vadd.f32 %v3471_v20, %v12364_v2  ;;  %v3473_v42 = vpop.f32.mrb[11].mxu0  ;;  %v12373_v37 = vpop.f32.mrb[11].mxu1 }
 0x3e7   : > { %v4213_v23 = vand.u32 2147483647, %v4181_v47  ;;  %v12379_v38 = vadd.f32 %v3473_v42, %v12364_v2 }
 0x3e8   : > { %v4228_v57 = vsub.f32 0.0, %v4212_v34  ;;  %v4184_v22 = vmul.f32 100.0, %v12371_v17 }
 0x3e9   : > { %v4229_v1 = vsub.f32 0.0, %v4213_v23  ;;  %v3478_v52 = vpop.f32.mrb[12].mxu0  ;;  %v12381_v35 = vpop.f32.mrb[12].mxu1  ;;  %v4185_v49 = vmul.f32 100.0, %v12379_v38 }
 0x3ea   : > { %v4244_v51 = vmul.f32 1.442695, %v4228_v57  ;;  %v4216_v54 = vand.u32 2147483647, %v4184_v22  ;;  %v12384_v5 = vadd.f32 %v3478_v52, %v12375_v56  ;;  %v3480_v30 = vpop.f32.mrb[13].mxu0  ;;  %v12387_v8 = vpop.f32.mrb[13].mxu1 }
 0x3eb   : > { %v4246_v7 = vmul.f32 1.442695, %v4229_v1  ;;  %v4217_v6 = vand.u32 2147483647, %v4185_v49  ;;  %v12395_v14 = vadd.f32 %v3480_v30, %v12375_v56  ;;  %v4196_v22 = vmax.f32 %v12357_v28, 0.0 }
 0x3ec   : > { %10705 = vpow2.f32 %v4244_v51  ;;  %v4232_v50 = vsub.f32 0.0, %v4216_v54  ;;  %v4188_v36 = vmul.f32 100.0, %v12384_v5  ;;  %v4197_v54 = vmax.f32 %v12362_v24, 0.0 }
 0x3ed   : > { %v3485_v39 = vpop.f32.mrb[14].mxu0  ;;  %v12389_v48 = vpop.f32.mrb[14].mxu1  ;;  %10707 = vpow2.f32 %v4246_v7  ;;  %v4233_v10 = vsub.f32 0.0, %v4217_v6  ;;  %v4189_v41 = vmul.f32 100.0, %v12395_v14 }
 0x3ee   : > { %v4252_v53 = vmul.f32 1.442695, %v4232_v50  ;;  %v3487_v29 = vpop.f32.mrb[15].mxu0  ;;  %v12392_v32 = vpop.f32.mrb[15].mxu1  ;;  %v4220_v9 = vand.u32 2147483647, %v4188_v36  ;;  %v12401_v16 = vadd.f32 %v3485_v39, %v12397_v18 }
 0x3ef   : > { %v4254_v19 = vmul.f32 1.442695, %v4233_v10  ;;  %v4221_v0 = vand.u32 2147483647, %v4189_v41  ;;  %v12405_v62 = vadd.f32 %v3487_v29, %v12397_v18  ;;  %v4200_v39 = vmax.f32 %v12371_v17, 0.0 }
 0x3f0   : > { %10709 = vpow2.f32 %v4252_v53  ;;  %v4236_v15 = vsub.f32 0.0, %v4220_v9  ;;  %v4192_v60 = vmul.f32 100.0, %v12401_v16  ;;  %v4204_v17 = vmax.f32 %v12384_v5, 0.0  ;;  %v12424_v5 = vld [vmem:[%s13632_s5] sm:$0xff] }
 0x3f1   : > { %10711 = vpow2.f32 %v4254_v19  ;;  %v4237_v26 = vsub.f32 0.0, %v4221_v0  ;;  %v4193_v13 = vmul.f32 100.0, %v12405_v62 }
 0x3f2   : > { %v4260_v25 = vmul.f32 1.442695, %v4236_v15  ;;  %v4224_v40 = vand.u32 2147483647, %v4192_v60  ;;  %v4201_v15 = vmax.f32 %v12379_v38, 0.0 }
 0x3f3   : > { %v4262_v11 = vmul.f32 1.442695, %v4237_v26  ;;  %v4225_v31 = vand.u32 2147483647, %v4193_v13  ;;  %v12437_v13 = vadd.f32 %v12368_v45, %v12364_v2 }
 0x3f4   : > { %10713 = vpow2.f32 %v4260_v25  ;;  %v4240_v58 = vsub.f32 0.0, %v4224_v40  ;;  %v12415_v40 = vadd.f32 %v12354_v33, %v12352_v3  ;;  %v4688_v33 = vand.u32 4294901760, %v12424_v5 }
 0x3f5   : > { %v4241_v47 = vsub.f32 0.0, %v4225_v31 }
 0x3f6   : > { %v10706_v12 = vpop.eup %10705  ;;  %v4268_v4 = vmul.f32 1.442695, %v4240_v58 }
 0x3f7   : > { %v4276_v44 = vadd.f32 1.0, %v10706_v12  ;;  %v10708_v43 = vpop.eup %10707  ;;  %v4270_v42 = vmul.f32 1.442695, %v4241_v47 }
 0x3f8   : > { %v4277_v21 = vadd.f32 1.0, %v10708_v43 }
 0x3f9   : > { %10715 = vlog2.f32 %v4276_v44 }
 0x3fa   : > { %v10710_v27 = vpop.eup %10709  ;;  %10717 = vlog2.f32 %v4277_v21  ;;  %v12419_v21 = vadd.f32 %v12359_v61, %v12352_v3  ;;  %v4182_v3 = vmul.f32 100.0, %v12415_v40 }
 0x3fb   : > { %v4280_v63 = vadd.f32 1.0, %v10710_v27  ;;  %v10712_v55 = vpop.eup %10711  ;;  %v12429_v27 = vld [vmem:[%s13632_s5 + $0x8] sm:$0xff] }
 0x3fc   : > { %v4281_v59 = vadd.f32 1.0, %v10712_v55  ;;  %v4691_v58 = vand.u32 4294901760, %v12429_v27  ;;  %v4183_v45 = vmul.f32 100.0, %v12419_v21 }
 0x3fd   : > { %10719 = vlog2.f32 %v4280_v63  ;;  %v4205_v63 = vmax.f32 %v12395_v14, 0.0 }
 0x3fe   : > { %10721 = vpow2.f32 %v4262_v11  ;;  %v10714_v46 = vpop.eup %10713  ;;  %v12443_v31 = vpack.c.bf16 %v4691_v58, %v4688_v33 }
 0x3ff   : > { %10723 = vlog2.f32 %v4281_v59  ;;  %v4284_v20 = vadd.f32 1.0, %v10714_v46  ;;  %v12448_v59 = vld [vmem:[%s13632_s5 + $0x10] sm:$0xff]  ;;  %v12453_v46 = vld [vmem:[%s13632_s5 + $0x18] sm:$0xff] }
 0x400   : > { %10030 = vmatprep.subr.bf16.mxu0 %v12443_v31  ;;  %v4697_v47 = vand.u32 4294901760, %v12453_v46  ;;  %10006 = vmatprep.subr.bf16.mxu1 %v12443_v31 }
 0x401   : > { %10725 = vlog2.f32 %v4284_v20  ;;  %10032 = vmatpush3.bf16.msra.mxu0 %v12443_v31  ;;  %10008 = vmatpush3.bf16.msra.mxu1 %v12443_v31 }
 0x402   : > { %10727 = vpow2.f32 %v4268_v4  ;;  %v4694_v4 = vand.u32 4294901760, %v12448_v59 }
 0x403   : > { %v10716_v34 = vpop.eup %10715  ;;  %10729 = vpow2.f32 %v4270_v42  ;;  %v12461_v42 = vadd.f32 %v12373_v37, %v12364_v2 }
 0x404   : > { %v4293_v23 = vmul.f32 0.6931472, %v10716_v34  ;;  %v10718_v57 = vpop.eup %10717  ;;  %v4214_v34 = vand.u32 2147483647, %v4182_v3  ;;  %v12476_v2 = vpack.c.bf16 %v4697_v47, %v4694_v4 }
 0x405   : > { %v4295_v52 = vmul.f32 0.6931472, %v10718_v57 }
 0x406   : > { %v4324_v1 = vmul.f32 0.01, %v4293_v23  ;;  %v4208_v23 = vmax.f32 %v12401_v16, 0.0  ;;  %v4209_v16 = vmax.f32 %v12405_v62, 0.0  ;;  %10034 = vmatprep.subr.bf16.mxu0 %v12476_v2  ;;  %10010 = vmatprep.subr.bf16.mxu1 %v12476_v2  ;;  %v12490_v62 = vadd.f32 %v12389_v48, %v12397_v18 }
 0x407   : > { %v10720_v51 = vpop.eup %10719  ;;  %v4325_v49 = vmul.f32 0.01, %v4295_v52  ;;  %10036 = vmatpush3.bf16.msra.mxu0 %v12476_v2  ;;  %10012 = vmatpush3.bf16.msra.mxu1 %v12476_v2 }
 0x408   : > { %v4301_v7 = vmul.f32 0.6931472, %v10720_v51  ;;  %v4340_v50 = vadd.f32 %v4324_v1, %v4196_v22  ;;  %v10722_v30 = vpop.eup %10721  ;;  %v4186_v22 = vmul.f32 100.0, %v12437_v13  ;;  %v12469_v1 = vadd.f32 %v12381_v35, %v12375_v56 }
 0x409   : > { %v4285_v6 = vadd.f32 1.0, %v10722_v30  ;;  %v4341_v36 = vadd.f32 %v4325_v49, %v4197_v54  ;;  %v10724_v29 = vpop.eup %10723  ;;  %v4230_v54 = vsub.f32 0.0, %v4214_v34  ;;  %v4215_v35 = vand.u32 2147483647, %v4183_v45 }
 0x40a   : > { %v4328_v53 = vmul.f32 0.01, %v4301_v7  ;;  %4367 = vxpose.xlu0.b32.start [1/4] (short) %v4340_v50, 128  ;;  %v4303_v9 = vmul.f32 0.6931472, %v10724_v29  ;;  %v4187_v7 = vmul.f32 100.0, %v12461_v42  ;;  %v12484_v50 = vadd.f32 %v12387_v8, %v12375_v56 }
 0x40b   : > { %10731 = vlog2.f32 %v4285_v6  ;;  %4399 = vxpose.xlu1.b32.start [1/4] (short) %v4341_v36, 128  ;;  %v10726_v28 = vpop.eup %10725  ;;  %v4218_v49 = vand.u32 2147483647, %v4186_v22  ;;  %v4190_v30 = vmul.f32 100.0, %v12469_v1  ;;  %v12496_v56 = vadd.f32 %v12392_v32, %v12397_v18 }
 0x40c   : > { %v4344_v10 = vadd.f32 %v4328_v53, %v4200_v39  ;;  %v10728_v19 = vpop.eup %10727  ;;  %v4329_v24 = vmul.f32 0.01, %v4303_v9  ;;  %v4309_v41 = vmul.f32 0.6931472, %v10726_v28  ;;  %v4231_v53 = vsub.f32 0.0, %v4215_v35 }
 0x40d   : > { %v4288_v25 = vadd.f32 1.0, %v10728_v19  ;;  %v10730_v12 = vpop.eup %10729  ;;  %v4219_v6 = vand.u32 2147483647, %v4187_v7  ;;  %v4191_v36 = vmul.f32 100.0, %v12484_v50  ;;  %v4248_v8 = vmul.f32 1.442695, %v4230_v54 }
 0x40e   : > { %4368 = vxpose.xlu0.b32.cont [2/4] (short) %v4344_v10, 128  ;;  %v4345_v0 = vadd.f32 %v4329_v24, %v4201_v15  ;;  %v4332_v60 = vmul.f32 0.01, %v4309_v41  ;;  %v4289_v26 = vadd.f32 1.0, %v10730_v12  ;;  %v4234_v29 = vsub.f32 0.0, %v4218_v49 }
 0x40f   : > { %10733 = vlog2.f32 %v4288_v25  ;;  %v4222_v10 = vand.u32 2147483647, %v4190_v30  ;;  %v4194_v9 = vmul.f32 100.0, %v12490_v62  ;;  %v4250_v28 = vmul.f32 1.442695, %v4231_v53 }
 0x410   : > { %v4348_v44 = vadd.f32 %v4332_v60, %v4204_v17  ;;  %4400 = vxpose.xlu1.b32.cont [2/4] (short) %v4345_v0, 128  ;;  %10735 = vlog2.f32 %v4289_v26  ;;  %v4235_v48 = vsub.f32 0.0, %v4219_v6  ;;  %v4223_v19 = vand.u32 2147483647, %v4191_v36 }
 0x411   : > { %v4195_v15 = vmul.f32 100.0, %v12496_v56  ;;  %10737 = vpow2.f32 %v4248_v8  ;;  %v4256_v24 = vmul.f32 1.442695, %v4234_v29  ;;  %v4238_v41 = vsub.f32 0.0, %v4222_v10 }
 0x412   : > { %4369 = vxpose.xlu0.b32.cont [3/4] (short) %v4348_v44, 128  ;;  %v4226_v25 = vand.u32 2147483647, %v4194_v9  ;;  %10739 = vpow2.f32 %v4250_v28  ;;  %v4258_v0 = vmul.f32 1.442695, %v4235_v48  ;;  %v4239_v17 = vsub.f32 0.0, %v4223_v19 }
 0x413   : > { %v4227_v60 = vand.u32 2147483647, %v4195_v15  ;;  %10741 = vpow2.f32 %v4256_v24  ;;  %v4264_v32 = vmul.f32 1.442695, %v4238_v41  ;;  %v12508_v54 = vsub.f32 %v12429_v27, %v4691_v58 }
 0x414   : > { %v4242_v18 = vsub.f32 0.0, %v4226_v25  ;;  %10743 = vpow2.f32 %v4258_v0  ;;  %v4266_v12 = vmul.f32 1.442695, %v4239_v17  ;;  %v4198_v48 = vmax.f32 %v12415_v40, 0.0 }
 0x415   : > { %v10732_v43 = vpop.eup %10731  ;;  %v4243_v44 = vsub.f32 0.0, %v4227_v60  ;;  %10745 = vpow2.f32 %v4264_v32  ;;  %v5406_v49 = vand.u32 4294901760, %v12508_v54  ;;  %v4199_v60 = vmax.f32 %v12419_v21, 0.0 }
 0x416   : > { %v4311_v38 = vmul.f32 0.6931472, %v10732_v43  ;;  %v4272_v26 = vmul.f32 1.442695, %v4242_v18  ;;  %10747 = vpow2.f32 %v4266_v12  ;;  %v4202_v32 = vmax.f32 %v12437_v13, 0.0 }
 0x417   : > { %v4207_v13 = vmax.f32 %v12484_v50, 0.0  ;;  %v12536_v50 = vsub.f32 %v12453_v46, %v4697_v47 }
 0x418   : > { %v4333_v11 = vmul.f32 0.01, %v4311_v38  ;;  %v4274_v38 = vmul.f32 1.442695, %v4243_v44  ;;  %10749 = vpow2.f32 %v4272_v26 }
 0x419   : > { %v10734_v61 = vpop.eup %10733 }
 0x41a   : > { %v4349_v55 = vadd.f32 %v4333_v11, %v4205_v63  ;;  %v4317_v14 = vmul.f32 0.6931472, %v10734_v61  ;;  %v10736_v20 = vpop.eup %10735  ;;  %10751 = vpow2.f32 %v4274_v38 }
 0x41b   : > { %v4319_v52 = vmul.f32 0.6931472, %v10736_v20  ;;  %v10738_v43 = vpop.eup %10737 }
 0x41c   : > { %4401 = vxpose.xlu1.b32.cont [3/4] (short) %v4349_v55, 128  ;;  %v4336_v57 = vmul.f32 0.01, %v4317_v14  ;;  %v10740_v63 = vpop.eup %10739  ;;  %v4278_v11 = vadd.f32 1.0, %v10738_v43 }
 0x41d   : > { %v4337_v51 = vmul.f32 0.01, %v4319_v52  ;;  %v10742_v3 = vpop.eup %10741  ;;  %v4279_v61 = vadd.f32 1.0, %v10740_v63  ;;  %v4203_v63 = vmax.f32 %v12461_v42, 0.0  ;;  %v4211_v42 = vmax.f32 %v12496_v56, 0.0 }
 0x41e   : > { %v4352_v37 = vadd.f32 %v4336_v57, %v4208_v23  ;;  %v10744_v55 = vpop.eup %10743  ;;  %10753 = vlog2.f32 %v4278_v11  ;;  %v4282_v14 = vadd.f32 1.0, %v10742_v3  ;;  %v4206_v11 = vmax.f32 %v12469_v1, 0.0 }
 0x41f   : > { %v4353_v39 = vadd.f32 %v4337_v51, %v4209_v16  ;;  %v10746_v45 = vpop.eup %10745  ;;  %10755 = vlog2.f32 %v4279_v61  ;;  %v4283_v20 = vadd.f32 1.0, %v10744_v55  ;;  %v12503_v51 = vsub.f32 %v12424_v5, %v4688_v33 }
 0x420   : > { %4370 = vxpose.xlu0.b32.end [4/4] (short) %v4352_v37, 128  ;;  %v10748_v34 = vpop.eup %10747  ;;  %10757 = vlog2.f32 %v4282_v14  ;;  %v4286_v23 = vadd.f32 1.0, %v10746_v45  ;;  %v5407_v5 = vsub.f32 %v12508_v54, %v5406_v49  ;;  %v4210_v45 = vmax.f32 %v12490_v62, 0.0 }
 0x421   : > { %4402 = vxpose.xlu1.b32.end [4/4] (short) %v4353_v39, 128  ;;  %10759 = vlog2.f32 %v4283_v20  ;;  %v4287_v22 = vadd.f32 1.0, %v10748_v34  ;;  %v5399_v7 = vand.u32 4294901760, %v12503_v51 }
 0x422   : > { %v10750_v57 = vpop.eup %10749  ;;  %10761 = vlog2.f32 %v4286_v23  ;;  %v5408_v58 = vand.u32 4294901760, %v5407_v5 }
 0x423   : > { %v4290_v37 = vadd.f32 1.0, %v10750_v57  ;;  %10763 = vlog2.f32 %v4287_v22  ;;  %v5400_v6 = vsub.f32 %v12503_v51, %v5399_v7  ;;  %v12514_v33 = vpack.c.bf16 %v5406_v49, %v5399_v7 }
 0x424   : > { %v10752_v52 = vpop.eup %10751  ;;  %v12531_v57 = vsub.f32 %v12448_v59, %v4694_v4 }
 0x425   : > { %v4291_v35 = vadd.f32 1.0, %v10752_v52  ;;  %10765 = vlog2.f32 %v4290_v37  ;;  %v5401_v27 = vand.u32 4294901760, %v5400_v6  ;;  %10038 = vmatprep.subr.bf16.mxu0 %v12514_v33  ;;  %v5420_v37 = vand.u32 4294901760, %v12536_v50 }
 0x426   : > { %v5413_v52 = vand.u32 4294901760, %v12531_v57 }
 0x427   : > { %10767 = vlog2.f32 %v4291_v35  ;;  %v12517_v28 = vpack.c.bf16 %v5408_v58, %v5401_v27  ;;  %v5421_v49 = vsub.f32 %v12536_v50, %v5420_v37 }
 0x428   : > { %v10754_v16 = vpop.eup %10753  ;;  %v5414_v46 = vsub.f32 %v12531_v57, %v5413_v52  ;;  %v10041_v27 = vpack.c.bf16 %v5420_v37, %v5413_v52 }
 0x429   : > { %v10756_v30 = vpop.eup %10755  ;;  %v4297_v39 = vmul.f32 0.6931472, %v10754_v16  ;;  %10014 = vmatprep.subr.bf16.mxu1 %v12517_v28 }
 0x42a   : > { %v10758_v53 = vpop.eup %10757  ;;  %v4299_v36 = vmul.f32 0.6931472, %v10756_v30 }
 0x42b   : > { %v10760_v8 = vpop.eup %10759  ;;  %v4305_v29 = vmul.f32 0.6931472, %v10758_v53  ;;  %v4326_v10 = vmul.f32 0.01, %v4297_v39 }
 0x42c   : > { %v10762_v9 = vpop.eup %10761  ;;  %v4307_v19 = vmul.f32 0.6931472, %v10760_v8  ;;  %v4327_v15 = vmul.f32 0.01, %v4299_v36  ;;  %v5415_v36 = vand.u32 4294901760, %v5414_v46 }
 0x42d   : > { %v10764_v24 = vpop.eup %10763  ;;  %v4330_v41 = vmul.f32 0.01, %v4305_v29  ;;  %v4313_v25 = vmul.f32 0.6931472, %v10762_v9  ;;  %v4342_v0 = vadd.f32 %v4326_v10, %v4198_v48  ;;  %v5422_v10 = vand.u32 4294901760, %v5421_v49 }
 0x42e   : > { %v4331_v18 = vmul.f32 0.01, %v4307_v19  ;;  %v4315_v12 = vmul.f32 0.6931472, %v10764_v24  ;;  %v4343_v44 = vadd.f32 %v4327_v15, %v4199_v60 }
 0x42f   : > { %v10766_v17 = vpop.eup %10765  ;;  %v4346_v43 = vadd.f32 %v4330_v41, %v4202_v32  ;;  %v4334_v40 = vmul.f32 0.01, %v4313_v25 }
 0x430   : > { %v4321_v38 = vmul.f32 0.6931472, %v10766_v17  ;;  %v4347_v3 = vadd.f32 %v4331_v18, %v4203_v63  ;;  %v4335_v61 = vmul.f32 0.01, %v4315_v12  ;;  %v10017_v17 = vpack.c.bf16 %v5422_v10, %v5415_v36 }
 0x431   : > { %v10768_v26 = vpop.eup %10767  ;;  %v4350_v21 = vadd.f32 %v4334_v40, %v4206_v11 }
 0x432   : > { %v4323_v55 = vmul.f32 0.6931472, %v10768_v26  ;;  %v4338_v14 = vmul.f32 0.01, %v4321_v38  ;;  %v4351_v20 = vadd.f32 %v4335_v61, %v4207_v13 }
 0x434   : > { %v4339_v34 = vmul.f32 0.01, %v4323_v55  ;;  %v4354_v23 = vadd.f32 %v4338_v14, %v4210_v45 }
 0x436   : > { %v4355_v1 = vadd.f32 %v4339_v34, %v4211_v42 }
 0x451   : > { %4431 = vxpose.xlu0.b32.start [1/4] (short) %v4342_v0, 128 }
 0x452   : > { %4463 = vxpose.xlu1.b32.start [1/4] (short) %v4343_v44, 128 }
 0x455   : > { %4432 = vxpose.xlu0.b32.cont [2/4] (short) %v4346_v43, 128 }
 0x456   : > { %4464 = vxpose.xlu1.b32.cont [2/4] (short) %v4347_v3, 128 }
 0x459   : > { %4433 = vxpose.xlu0.b32.cont [3/4] (short) %v4350_v21, 128 }
 0x45a   : > { %4465 = vxpose.xlu1.b32.cont [3/4] (short) %v4351_v20, 128 }
 0x45d   : > { %4434 = vxpose.xlu0.b32.end [4/4] (short) %v4354_v23, 128 }
 0x45e   : > { %4466 = vxpose.xlu1.b32.end [4/4] (short) %v4355_v1, 128 }
 0x494   : > { %v4383_v62 = vpop.trf.xlu0 }
 0x495   : > { %v4496_v22 = vsel %vm2787_vm1, %v4383_v62, 0  ;;  %v12543_v16 = vpop.trf.xlu1 }
 0x496   : > { %v12540_v56 = vand.u32 4294901760, %v4496_v22 }
 0x498   : > { %v12546_v35 = vsub.f32 %v4496_v22, %v12540_v56  ;;  %v4384_v59 = vpop.trf.xlu0 }
 0x499   : > { %v4499_v4 = vsel %vm2787_vm1, %v4384_v59, 0  ;;  %v12554_v30 = vpop.trf.xlu1 }
 0x49a   : > { %14342 = vst [vmem:[#allocation87_spill] sm:$0xff] %v12546_v35  ;;  %v12550_v47 = vand.u32 4294901760, %v4499_v4  ;;  %v4758_v7 = vand.u32 4294901760, %v12546_v35 }
 0x49c   : > { %v12557_v39 = vsub.f32 %v4499_v4, %v12550_v47  ;;  %v4385_v53 = vpop.trf.xlu0  ;;  %9221 = vmatprep.mubr.f32.mxu0 %v4758_v7  ;;  %v4759_v6 = vsub.f32 %v12546_v35, %v4758_v7 }
 0x49d   : > { %v4502_v5 = vsel %vm2787_vm1, %v4385_v53, 0  ;;  %v12564_v9 = vpop.trf.xlu1 }
 0x49e   : > { %14343 = vst [vmem:[#allocation8_spill] sm:$0xff] %v12557_v39  ;;  %v4768_v58 = vand.u32 4294901760, %v12557_v39  ;;  %v12562_v8 = vand.u32 4294901760, %v4502_v5  ;;  %v4760_v29 = vand.u32 4294901760, %v4759_v6 }
 0x4a0   : > { %v4769_v48 = vsub.f32 %v12557_v39, %v4768_v58  ;;  %v12568_v19 = vsub.f32 %v4502_v5, %v12562_v8  ;;  %v4386_v15 = vpop.trf.xlu0  ;;  %8909 = vmatprep.mubr.f32.mxu1 %v4760_v29  ;;  %9222 = vmatmul.mubr.f32.vlgmr.msra.gmra.mrb[16].mxu0 %v4768_v58 }
 0x4a1   : > { %v4505_v24 = vsel %vm2787_vm1, %v4386_v15, 0  ;;  %10040 = vmatpush3.bf16.msra.mxu0 %v12514_v33  ;;  %v12575_v60 = vpop.trf.xlu1 }
 0x4a2   : > { %14344 = vst [vmem:[#allocation10_spill] sm:$0xff] %v12568_v19  ;;  %v4770_v41 = vand.u32 4294901760, %v4769_v48  ;;  %v12572_v25 = vand.u32 4294901760, %v4505_v24  ;;  %v4778_v0 = vand.u32 4294901760, %v12568_v19  ;;  %10042 = vmatprep.subr.bf16.mxu0 %v10041_v27 }
 0x4a4   : > { %v12578_v32 = vsub.f32 %v4505_v24, %v12572_v25  ;;  %v4387_v18 = vpop.trf.xlu0  ;;  %8910 = vmatmul.mubr.f32.vlgmr.msra.gmra.mrb[16].mxu1 %v4770_v41  ;;  %9224 = vmatprep.mubr.f32.mxu0 %v4778_v0  ;;  %v4779_v12 = vsub.f32 %v12568_v19, %v4778_v0 }
 0x4a5   : > { %v4508_v44 = vsel %vm2787_vm1, %v4387_v18, 0  ;;  %10016 = vmatpush3.bf16.msra.mxu1 %v12517_v28  ;;  %10044 = vmatpush3.bf16.msra.mxu0 %v10041_v27  ;;  %v12587_v40 = vpop.trf.xlu1 }
 0x4a6   : > { %14345 = vst [vmem:[#allocation2_spill] sm:$0xff] %v12578_v32  ;;  %v12583_v33 = vand.u32 4294901760, %v4508_v44  ;;  %v4780_v26 = vand.u32 4294901760, %v4779_v12  ;;  %v4788_v43 = vand.u32 4294901760, %v12578_v32  ;;  %10018 = vmatprep.subr.bf16.mxu1 %v10017_v17  ;;  %10046 = vmatprep.subr.bf16.mxu0 %v12443_v31 }
 0x4a8   : > { %v12590_v38 = vsub.f32 %v4508_v44, %v12583_v33  ;;  %v4388_v63 = vpop.trf.xlu0  ;;  %8912 = vmatprep.mubr.f32.mxu1 %v4780_v26  ;;  %9225 = vmatmul.mubr.f32.gmra.mrb[18].mxu0 %v4788_v43  ;;  %v4789_v11 = vsub.f32 %v12578_v32, %v4788_v43 }
 0x4a9   : > { %v4511_v28 = vsel %vm2787_vm1, %v4388_v63, 0  ;;  %10020 = vmatpush3.bf16.msra.mxu1 %v10017_v17  ;;  %v12597_v21 = vpop.trf.xlu1 }
 0x4aa   : > { %14346 = vst [vmem:[#allocation65_spill] sm:$0xff] %v12590_v38  ;;  %v12594_v3 = vand.u32 4294901760, %v4511_v28  ;;  %v4790_v61 = vand.u32 4294901760, %v4789_v11  ;;  %v4798_v55 = vand.u32 4294901760, %v12590_v38 }
 0x4ac   : > { %v12600_v14 = vsub.f32 %v4511_v28, %v12594_v3  ;;  %v4389_v13 = vpop.trf.xlu0  ;;  %8913 = vmatmul.mubr.f32.gmra.mrb[18].mxu1 %v4790_v61  ;;  %9227 = vmatprep.mubr.f32.mxu0 %v4798_v55  ;;  %v4799_v45 = vsub.f32 %v12590_v38, %v4798_v55 }
 0x4ad   : > { %v4514_v20 = vsel %vm2787_vm1, %v4389_v13, 0  ;;  %v12607_v1 = vpop.trf.xlu1 }
 0x4ae   : > { %14347 = vst [vmem:[#allocation68_spill] sm:$0xff] %v12600_v14  ;;  %v12604_v34 = vand.u32 4294901760, %v4514_v20  ;;  %v4800_v23 = vand.u32 4294901760, %v4799_v45  ;;  %v4808_v42 = vand.u32 4294901760, %v12600_v14 }
 0x4b0   : > { %v12610_v62 = vsub.f32 %v4514_v20, %v12604_v34  ;;  %v4390_v22 = vpop.trf.xlu0  ;;  %8915 = vmatprep.mubr.f32.mxu1 %v4800_v23  ;;  %9228 = vmatmul.mubr.f32.gmra.mrb[20].mxu0 %v4808_v42  ;;  %v4809_v52 = vsub.f32 %v12600_v14, %v4808_v42 }
 0x4b1   : > { %v4517_v37 = vsel %vm2787_vm1, %v4390_v22, 0  ;;  %v12617_v7 = vpop.trf.xlu1 }
 0x4b2   : > { %14348 = vst [vmem:[#allocation75_spill] sm:$0xff] %v12610_v62  ;;  %v12614_v59 = vand.u32 4294901760, %v4517_v37  ;;  %v4810_v4 = vand.u32 4294901760, %v4809_v52  ;;  %v4818_v46 = vand.u32 4294901760, %v12610_v62 }
 0x4b4   : > { %v12620_v49 = vsub.f32 %v4517_v37, %v12614_v59  ;;  %v4391_v53 = vpop.trf.xlu0  ;;  %8916 = vmatmul.mubr.f32.gmra.mrb[20].mxu1 %v4810_v4  ;;  %9230 = vmatprep.mubr.f32.mxu0 %v4818_v46  ;;  %v4819_v6 = vsub.f32 %v12610_v62, %v4818_v46 }
 0x4b5   : > { %v4520_v5 = vsel %vm2787_vm1, %v4391_v53, 0  ;;  %v12627_v29 = vpop.trf.xlu1  ;;  %v12665_v53 = vpack.c.bf16 %v12508_v54, %v12503_v51 }
 0x4b6   : > { %14349 = vst [vmem:[#allocation77_spill] sm:$0xff] %v12620_v49  ;;  %v12624_v36 = vand.u32 4294901760, %v4520_v5  ;;  %v4820_v27 = vand.u32 4294901760, %v4819_v6  ;;  %v4828_v58 = vand.u32 4294901760, %v12620_v49 }
 0x4b7   : > { %10022 = vmatprep.subr.bf16.mxu1 %v12665_v53 }
 0x4b8   : > { %v12630_v10 = vsub.f32 %v4520_v5, %v12624_v36  ;;  %v4392_v48 = vpop.trf.xlu0  ;;  %8918 = vmatprep.mubr.f32.mxu1 %v4820_v27  ;;  %9231 = vmatmul.mubr.f32.gmra.mrb[22].mxu0 %v4828_v58  ;;  %v4829_v15 = vsub.f32 %v12620_v49, %v4828_v58 }
 0x4b9   : > { %v4523_v24 = vsel %vm2787_vm1, %v4392_v48, 0  ;;  %v12637_v18 = vpop.trf.xlu1 }
 0x4ba   : > { %14350 = vst [vmem:[#allocation80_spill] sm:$0xff] %v12630_v10  ;;  %v12634_v41 = vand.u32 4294901760, %v4523_v24  ;;  %v4830_v0 = vand.u32 4294901760, %v4829_v15  ;;  %v4838_v17 = vand.u32 4294901760, %v12630_v10  ;;  %v4544_v15 = vsel %vm2787_vm1, %v12543_v16, 0 }
 0x4bc   : > { %v12640_v12 = vsub.f32 %v4523_v24, %v12634_v41  ;;  %v4393_v44 = vpop.trf.xlu0  ;;  %8919 = vmatmul.mubr.f32.gmra.mrb[22].mxu1 %v4830_v0  ;;  %9233 = vmatprep.mubr.f32.mxu0 %v4838_v17  ;;  %v4839_v26 = vsub.f32 %v12630_v10, %v4838_v17  ;;  %v4547_v17 = vsel %vm2787_vm1, %v12554_v30, 0 }
 0x4bd   : > { %v4526_v43 = vsel %vm2787_vm1, %v4393_v44, 0  ;;  %v12647_v61 = vpop.trf.xlu1 }
 0x4be   : > { %14351 = vst [vmem:[#allocation82_spill] sm:$0xff] %v12640_v12  ;;  %v12644_v63 = vand.u32 4294901760, %v4526_v43  ;;  %v4840_v11 = vand.u32 4294901760, %v4839_v26  ;;  %v4848_v28 = vand.u32 4294901760, %v12640_v12 }
 0x4c0   : > { %v12650_v55 = vsub.f32 %v4526_v43, %v12644_v63  ;;  %v4394_v13 = vpop.trf.xlu0  ;;  %8921 = vmatprep.mubr.f32.mxu1 %v4840_v11  ;;  %9234 = vmatmul.mubr.f32.gmra.mrb[24].mxu0 %v4848_v28  ;;  %v4849_v45 = vsub.f32 %v12640_v12, %v4848_v28  ;;  %v12686_v11 = vand.u32 4294901760, %v4544_v15  ;;  %v4550_v28 = vsel %vm2787_vm1, %v12564_v9, 0 }
 0x4c1   : > { %v4529_v20 = vsel %vm2787_vm1, %v4394_v13, 0  ;;  %v12657_v52 = vpop.trf.xlu1  ;;  %v4565_v12 = vsel %vm2787_vm1, %v12617_v7, 0 }
 0x4c2   : > { %14352 = vst [vmem:[#allocation91_spill] sm:$0xff] %v12650_v55  ;;  %v12654_v23 = vand.u32 4294901760, %v4529_v20  ;;  %v4850_v42 = vand.u32 4294901760, %v4849_v45  ;;  %v4858_v22 = vand.u32 4294901760, %v12650_v55 }
 0x4c4   : > { %v12660_v37 = vsub.f32 %v4529_v20, %v12654_v23  ;;  %v4395_v4 = vpop.trf.xlu0  ;;  %8922 = vmatmul.mubr.f32.gmra.mrb[24].mxu1 %v4850_v42  ;;  %9236 = vmatprep.mubr.f32.mxu0 %v4858_v22  ;;  %v4859_v46 = vsub.f32 %v12650_v55, %v4858_v22  ;;  %v12696_v20 = vand.u32 4294901760, %v4547_v17  ;;  %v4553_v22 = vsel %vm2787_vm1, %v12575_v60, 0 }
 0x4c5   : > { %v4532_v6 = vsel %vm2787_vm1, %v4395_v4, 0  ;;  %v12672_v48 = vpop.trf.xlu1 }
 0x4c6   : > { %14353 = vst [vmem:[#allocation3_spill] sm:$0xff] %v12660_v37  ;;  %v12668_v5 = vand.u32 4294901760, %v4532_v6  ;;  %v4860_v27 = vand.u32 4294901760, %v4859_v46  ;;  %v4868_v58 = vand.u32 4294901760, %v12660_v37 }
 0x4c8   : > { %v12677_v24 = vsub.f32 %v4532_v6, %v12668_v5  ;;  %v4396_v0 = vpop.trf.xlu0  ;;  %8924 = vmatprep.mubr.f32.mxu1 %v4860_v27  ;;  %9237 = vmatmul.mubr.f32.gmra.mrb[26].mxu0 %v4868_v58  ;;  %v4869_v51 = vsub.f32 %v12660_v37, %v4868_v58  ;;  %v12705_v6 = vsub.f32 %v4544_v15, %v12686_v11  ;;  %v12707_v27 = vand.u32 4294901760, %v4550_v28 }
 0x4c9   : > { %v4535_v54 = vsel %vm2787_vm1, %v4396_v0, 0  ;;  %v12688_v16 = vpop.trf.xlu1  ;;  %v4556_v0 = vsel %vm2787_vm1, %v12587_v40, 0  ;;  %v12720_v15 = vand.u32 4294901760, %v4553_v22 }
 0x4ca   : > { %14354 = vst [vmem:[#allocation4_spill] sm:$0xff] %v12677_v24  ;;  %v12683_v44 = vand.u32 4294901760, %v4535_v54  ;;  %v4870_v26 = vand.u32 4294901760, %v4869_v51  ;;  %v4878_v43 = vand.u32 4294901760, %v12677_v24  ;;  %14356 = vst [vmem:[#allocation5_spill] sm:$0xff] %v12705_v6 }
 0x4cc   : > { %v12693_v13 = vsub.f32 %v4535_v54, %v12683_v44  ;;  %v4397_v45 = vpop.trf.xlu0  ;;  %8925 = vmatmul.mubr.f32.gmra.mrb[26].mxu1 %v4870_v26  ;;  %9239 = vmatprep.mubr.f32.mxu0 %v4878_v43  ;;  %v4879_v30 = vsub.f32 %v12677_v24, %v4878_v43  ;;  %v12718_v26 = vsub.f32 %v4547_v17, %v12696_v20  ;;  %v12731_v24 = vand.u32 4294901760, %v4556_v0 }
 0x4cd   : > { %v4538_v42 = vsel %vm2787_vm1, %v4397_v45, 0  ;;  %v12709_v58 = vpop.trf.xlu1  ;;  %v4559_v45 = vsel %vm2787_vm1, %v12597_v21, 0  ;;  %v4562_v17 = vsel %vm2787_vm1, %v12607_v1, 0 }
 0x4ce   : > { %14355 = vst [vmem:[#allocation6_spill] sm:$0xff] %v12693_v13  ;;  %v12701_v4 = vand.u32 4294901760, %v4538_v42  ;;  %v4880_v46 = vand.u32 4294901760, %v4879_v30  ;;  %v4888_v9 = vand.u32 4294901760, %v12693_v13  ;;  %14358 = vst [vmem:[#allocation14_spill] sm:$0xff] %v12718_v26  ;;  %v12747_v37 = vand.u32 4294901760, %v4559_v45 }
 0x4cf   : > { %v4928_v1 = vand.u32 4294901760, %v12718_v26  ;;  %v12750_v55 = vand.u32 4294901760, %v4562_v17 }
 0x4d0   : > { %v12714_v51 = vsub.f32 %v4538_v42, %v12701_v4  ;;  %v4398_v54 = vpop.trf.xlu0  ;;  %8927 = vmatprep.mubr.f32.mxu1 %v4880_v46  ;;  %9240 = vmatmul.mubr.f32.gmra.mrb[28].mxu0 %v4888_v9  ;;  %v4889_v60 = vsub.f32 %v12693_v13, %v4888_v9  ;;  %v12729_v46 = vsub.f32 %v4550_v28, %v12707_v27  ;;  %v4918_v9 = vand.u32 4294901760, %v12705_v6 }
 0x4d1   : > { %v4541_v43 = vsel %vm2787_vm1, %v4398_v54, 0  ;;  %v12736_v13 = vpop.trf.xlu1  ;;  %v12745_v28 = vsub.f32 %v4553_v22, %v12720_v15  ;;  %v12775_v14 = vsub.f32 %v4562_v17, %v12750_v55 }
 0x4d2   : > { %14357 = vst [vmem:[#allocation11_spill] sm:$0xff] %v12714_v51  ;;  %v12725_v30 = vand.u32 4294901760, %v4541_v43  ;;  %v4890_v40 = vand.u32 4294901760, %v4889_v60  ;;  %v4898_v42 = vand.u32 4294901760, %v12714_v51  ;;  %14359 = vst [vmem:[#allocation16_spill] sm:$0xff] %v12729_v46  ;;  %v4919_v22 = vsub.f32 %v12705_v6, %v4918_v9 }
 0x4d3   : > { %14361 = vst [vmem:[#allocation19_spill] sm:$0xff] %v12745_v28  ;;  %v4948_v6 = vand.u32 4294901760, %v12745_v28  ;;  %14365 = vst [vmem:[#allocation34_spill] sm:$0xff] %v12775_v14 }
 0x4d4   : > { %v12739_v54 = vsub.f32 %v4541_v43, %v12725_v30  ;;  %v12741_v21 = vpop.trf.xlu0  ;;  %8928 = vmatmul.mubr.f32.gmra.mrb[28].mxu1 %v4890_v40  ;;  %9242 = vmatprep.mubr.f32.mxu0 %v4898_v42  ;;  %v4899_v60 = vsub.f32 %v12714_v51, %v4898_v42  ;;  %v12756_v40 = vsub.f32 %v4556_v0, %v12731_v24  ;;  %v4568_v42 = vsel %vm2787_vm1, %v12627_v29, 0 }
 0x4d5   : > { %v4938_v51 = vand.u32 4294901760, %v12729_v46  ;;  %v12762_v49 = vpop.trf.xlu1  ;;  %v12770_v0 = vand.u32 4294901760, %v4565_v12  ;;  %v4929_v29 = vsub.f32 %v12718_v26, %v4928_v1  ;;  %v12777_v38 = vand.u32 4294901760, %v4568_v42 }
 0x4d6   : > { %14360 = vst [vmem:[#allocation22_spill] sm:$0xff] %v12739_v54  ;;  %v4908_v43 = vand.u32 4294901760, %v12739_v54  ;;  %v4900_v10 = vand.u32 4294901760, %v4899_v60  ;;  %14362 = vst [vmem:[#allocation25_spill] sm:$0xff] %v12756_v40  ;;  %v12768_v60 = vsub.f32 %v4559_v45, %v12747_v37 }
 0x4d7   : > { %14364 = vst [vmem:[#allocation28_spill] sm:$0xff] %v12770_v0  ;;  %14366 = vst [vmem:[#allocation31_spill] sm:$0xff] %v12777_v38  ;;  %v4939_v45 = vsub.f32 %v12729_v46, %v4938_v51  ;;  %v12790_v26 = vsub.f32 %v4565_v12, %v12770_v0  ;;  %v12795_v46 = vsub.f32 %v4568_v42, %v12777_v38  ;;  %v4580_v42 = vsel %vm2787_vm1, %v12672_v48, 0 }
 0x4d8   : > { %9243 = vmatmul.mubr.f32.gmra.mrb[30].mxu0 %v4908_v43  ;;  %v12764_v62 = vpop.trf.xlu0  ;;  %8930 = vmatprep.mubr.f32.mxu1 %v4900_v10  ;;  %v4909_v7 = vsub.f32 %v12739_v54, %v4908_v43  ;;  %14363 = vst [vmem:[#allocation9_spill] sm:$0xff] %v12768_v60  ;;  %v4571_v10 = vsel %vm2787_vm1, %v12637_v18, 0  ;;  %v4920_v43 = vand.u32 4294901760, %v4919_v22  ;;  %v4958_v54 = vand.u32 4294901760, %v12756_v40 }
 0x4d9   : > { %9245 = vmatprep.mubr.f32.mxu0 %v4918_v9  ;;  %v12783_v19 = vpop.trf.xlu1  ;;  %v4574_v9 = vsel %vm2787_vm1, %v12647_v61, 0  ;;  %14367 = vst [vmem:[#allocation37_spill] sm:$0xff] %v12790_v26  ;;  %v4930_v18 = vand.u32 4294901760, %v4929_v29  ;;  %v4949_v22 = vsub.f32 %v12745_v28, %v4948_v6  ;;  %14368 = vst [vmem:[#allocation7_spill] sm:$0xff] %v12795_v46  ;;  %v12797_v39 = vand.u32 4294901760, %v4571_v10 }
 0x4da   : > { %v4910_v32 = vand.u32 4294901760, %v4909_v7  ;;  %v4968_v7 = vand.u32 4294901760, %v12768_v60  ;;  %v4978_v61 = vand.u32 4294901760, %v12775_v14  ;;  %v4940_v12 = vand.u32 4294901760, %v4939_v45 }
 0x4db   : > { %14369 = vst [vmem:[#allocation40_spill] sm:$0xff] %v12797_v39  ;;  %v4988_v45 = vand.u32 4294901760, %v12790_v26  ;;  %v4998_v38 = vand.u32 4294901760, %v12795_v46 }
 0x4dc   : > { %8931 = vmatmul.mubr.f32.gmra.mrb[30].mxu1 %v4910_v32  ;;  %9246 = vmatmul.mubr.f32.gmra.mrb[32].mxu0 %v4928_v1  ;;  %v12787_v17 = vpop.trf.xlu0  ;;  %v4577_v32 = vsel %vm2787_vm1, %v12657_v52, 0  ;;  %v12802_v1 = vand.u32 4294901760, %v4574_v9  ;;  %v4950_v52 = vand.u32 4294901760, %v4949_v22  ;;  %v4969_v35 = vsub.f32 %v12768_v60, %v4968_v7 }
 0x4dd   : > { %8933 = vmatprep.mubr.f32.mxu1 %v4920_v43  ;;  %9248 = vmatprep.mubr.f32.mxu0 %v4938_v51  ;;  %v4959_v51 = vsub.f32 %v12756_v40, %v4958_v54  ;;  %v12805_v29 = vpop.trf.xlu1  ;;  %v12811_v28 = vand.u32 4294901760, %v4577_v32  ;;  %v12816_v40 = vsub.f32 %v4571_v10, %v12797_v39  ;;  %v4586_v10 = vsel %vm2787_vm1, %v12709_v58, 0 }
 0x4de   : > { %14370 = vst [vmem:[#allocation46_spill] sm:$0xff] %v12802_v1  ;;  %v12823_v48 = vsub.f32 %v4574_v9, %v12802_v1  ;;  %v4970_v9 = vand.u32 4294901760, %v4969_v35  ;;  %v4989_v1 = vsub.f32 %v12790_v26, %v4988_v45  ;;  %v4592_v58 = vsel %vm2787_vm1, %v12741_v21, 0 }
 0x4df   : > { %14371 = vst [vmem:[#allocation43_spill] sm:$0xff] %v12811_v28  ;;  %14372 = vst [vmem:[#allocation49_spill] sm:$0xff] %v12816_v40 }
 0x4e0   : > { %8934 = vmatmul.mubr.f32.gmra.mrb[32].mxu1 %v4930_v18  ;;  %9249 = vmatmul.mubr.f32.gmra.mrb[34].mxu0 %v4948_v6  ;;  %v12807_v43 = vpop.trf.xlu0  ;;  %v4583_v6 = vsel %vm2787_vm1, %v12688_v16, 0  ;;  %v4979_v18 = vsub.f32 %v12775_v14, %v4978_v61  ;;  %14373 = vst [vmem:[#allocation53_spill] sm:$0xff] %v12823_v48  ;;  %v12832_v16 = vsub.f32 %v4577_v32, %v12811_v28  ;;  %v5018_v35 = vand.u32 4294901760, %v12823_v48 }
 0x4e1   : > { %8936 = vmatprep.mubr.f32.mxu1 %v4940_v12  ;;  %9251 = vmatprep.mubr.f32.mxu0 %v4958_v54  ;;  %v12825_v12 = vand.u32 4294901760, %v4580_v42  ;;  %v4960_v54 = vand.u32 4294901760, %v4959_v51  ;;  %v12827_v22 = vpop.trf.xlu1  ;;  %v12834_v14 = vand.u32 4294901760, %v4583_v6  ;;  %v5008_v51 = vand.u32 4294901760, %v12816_v40 }
 0x4e2   : > { %14375 = vst [vmem:[#allocation57_spill] sm:$0xff] %v12832_v16  ;;  %v4980_v39 = vand.u32 4294901760, %v4979_v18  ;;  %v5028_v21 = vand.u32 4294901760, %v12832_v16 }
 0x4e3   : > { %14374 = vst [vmem:[#allocation58_spill] sm:$0xff] %v12825_v12  ;;  %14376 = vst [vmem:[#allocation61_spill] sm:$0xff] %v12834_v14  ;;  %v12844_v32 = vsub.f32 %v4580_v42, %v12825_v12  ;;  %v12857_v42 = vand.u32 4294901760, %v4592_v58  ;;  %v4595_v12 = vsel %vm2787_vm1, %v12764_v62, 0 }
 0x4e4   : > { %8937 = vmatmul.mubr.f32.gmra.mrb[34].mxu1 %v4950_v52  ;;  %9252 = vmatmul.mubr.f32.gmra.mrb[36].mxu0 %v4968_v7  ;;  %v4451_v60 = vpop.trf.xlu0  ;;  %v4999_v52 = vsub.f32 %v12795_v46, %v4998_v38  ;;  %v4589_v7 = vsel %vm2787_vm1, %v12736_v13, 0  ;;  %v12852_v46 = vsub.f32 %v4583_v6, %v12834_v14  ;;  %v4990_v13 = vand.u32 4294901760, %v4989_v1 }
 0x4e5   : > { %8939 = vmatprep.mubr.f32.mxu1 %v4960_v54  ;;  %9254 = vmatprep.mubr.f32.mxu0 %v4978_v61  ;;  %14377 = vst [vmem:[#allocation67_spill] sm:$0xff] %v12844_v32  ;;  %v12846_v61 = vand.u32 4294901760, %v4586_v10  ;;  %v12849_v54 = vpop.trf.xlu1  ;;  %v12854_v26 = vand.u32 4294901760, %v4589_v7  ;;  %14381 = vst [vmem:[#allocation18_spill] sm:$0xff] %v12857_v42  ;;  %v12871_v0 = vand.u32 4294901760, %v4595_v12 }
 0x4e6   : > { %14379 = vst [vmem:[#allocation71_spill] sm:$0xff] %v12852_v46  ;;  %v5000_v28 = vand.u32 4294901760, %v4999_v52  ;;  %v12879_v52 = vsub.f32 %v4592_v58, %v12857_v42 }
 0x4e7   : > { %14378 = vst [vmem:[#allocation70_spill] sm:$0xff] %v12846_v61  ;;  %14380 = vst [vmem:[#allocation17_spill] sm:$0xff] %v12854_v26  ;;  %v12865_v6 = vsub.f32 %v4586_v10, %v12846_v61  ;;  %v12874_v62 = vsub.f32 %v4589_v7, %v12854_v26  ;;  %v5048_v10 = vand.u32 4294901760, %v12852_v46  ;;  %v12891_v58 = vsub.f32 %v4595_v12, %v12871_v0 }
 0x4e8   : > { %8940 = vmatmul.mubr.f32.gmra.mrb[36].mxu1 %v4970_v9  ;;  %9255 = vmatmul.mubr.f32.gmra.mrb[38].mxu0 %v4988_v45  ;;  %v4452_v18 = vpop.trf.xlu0  ;;  %v5009_v9 = vsub.f32 %v12816_v40, %v5008_v51  ;;  %v4598_v45 = vsel %vm2787_vm1, %v12787_v17, 0  ;;  %14383 = vst [vmem:[#allocation21_spill] sm:$0xff] %v12871_v0  ;;  %v5029_v17 = vsub.f32 %v12832_v16, %v5028_v21  ;;  %14385 = vst [vmem:[#allocation27_spill] sm:$0xff] %v12879_v52 }
 0x4e9   : > { %8942 = vmatprep.mubr.f32.mxu1 %v4980_v39  ;;  %9257 = vmatprep.mubr.f32.mxu0 %v4998_v38  ;;  %14382 = vst [vmem:[#allocation20_spill] sm:$0xff] %v12865_v6  ;;  %v5019_v39 = vsub.f32 %v12823_v48, %v5018_v35  ;;  %v5038_v38 = vand.u32 4294901760, %v12844_v32  ;;  %v12869_v1 = vpop.trf.xlu1  ;;  %14384 = vst [vmem:[#allocation23_spill] sm:$0xff] %v12874_v62  ;;  %v12881_v48 = vand.u32 4294901760, %v4598_v45  ;;  %v4604_v16 = vsel %vm2787_vm1, %v4451_v60, 0 }
 0x4ea   : > { %v5010_v40 = vand.u32 4294901760, %v5009_v9  ;;  %14387 = vst [vmem:[#allocation24_spill] sm:$0xff] %v12891_v58  ;;  %v5030_v9 = vand.u32 4294901760, %v5029_v17  ;;  %v4607_v60 = vsel %vm2787_vm1, %v4452_v18, 0 }
 0x4eb   : > { %14386 = vst [vmem:[#allocation29_spill] sm:$0xff] %v12881_v48 }
 0x4ec   : > { %8943 = vmatmul.mubr.f32.gmra.mrb[38].mxu1 %v4990_v13  ;;  %9258 = vmatmul.mubr.f32.gmra.mrb[40].mxu0 %v5008_v51  ;;  %v4453_v14 = vpop.trf.xlu0  ;;  %v4601_v51 = vsel %vm2787_vm1, %v12807_v43, 0  ;;  %v5020_v13 = vand.u32 4294901760, %v5019_v39  ;;  %v5049_v43 = vsub.f32 %v12852_v46, %v5048_v10  ;;  %v5068_v39 = vand.u32 4294901760, %v12874_v62 }
 0x4ed   : > { %8945 = vmatprep.mubr.f32.mxu1 %v5000_v28  ;;  %9260 = vmatprep.mubr.f32.mxu0 %v5018_v35  ;;  %v5039_v28 = vsub.f32 %v12844_v32, %v5038_v38  ;;  %v5058_v35 = vand.u32 4294901760, %v12865_v6  ;;  %v12887_v7 = vpop.trf.xlu1  ;;  %v12896_v32 = vsub.f32 %v4598_v45, %v12881_v48  ;;  %v12898_v42 = vand.u32 4294901760, %v4601_v51 }
 0x4ee   : > { %v12908_v45 = vand.u32 4294901760, %v4607_v60  ;;  %v5069_v18 = vsub.f32 %v12874_v62, %v5068_v39  ;;  %v5088_v48 = vand.u32 4294901760, %v12891_v58 }
 0x4ef   : > { %14388 = vst [vmem:[#allocation26_spill] sm:$0xff] %v12896_v32  ;;  %14389 = vst [vmem:[#allocation30_spill] sm:$0xff] %v12898_v42  ;;  %v5040_v12 = vand.u32 4294901760, %v5039_v28  ;;  %v12913_v0 = vsub.f32 %v4601_v51, %v12898_v42  ;;  %v5050_v28 = vand.u32 4294901760, %v5049_v43 }
 0x4f0   : > { %8946 = vmatmul.mubr.f32.gmra.mrb[40].mxu1 %v5010_v40  ;;  %9261 = vmatmul.mubr.f32.gmra.mrb[42].mxu0 %v5028_v21  ;;  %v4454_v26 = vpop.trf.xlu0  ;;  %v5078_v40 = vand.u32 4294901760, %v12879_v52  ;;  %v12902_v21 = vand.u32 4294901760, %v4604_v16  ;;  %v12925_v51 = vsub.f32 %v4607_v60, %v12908_v45  ;;  %v5070_v43 = vand.u32 4294901760, %v5069_v18 }
 0x4f1   : > { %8948 = vmatprep.mubr.f32.mxu1 %v5020_v13  ;;  %9263 = vmatprep.mubr.f32.mxu0 %v5038_v38  ;;  %v5059_v13 = vsub.f32 %v12865_v6, %v5058_v35  ;;  %v4610_v38 = vsel %vm2787_vm1, %v4453_v14, 0  ;;  %v12906_v46 = vpop.trf.xlu1  ;;  %14391 = vst [vmem:[#allocation12_spill] sm:$0xff] %v12913_v0  ;;  %v5098_v14 = vand.u32 4294901760, %v12896_v32  ;;  %v5108_v42 = vand.u32 4294901760, %v12913_v0 }
 0x4f2   : > { %14390 = vst [vmem:[#allocation32_spill] sm:$0xff] %v12902_v21  ;;  %v5079_v6 = vsub.f32 %v12879_v52, %v5078_v40  ;;  %14394 = vst [vmem:[#allocation13_spill] sm:$0xff] %v12925_v51  ;;  %v5089_v52 = vsub.f32 %v12891_v58, %v5088_v48 }
 0x4f4   : > { %8949 = vmatmul.mubr.f32.gmra.mrb[42].mxu1 %v5030_v9  ;;  %9264 = vmatmul.mubr.f32.gmra.mrb[44].mxu0 %v5048_v10  ;;  %v4455_v17 = vpop.trf.xlu0  ;;  %v12918_v10 = vsub.f32 %v4604_v16, %v12902_v21  ;;  %v12920_v9 = vand.u32 4294901760, %v4610_v38  ;;  %v5080_v21 = vand.u32 4294901760, %v5079_v6 }
 0x4f5   : > { %8951 = vmatprep.mubr.f32.mxu1 %v5040_v12  ;;  %9266 = vmatprep.mubr.f32.mxu0 %v5058_v35  ;;  %v4613_v12 = vsel %vm2787_vm1, %v4454_v26, 0  ;;  %v5060_v35 = vand.u32 4294901760, %v5059_v13  ;;  %v4616_v62 = vsel %vm2787_vm1, %v4455_v17, 0  ;;  %v5099_v26 = vsub.f32 %v12896_v32, %v5098_v14  ;;  %v12932_v13 = vpop.trf.xlu1 }
 0x4f6   : > { %14392 = vst [vmem:[#allocation33_spill] sm:$0xff] %v12918_v10  ;;  %14393 = vst [vmem:[#allocation35_spill] sm:$0xff] %v12920_v9  ;;  %v12928_v16 = vand.u32 4294901760, %v4613_v12  ;;  %v12937_v17 = vand.u32 4294901760, %v4616_v62 }
 0x4f7   : > { %v5100_v58 = vand.u32 4294901760, %v5099_v26 }
 0x4f8   : > { %8952 = vmatmul.mubr.f32.gmra.mrb[44].mxu1 %v5050_v28  ;;  %9267 = vmatmul.mubr.f32.gmra.mrb[46].mxu0 %v5068_v39  ;;  %v4456_v61 = vpop.trf.xlu0  ;;  %v12935_v39 = vsub.f32 %v4610_v38, %v12920_v9  ;;  %14396 = vst [vmem:[#allocation41_spill] sm:$0xff] %v12937_v17  ;;  %v5090_v28 = vand.u32 4294901760, %v5089_v52  ;;  %v12944_v32 = vsub.f32 %v4613_v12, %v12928_v16 }
 0x4f9   : > { %8954 = vmatprep.mubr.f32.mxu1 %v5060_v35  ;;  %9269 = vmatprep.mubr.f32.mxu0 %v5078_v40  ;;  %v4619_v60 = vsel %vm2787_vm1, %v4456_v61, 0  ;;  %v5118_v40 = vand.u32 4294901760, %v12918_v10  ;;  %v5128_v35 = vand.u32 4294901760, %v12925_v51  ;;  %v5109_v61 = vsub.f32 %v12913_v0, %v5108_v42 }
 0x4fa   : > { %14395 = vst [vmem:[#allocation39_spill] sm:$0xff] %v12935_v39  ;;  %14397 = vst [vmem:[#allocation36_spill] sm:$0xff] %v12944_v32  ;;  %v12946_v38 = vand.u32 4294901760, %v4619_v60  ;;  %v12950_v9 = vsub.f32 %v4616_v62, %v12937_v17 }
 0x4fb   : > { %v5129_v26 = vsub.f32 %v12925_v51, %v5128_v35  ;;  %v5110_v0 = vand.u32 4294901760, %v5109_v61 }
 0x4fc   : > { %8955 = vmatmul.mubr.f32.gmra.mrb[46].mxu1 %v5070_v43  ;;  %9270 = vmatmul.mubr.f32.gmra.mrb[48].mxu0 %v5088_v48  ;;  %v4457_v18 = vpop.trf.xlu0  ;;  %14398 = vst [vmem:[#allocation38_spill] sm:$0xff] %v12946_v38  ;;  %14399 = vst [vmem:[#allocation42_spill] sm:$0xff] %v12950_v9  ;;  %v5119_v43 = vsub.f32 %v12918_v10, %v5118_v40  ;;  %v12961_v62 = vsub.f32 %v4619_v60, %v12946_v38  ;;  %v5148_v10 = vand.u32 4294901760, %v12944_v32 }
 0x4fd   : > { %v4622_v6 = vsel %vm2787_vm1, %v4457_v18, 0  ;;  %8957 = vmatprep.mubr.f32.mxu1 %v5080_v21  ;;  %9272 = vmatprep.mubr.f32.mxu0 %v5098_v14  ;;  %v5138_v21 = vand.u32 4294901760, %v12935_v39  ;;  %v12956_v14 = vpop.trf.xlu1  ;;  %v5130_v60 = vand.u32 4294901760, %v5129_v26 }
 0x4fe   : > { %v12952_v48 = vand.u32 4294901760, %v4622_v6  ;;  %14401 = vst [vmem:[#allocation15_spill] sm:$0xff] %v12961_v62 }
 0x4ff   : > { %v5139_v17 = vsub.f32 %v12935_v39, %v5138_v21 }
 0x500   : > { %14400 = vst [vmem:[#allocation44_spill] sm:$0xff] %v12952_v48  ;;  %8958 = vmatmul.mubr.f32.gmra.mrb[48].mxu1 %v5090_v28  ;;  %9273 = vmatmul.mubr.f32.gmra.mrb[50].mxu0 %v5108_v42  ;;  %v4458_v52 = vpop.trf.xlu0  ;;  %v12967_v28 = vsub.f32 %v4622_v6, %v12952_v48  ;;  %v5120_v42 = vand.u32 4294901760, %v5119_v43  ;;  %v5149_v6 = vsub.f32 %v12944_v32, %v5148_v10  ;;  %v5168_v43 = vand.u32 4294901760, %v12961_v62 }
 0x501   : > { %v4625_v12 = vsel %vm2787_vm1, %v4458_v52, 0  ;;  %8960 = vmatprep.mubr.f32.mxu1 %v5100_v58  ;;  %9275 = vmatprep.mubr.f32.mxu0 %v5118_v40  ;;  %v5158_v52 = vand.u32 4294901760, %v12950_v9  ;;  %v12979_v39 = vpop.trf.xlu1  ;;  %v5140_v48 = vand.u32 4294901760, %v5139_v17 }
 0x502   : > { %v12963_v18 = vand.u32 4294901760, %v4625_v12  ;;  %14403 = vst [vmem:[#allocation47_spill] sm:$0xff] %v12967_v28  ;;  %v5169_v32 = vsub.f32 %v12961_v62, %v5168_v43 }
 0x504   : > { %14402 = vst [vmem:[#allocation45_spill] sm:$0xff] %v12963_v18  ;;  %8961 = vmatmul.mubr.f32.gmra.mrb[50].mxu1 %v5110_v0  ;;  %9276 = vmatmul.mubr.f32.gmra.mrb[52].mxu0 %v5128_v35  ;;  %v4459_v58 = vpop.trf.xlu0  ;;  %v12973_v61 = vsub.f32 %v4625_v12, %v12963_v18  ;;  %v5159_v0 = vsub.f32 %v12950_v9, %v5158_v52  ;;  %v5178_v35 = vand.u32 4294901760, %v12967_v28  ;;  %v5150_v9 = vand.u32 4294901760, %v5149_v6 }
 0x505   : > { %v4628_v40 = vsel %vm2787_vm1, %v4459_v58, 0  ;;  %8963 = vmatprep.mubr.f32.mxu1 %v5120_v42  ;;  %9278 = vmatprep.mubr.f32.mxu0 %v5138_v21  ;;  %v4640_v21 = vsel %vm2787_vm1, %v12762_v49, 0  ;;  %v4643_v42 = vsel %vm2787_vm1, %v12783_v19, 0  ;;  %v4646_v19 = vsel %vm2787_vm1, %v12805_v29, 0  ;;  %v13006_v6 = vpop.trf.xlu1 }
 0x506   : > { %14404 = vst [vmem:[#allocation51_spill] sm:$0xff] %v12973_v61  ;;  %v12975_v51 = vand.u32 4294901760, %v4628_v40  ;;  %v5188_v49 = vand.u32 4294901760, %v12973_v61  ;;  %v12995_v18 = vand.u32 4294901760, %v4640_v21  ;;  %v5170_v62 = vand.u32 4294901760, %v5169_v32 }
 0x508   : > { %14405 = vst [vmem:[#allocation52_spill] sm:$0xff] %v12975_v51  ;;  %v12986_v26 = vsub.f32 %v4628_v40, %v12975_v51  ;;  %8964 = vmatmul.mubr.f32.gmra.mrb[52].mxu1 %v5130_v60  ;;  %9279 = vmatmul.mubr.f32.gmra.mrb[54].mxu0 %v5148_v10  ;;  %v4460_v12 = vpop.trf.xlu0  ;;  %v5160_v40 = vand.u32 4294901760, %v5159_v0  ;;  %v5179_v10 = vsub.f32 %v12967_v28, %v5178_v35  ;;  %v12999_v51 = vand.u32 4294901760, %v4643_v42 }
 0x509   : > { %v4631_v58 = vsel %vm2787_vm1, %v4460_v12, 0  ;;  %8966 = vmatprep.mubr.f32.mxu1 %v5140_v48  ;;  %9281 = vmatprep.mubr.f32.mxu0 %v5158_v52  ;;  %v4649_v0 = vsel %vm2787_vm1, %v12827_v22, 0  ;;  %v5189_v29 = vsub.f32 %v12973_v61, %v5188_v49 }
 0x50a   : > { %14406 = vst [vmem:[#allocation48_spill] sm:$0xff] %v12986_v26  ;;  %v12991_v17 = vand.u32 4294901760, %v4631_v58  ;;  %v5198_v60 = vand.u32 4294901760, %v12986_v26  ;;  %14408 = vst [vmem:[#allocation54_spill] sm:$0xff] %v12999_v51  ;;  %v13022_v22 = vsub.f32 %v4643_v42, %v12999_v51 }
 0x50c   : > { %14407 = vst [vmem:[#allocation50_spill] sm:$0xff] %v12991_v17  ;;  %v13004_v48 = vsub.f32 %v4631_v58, %v12991_v17  ;;  %8967 = vmatmul.mubr.f32.gmra.mrb[54].mxu1 %v5150_v9  ;;  %9282 = vmatmul.mubr.f32.gmra.mrb[56].mxu0 %v5168_v43  ;;  %v4461_v52 = vpop.trf.xlu0  ;;  %v13016_v9 = vsub.f32 %v4640_v21, %v12995_v18  ;;  %v13018_v43 = vand.u32 4294901760, %v4646_v19  ;;  %v5180_v17 = vand.u32 4294901760, %v5179_v10 }
 0x50d   : > { %v4634_v12 = vsel %vm2787_vm1, %v4461_v52, 0  ;;  %8969 = vmatprep.mubr.f32.mxu1 %v5160_v40  ;;  %9284 = vmatprep.mubr.f32.mxu0 %v5178_v35  ;;  %v5199_v38 = vsub.f32 %v12986_v26, %v5198_v60  ;;  %14412 = vst [vmem:[#allocation63_spill] sm:$0xff] %v13022_v22  ;;  %v4652_v35 = vsel %vm2787_vm1, %v12849_v54, 0  ;;  %v13029_v52 = vand.u32 4294901760, %v4649_v0 }
 0x50e   : > { %14409 = vst [vmem:[#allocation55_spill] sm:$0xff] %v13004_v48  ;;  %v13011_v28 = vand.u32 4294901760, %v4634_v12  ;;  %v5208_v58 = vand.u32 4294901760, %v13004_v48  ;;  %14410 = vst [vmem:[#allocation56_spill] sm:$0xff] %v13016_v9  ;;  %v4655_v21 = vsel %vm2787_vm1, %v12869_v1, 0  ;;  %v4658_v10 = vsel %vm2787_vm1, %v12887_v7, 0 }
 0x50f   : > { %14411 = vst [vmem:[#allocation59_spill] sm:$0xff] %v13018_v43  ;;  %14414 = vst [vmem:[#allocation60_spill] sm:$0xff] %v13029_v52  ;;  %v5190_v54 = vand.u32 4294901760, %v5189_v29  ;;  %v13041_v61 = vsub.f32 %v4646_v19, %v13018_v43  ;;  %v13043_v51 = vand.u32 4294901760, %v4652_v35  ;;  %v5200_v1 = vand.u32 4294901760, %v5199_v38 }
 0x510   : > { %v13027_v32 = vsub.f32 %v4634_v12, %v13011_v28  ;;  %8970 = vmatmul.mubr.f32.gmra.mrb[56].mxu1 %v5170_v62  ;;  %9285 = vmatmul.mubr.f32.gmra.mrb[58].mxu0 %v5188_v49  ;;  %v4462_v40 = vpop.trf.xlu0  ;;  %v5209_v62 = vsub.f32 %v13004_v48, %v5208_v58  ;;  %v4491_v49 = vpop.trf.xlu1  ;;  %v5238_v7 = vand.u32 4294901760, %v13016_v9  ;;  %v13053_v29 = vand.u32 4294901760, %v4655_v21 }
 0x511   : > { %v4637_v42 = vsel %vm2787_vm1, %v4462_v40, 0  ;;  %8972 = vmatprep.mubr.f32.mxu1 %v5180_v17  ;;  %9287 = vmatprep.mubr.f32.mxu0 %v5198_v60  ;;  %14415 = vst [vmem:[#allocation62_spill] sm:$0xff] %v13041_v61  ;;  %v13051_v60 = vsub.f32 %v4649_v0, %v13029_v52  ;;  %v13055_v48 = vand.u32 4294901760, %v4658_v10  ;;  %v5248_v38 = vand.u32 4294901760, %v13022_v22 }
 0x512   : > { %14413 = vst [vmem:[#allocation64_spill] sm:$0xff] %v13027_v32  ;;  %v13036_v26 = vand.u32 4294901760, %v4637_v42  ;;  %v5218_v12 = vand.u32 4294901760, %v13027_v32  ;;  %v4661_v19 = vsel %vm2787_vm1, %v12906_v46, 0  ;;  %v4664_v0 = vsel %vm2787_vm1, %v12932_v13, 0 }
 0x513   : > { %14417 = vst [vmem:[#allocation69_spill] sm:$0xff] %v13051_v60  ;;  %14418 = vst [vmem:[#allocation76_spill] sm:$0xff] %v13055_v48  ;;  %v5239_v52 = vsub.f32 %v13016_v9, %v5238_v7  ;;  %v13070_v46 = vsub.f32 %v4655_v21, %v13053_v29  ;;  %v13077_v13 = vand.u32 4294901760, %v4664_v0  ;;  %v5249_v9 = vsub.f32 %v13022_v22, %v5248_v38 }
 0x514   : > { %v13047_v40 = vsub.f32 %v4637_v42, %v13036_v26  ;;  %8973 = vmatmul.mubr.f32.gmra.mrb[58].mxu1 %v5190_v54  ;;  %9288 = vmatmul.mubr.f32.gmra.mrb[60].mxu0 %v5208_v58  ;;  %v5219_v17 = vsub.f32 %v13027_v32, %v5218_v12  ;;  %v5210_v42 = vand.u32 4294901760, %v5209_v62  ;;  %v13062_v32 = vsub.f32 %v4652_v35, %v13043_v51  ;;  %v4492_v43 = vpop.trf.xlu1 }
 0x515   : > { %8975 = vmatprep.mubr.f32.mxu1 %v5200_v1  ;;  %9290 = vmatprep.mubr.f32.mxu0 %v5218_v12  ;;  %v5258_v1 = vand.u32 4294901760, %v13041_v61  ;;  %14420 = vst [vmem:[#allocation74_spill] sm:$0xff] %v13070_v46  ;;  %v13073_v62 = vsub.f32 %v4658_v10, %v13055_v48  ;;  %v13075_v35 = vand.u32 4294901760, %v4661_v19  ;;  %14423 = vst [vmem:[#allocation85_spill] sm:$0xff] %v13077_v13  ;;  %v4670_v48 = vsel %vm2787_vm1, %v12979_v39, 0 }
 0x516   : > { %14416 = vst [vmem:[#allocation66_spill] sm:$0xff] %v13047_v40  ;;  %v5228_v54 = vand.u32 4294901760, %v13047_v40  ;;  %v5220_v58 = vand.u32 4294901760, %v5219_v17  ;;  %14419 = vst [vmem:[#allocation72_spill] sm:$0xff] %v13062_v32  ;;  %v5278_v10 = vand.u32 4294901760, %v13062_v32 }
 0x517   : > { %14421 = vst [vmem:[#allocation78_spill] sm:$0xff] %v13073_v62  ;;  %14422 = vst [vmem:[#allocation81_spill] sm:$0xff] %v13075_v35  ;;  %v5259_v21 = vsub.f32 %v13041_v61, %v5258_v1  ;;  %v5250_v61 = vand.u32 4294901760, %v5249_v9 }
 0x518   : > { %8976 = vmatmul.mubr.f32.gmra.mrb[60].mxu1 %v5210_v42  ;;  %9291 = vmatmul.mubr.f32.gmra.mrb[62].mxu0 %v5228_v54  ;;  %v5229_v12 = vsub.f32 %v13047_v40, %v5228_v54  ;;  %v5268_v42 = vand.u32 4294901760, %v13051_v60  ;;  %v4667_v54 = vsel %vm2787_vm1, %v12956_v14, 0  ;;  %v5240_v40 = vand.u32 4294901760, %v5239_v52  ;;  %v4493_v39 = vpop.trf.xlu1 }
 0x519   : > { %8978 = vmatprep.mubr.f32.mxu1 %v5220_v58  ;;  %9293 = vmatprep.mubr.f32.mxu0 %v5238_v7  ;;  %v13088_v7 = vsub.f32 %v4661_v19, %v13075_v35  ;;  %v5288_v58 = vand.u32 4294901760, %v13070_v46  ;;  %v13093_v14 = vsub.f32 %v4664_v0, %v13077_v13  ;;  %v13095_v52 = vand.u32 4294901760, %v4667_v54 }
 0x51a   : > { %v5230_v17 = vand.u32 4294901760, %v5229_v12  ;;  %v5298_v12 = vand.u32 4294901760, %v13073_v62  ;;  %v5269_v22 = vsub.f32 %v13051_v60, %v5268_v42  ;;  %v5279_v19 = vsub.f32 %v13062_v32, %v5278_v10 }
 0x51b   : > { %14424 = vst [vmem:[#allocation88_spill] sm:$0xff] %v13088_v7  ;;  %14425 = vst [vmem:[#allocation89_spill] sm:$0xff] %v13093_v14  ;;  %v5289_v0 = vsub.f32 %v13070_v46, %v5288_v58  ;;  %v5308_v9 = vand.u32 4294901760, %v13088_v7  ;;  %v13108_v13 = vsub.f32 %v4667_v54, %v13095_v52 }
 0x51c   : > { %8979 = vmatmul.mubr.f32.gmra.mrb[62].mxu1 %v5230_v17  ;;  %9294 = vmatmul.mubr.f32.gmra.mrb[64].mxu0 %v5248_v38  ;;  %v13098_v17 = vand.u32 4294901760, %v4670_v48  ;;  %v4673_v38 = vsel %vm2787_vm1, %v13006_v6, 0  ;;  %v5299_v60 = vsub.f32 %v13073_v62, %v5298_v12  ;;  %v5270_v6 = vand.u32 4294901760, %v5269_v22  ;;  %v4494_v62 = vpop.trf.xlu1 }
 0x51d   : > { %8981 = vmatprep.mubr.f32.mxu1 %v5240_v40  ;;  %9296 = vmatprep.mubr.f32.mxu0 %v5258_v1  ;;  %v5260_v40 = vand.u32 4294901760, %v5259_v21  ;;  %v4676_v1 = vsel %vm2787_vm1, %v4491_v49, 0  ;;  %14427 = vst [vmem:[#allocation73_spill] sm:$0xff] %v13108_v13  ;;  %v13110_v35 = vand.u32 4294901760, %v4673_v38  ;;  %v5318_v21 = vand.u32 4294901760, %v13093_v14 }
 0x51e   : > { %14426 = vst [vmem:[#allocation92_spill] sm:$0xff] %v13098_v17  ;;  %v13116_v49 = vand.u32 4294901760, %v4676_v1  ;;  %v5290_v54 = vand.u32 4294901760, %v5289_v0  ;;  %v5300_v46 = vand.u32 4294901760, %v5299_v60  ;;  %v5309_v22 = vsub.f32 %v13088_v7, %v5308_v9 }
 0x51f   : > { %14428 = vst [vmem:[#allocation79_spill] sm:$0xff] %v13110_v35  ;;  %v13122_v32 = vsub.f32 %v4673_v38, %v13110_v35  ;;  %v4685_v60 = vsel %vm2787_vm1, %v4494_v62, 0 }
 0x520   : > { %8982 = vmatmul.mubr.f32.gmra.mrb[64].mxu1 %v5250_v61  ;;  %9297 = vmatmul.mubr.f32.gmra.mrb[66].mxu0 %v5268_v42  ;;  %v13114_v61 = vsub.f32 %v4670_v48, %v13098_v17  ;;  %14430 = vst [vmem:[#allocation84_spill] sm:$0xff] %v13116_v49  ;;  %v5280_v42 = vand.u32 4294901760, %v5279_v19  ;;  %v5328_v19 = vand.u32 4294901760, %v13108_v13  ;;  %v5310_v38 = vand.u32 4294901760, %v5309_v22 }
 0x521   : > { %8984 = vmatprep.mubr.f32.mxu1 %v5260_v40  ;;  %9299 = vmatprep.mubr.f32.mxu0 %v5278_v10  ;;  %v4679_v10 = vsel %vm2787_vm1, %v4492_v43, 0  ;;  %v4682_v40 = vsel %vm2787_vm1, %v4493_v39, 0  ;;  %14431 = vst [vmem:[#allocation86_spill] sm:$0xff] %v13122_v32  ;;  %v5319_v43 = vsub.f32 %v13093_v14, %v5318_v21 }
 0x522   : > { %14429 = vst [vmem:[#allocation83_spill] sm:$0xff] %v13114_v61  ;;  %v13124_v48 = vand.u32 4294901760, %v4679_v10  ;;  %v13131_v39 = vand.u32 4294901760, %v4682_v40 }
 0x523   : > { %v5320_v7 = vand.u32 4294901760, %v5319_v43 }
 0x524   : > { %8985 = vmatmul.mubr.f32.gmra.mrb[66].mxu1 %v5270_v6  ;;  %9300 = vmatmul.mubr.f32.gmra.mrb[68].mxu0 %v5288_v58  ;;  %14432 = vst [vmem:[#allocation90_spill] sm:$0xff] %v13124_v48  ;;  %v13129_v58 = vsub.f32 %v4676_v1, %v13116_v49  ;;  %v13136_v0 = vsub.f32 %v4679_v10, %v13124_v48  ;;  %v13138_v6 = vand.u32 4294901760, %v4685_v60  ;;  %v5348_v1 = vand.u32 4294901760, %v13122_v32 }
 0x525   : > { %8987 = vmatprep.mubr.f32.mxu1 %v5280_v42  ;;  %9302 = vmatprep.mubr.f32.mxu0 %v5298_v12  ;;  %v5338_v12 = vand.u32 4294901760, %v13114_v61  ;;  %v5329_v42 = vsub.f32 %v13108_v13, %v5328_v19  ;;  %v13143_v14 = vsub.f32 %v4682_v40, %v13131_v39  ;;  %v14463_v13 = vld [vmem:[#allocation85_spill] sm:$0xff] }
 0x526   : > { %14433 = vst [vmem:[#allocation94_spill] sm:$0xff] %v13129_v58  ;;  %14434 = vst [vmem:[#allocation93_spill] sm:$0xff] %v13136_v0  ;;  %v5349_v10 = vsub.f32 %v13122_v32, %v5348_v1  ;;  %v14461_v32 = vld [vmem:[#allocation76_spill] sm:$0xff] }
 0x527   : > { %14435 = vst [vmem:[#allocation95_spill] sm:$0xff] %v13143_v14  ;;  %v5339_v62 = vsub.f32 %v13114_v61, %v5338_v12  ;;  %v5378_v43 = vand.u32 4294901760, %v13143_v14  ;;  %v14462_v61 = vld [vmem:[#allocation81_spill] sm:$0xff] }
 0x528   : > { %8988 = vmatmul.mubr.f32.gmra.mrb[68].mxu1 %v5290_v54  ;;  %9303 = vmatmul.mubr.f32.gmra.mrb[70].mxu0 %v5308_v9  ;;  %v5358_v9 = vand.u32 4294901760, %v13129_v58  ;;  %v5368_v54 = vand.u32 4294901760, %v13136_v0 }
 0x529   : > { %8990 = vmatprep.mubr.f32.mxu1 %v5300_v46  ;;  %9305 = vmatprep.mubr.f32.mxu0 %v5318_v21  ;;  %v13148_v46 = vsub.f32 %v4685_v60, %v13138_v6  ;;  %v5330_v21 = vand.u32 4294901760, %v5329_v42  ;;  %v5340_v22 = vand.u32 4294901760, %v5339_v62 }
 0x52a   : > { %v5359_v40 = vsub.f32 %v13129_v58, %v5358_v9 }
 0x52b   : > { %14436 = vst [vmem:[#allocation96_spill] sm:$0xff] %v13148_v46 }
 0x52c   : > { %8991 = vmatmul.mubr.f32.gmra.mrb[70].mxu1 %v5310_v38  ;;  %9306 = vmatmul.mubr.f32.gmra.mrb[72].mxu0 %v5328_v19  ;;  %v5350_v19 = vand.u32 4294901760, %v5349_v10  ;;  %v5360_v60 = vand.u32 4294901760, %v5359_v40  ;;  %v5379_v38 = vsub.f32 %v13143_v14, %v5378_v43  ;;  %v14444_v10 = vld [vmem:[#allocation70_spill] sm:$0xff]  ;;  %v14447_v40 = vld [vmem:[#allocation21_spill] sm:$0xff]  ;;  %v14459_v14 = vld [vmem:[#allocation59_spill] sm:$0xff] }
 0x52d   : > { %8993 = vmatprep.mubr.f32.mxu1 %v5320_v7  ;;  %9308 = vmatprep.mubr.f32.mxu0 %v5338_v12  ;;  %v5369_v7 = vsub.f32 %v13136_v0, %v5368_v54  ;;  %v5388_v12 = vand.u32 4294901760, %v13148_v46  ;;  %v14460_v0 = vld [vmem:[#allocation60_spill] sm:$0xff] }
 0x52e   : > { %v5380_v58 = vand.u32 4294901760, %v5379_v38  ;;  %v14453_v38 = vld [vmem:[#allocation38_spill] sm:$0xff] }
 0x52f   : > { %v5370_v42 = vand.u32 4294901760, %v5369_v7  ;;  %v5389_v62 = vsub.f32 %v13148_v46, %v5388_v12  ;;  %v14450_v7 = vld [vmem:[#allocation32_spill] sm:$0xff]  ;;  %v14458_v46 = vld [vmem:[#allocation54_spill] sm:$0xff] }
 0x530   : > { %8994 = vmatmul.mubr.f32.gmra.mrb[72].mxu1 %v5330_v21  ;;  %9309 = vmatmul.mubr.f32.gmra.mrb[74].mxu0 %v5348_v1  ;;  %v14443_v21 = vld [vmem:[#allocation61_spill] sm:$0xff] }
 0x531   : > { %8996 = vmatprep.mubr.f32.mxu1 %v5340_v22  ;;  %9311 = vmatprep.mubr.f32.mxu0 %v5358_v9  ;;  %v5390_v1 = vand.u32 4294901760, %v5389_v62  ;;  %v10025_v9 = vpack.c.bf16 %v12536_v50, %v12531_v57  ;;  %v14439_v57 = vld [vmem:[#allocation40_spill] sm:$0xff]  ;;  %v14440_v50 = vld [vmem:[#allocation46_spill] sm:$0xff]  ;;  %v14455_v62 = vld [vmem:[#allocation45_spill] sm:$0xff] }
 0x532   : > { %v14446_v22 = vld [vmem:[#allocation18_spill] sm:$0xff] }
 0x534   : > { %8997 = vmatmul.mubr.f32.gmra.mrb[74].mxu1 %v5350_v19  ;;  %9312 = vmatmul.mubr.f32.gmra.mrb[76].mxu0 %v5368_v54  ;;  %v14445_v54 = vld [vmem:[#allocation17_spill] sm:$0xff]  ;;  %v14449_v19 = vld [vmem:[#allocation30_spill] sm:$0xff] }
 0x535   : > { %8999 = vmatprep.mubr.f32.mxu1 %v5360_v60  ;;  %9314 = vmatprep.mubr.f32.mxu0 %v5378_v43  ;;  %v14448_v43 = vld [vmem:[#allocation29_spill] sm:$0xff] }
 0x536   : > { %v14452_v60 = vld [vmem:[#allocation41_spill] sm:$0xff] }
 0x538   : > { %9000 = vmatmul.mubr.f32.gmra.mrb[76].mxu1 %v5370_v42  ;;  %9315 = vmatmul.mubr.f32.gmra.mrb[78].mxu0 %v5388_v12  ;;  %v14451_v12 = vld [vmem:[#allocation35_spill] sm:$0xff]  ;;  %v14454_v42 = vld [vmem:[#allocation44_spill] sm:$0xff] }
 0x539   : > { %9002 = vmatprep.mubr.f32.mxu1 %v5380_v58  ;;  %9325 = vmatprep.mubr.f32.mxu0 %v12540_v56  ;;  %v14442_v58 = vld [vmem:[#allocation58_spill] sm:$0xff] }
 0x53c   : > { %9003 = vmatmul.mubr.f32.gmra.mrb[78].mxu1 %v5390_v1  ;;  %9326 = vmatmul.mubr.f32.vlgmr.msra.gmra.mrb[16].mxu0 %v12550_v47  ;;  %v14456_v1 = vld [vmem:[#allocation52_spill] sm:$0xff] }
 0x53d   : > { %9013 = vmatprep.mubr.f32.mxu1 %v12540_v56  ;;  %9328 = vmatprep.mubr.f32.mxu0 %v12562_v8 }
 0x53e   : > { %10048 = vmatpush3.bf16.msra.mxu0 %v12443_v31  ;;  %v14437_v31 = vld [vmem:[#allocation28_spill] sm:$0xff] }
 0x53f   : > { %10050 = vmatprep.subr.bf16.mxu0 %v12476_v2 }
 0x540   : > { %9014 = vmatmul.mubr.f32.vlgmr.msra.gmra.mrb[16].mxu1 %v12550_v47  ;;  %9329 = vmatmul.mubr.f32.gmra.mrb[18].mxu0 %v12572_v25 }
 0x541   : > { %9016 = vmatprep.mubr.f32.mxu1 %v12562_v8  ;;  %9331 = vmatprep.mubr.f32.mxu0 %v12583_v33 }
 0x542   : > { %10024 = vmatpush3.bf16.msra.mxu1 %v12665_v53  ;;  %10052 = vmatpush3.bf16.msra.mxu0 %v12476_v2  ;;  %v14438_v2 = vld [vmem:[#allocation31_spill] sm:$0xff] }
 0x543   : > { %10026 = vmatprep.subr.bf16.mxu1 %v10025_v9  ;;  %v14441_v53 = vld [vmem:[#allocation43_spill] sm:$0xff] }
 0x544   : > { %9017 = vmatmul.mubr.f32.gmra.mrb[18].mxu1 %v12572_v25  ;;  %9332 = vmatmul.mubr.f32.gmra.mrb[20].mxu0 %v12594_v3 }
 0x545   : > { %9019 = vmatprep.mubr.f32.mxu1 %v12583_v33  ;;  %9334 = vmatprep.mubr.f32.mxu0 %v12604_v34 }
 0x546   : > { %10028 = vmatpush3.bf16.msra.mxu1 %v10025_v9  ;;  %v14457_v9 = vld [vmem:[#allocation50_spill] sm:$0xff] }
 0x548   : > { %9020 = vmatmul.mubr.f32.gmra.mrb[20].mxu1 %v12594_v3  ;;  %9335 = vmatmul.mubr.f32.gmra.mrb[22].mxu0 %v12614_v59 }
 0x549   : > { %9022 = vmatprep.mubr.f32.mxu1 %v12604_v34  ;;  %9337 = vmatprep.mubr.f32.mxu0 %v12624_v36 }
 0x54c   : > { %9023 = vmatmul.mubr.f32.gmra.mrb[22].mxu1 %v12614_v59  ;;  %9338 = vmatmul.mubr.f32.gmra.mrb[24].mxu0 %v12634_v41 }
 0x54d   : > { %9025 = vmatprep.mubr.f32.mxu1 %v12624_v36  ;;  %9340 = vmatprep.mubr.f32.mxu0 %v12644_v63 }
 0x550   : > { %9026 = vmatmul.mubr.f32.gmra.mrb[24].mxu1 %v12634_v41  ;;  %9341 = vmatmul.mubr.f32.gmra.mrb[26].mxu0 %v12654_v23 }
 0x551   : > { %9028 = vmatprep.mubr.f32.mxu1 %v12644_v63  ;;  %9343 = vmatprep.mubr.f32.mxu0 %v12668_v5 }
 0x554   : > { %9029 = vmatmul.mubr.f32.gmra.mrb[26].mxu1 %v12654_v23  ;;  %9344 = vmatmul.mubr.f32.gmra.mrb[28].mxu0 %v12683_v44 }
 0x555   : > { %9031 = vmatprep.mubr.f32.mxu1 %v12668_v5  ;;  %9346 = vmatprep.mubr.f32.mxu0 %v12701_v4 }
 0x558   : > { %9032 = vmatmul.mubr.f32.gmra.mrb[28].mxu1 %v12683_v44  ;;  %9347 = vmatmul.mubr.f32.gmra.mrb[30].mxu0 %v12725_v30 }
 0x559   : > { %9034 = vmatprep.mubr.f32.mxu1 %v12701_v4  ;;  %9349 = vmatprep.mubr.f32.mxu0 %v12686_v11 }
 0x55c   : > { %9035 = vmatmul.mubr.f32.gmra.mrb[30].mxu1 %v12725_v30  ;;  %9350 = vmatmul.mubr.f32.gmra.mrb[32].mxu0 %v12696_v20 }
 0x55d   : > { %9037 = vmatprep.mubr.f32.mxu1 %v12686_v11  ;;  %9352 = vmatprep.mubr.f32.mxu0 %v12707_v27 }
 0x560   : > { %9038 = vmatmul.mubr.f32.gmra.mrb[32].mxu1 %v12696_v20  ;;  %9353 = vmatmul.mubr.f32.gmra.mrb[34].mxu0 %v12720_v15 }
 0x561   : > { %9040 = vmatprep.mubr.f32.mxu1 %v12707_v27  ;;  %9355 = vmatprep.mubr.f32.mxu0 %v12731_v24 }
 0x564   : > { %9041 = vmatmul.mubr.f32.gmra.mrb[34].mxu1 %v12720_v15  ;;  %9356 = vmatmul.mubr.f32.gmra.mrb[36].mxu0 %v12747_v37 }
 0x565   : > { %9043 = vmatprep.mubr.f32.mxu1 %v12731_v24  ;;  %9358 = vmatprep.mubr.f32.mxu0 %v12750_v55 }
 0x568   : > { %9044 = vmatmul.mubr.f32.gmra.mrb[36].mxu1 %v12747_v37  ;;  %9359 = vmatmul.mubr.f32.gmra.mrb[38].mxu0 %v14437_v31 }
 0x569   : > { %9046 = vmatprep.mubr.f32.mxu1 %v12750_v55  ;;  %9361 = vmatprep.mubr.f32.mxu0 %v14438_v2 }
 0x56c   : > { %9047 = vmatmul.mubr.f32.gmra.mrb[38].mxu1 %v14437_v31  ;;  %9362 = vmatmul.mubr.f32.gmra.mrb[40].mxu0 %v14439_v57 }
 0x56d   : > { %9049 = vmatprep.mubr.f32.mxu1 %v14438_v2  ;;  %9364 = vmatprep.mubr.f32.mxu0 %v14440_v50 }
 0x570   : > { %9050 = vmatmul.mubr.f32.gmra.mrb[40].mxu1 %v14439_v57  ;;  %9365 = vmatmul.mubr.f32.gmra.mrb[42].mxu0 %v14441_v53 }
 0x571   : > { %9052 = vmatprep.mubr.f32.mxu1 %v14440_v50  ;;  %9367 = vmatprep.mubr.f32.mxu0 %v14442_v58 }
 0x574   : > { %9053 = vmatmul.mubr.f32.gmra.mrb[42].mxu1 %v14441_v53  ;;  %9368 = vmatmul.mubr.f32.gmra.mrb[44].mxu0 %v14443_v21 }
 0x575   : > { %9055 = vmatprep.mubr.f32.mxu1 %v14442_v58  ;;  %9370 = vmatprep.mubr.f32.mxu0 %v14444_v10 }
 0x578   : > { %9056 = vmatmul.mubr.f32.gmra.mrb[44].mxu1 %v14443_v21  ;;  %9371 = vmatmul.mubr.f32.gmra.mrb[46].mxu0 %v14445_v54 }
 0x579   : > { %9058 = vmatprep.mubr.f32.mxu1 %v14444_v10  ;;  %9373 = vmatprep.mubr.f32.mxu0 %v14446_v22 }
 0x57c   : > { %9059 = vmatmul.mubr.f32.gmra.mrb[46].mxu1 %v14445_v54  ;;  %9374 = vmatmul.mubr.f32.gmra.mrb[48].mxu0 %v14447_v40 }
 0x57d   : > { %9061 = vmatprep.mubr.f32.mxu1 %v14446_v22  ;;  %9376 = vmatprep.mubr.f32.mxu0 %v14448_v43 }
 0x580   : > { %9062 = vmatmul.mubr.f32.gmra.mrb[48].mxu1 %v14447_v40  ;;  %9377 = vmatmul.mubr.f32.gmra.mrb[50].mxu0 %v14449_v19 }
 0x581   : > { %9064 = vmatprep.mubr.f32.mxu1 %v14448_v43  ;;  %9379 = vmatprep.mubr.f32.mxu0 %v14450_v7 }
 0x584   : > { %9065 = vmatmul.mubr.f32.gmra.mrb[50].mxu1 %v14449_v19  ;;  %9380 = vmatmul.mubr.f32.gmra.mrb[52].mxu0 %v12908_v45 }
 0x585   : > { %9067 = vmatprep.mubr.f32.mxu1 %v14450_v7  ;;  %9382 = vmatprep.mubr.f32.mxu0 %v14451_v12 }
 0x588   : > { %9068 = vmatmul.mubr.f32.gmra.mrb[52].mxu1 %v12908_v45  ;;  %9383 = vmatmul.mubr.f32.gmra.mrb[54].mxu0 %v12928_v16 }
 0x589   : > { %9070 = vmatprep.mubr.f32.mxu1 %v14451_v12  ;;  %9385 = vmatprep.mubr.f32.mxu0 %v14452_v60 }
 0x58c   : > { %9071 = vmatmul.mubr.f32.gmra.mrb[54].mxu1 %v12928_v16  ;;  %9386 = vmatmul.mubr.f32.gmra.mrb[56].mxu0 %v14453_v38 }
 0x58d   : > { %9073 = vmatprep.mubr.f32.mxu1 %v14452_v60  ;;  %9388 = vmatprep.mubr.f32.mxu0 %v14454_v42 }
 0x590   : > { %9074 = vmatmul.mubr.f32.gmra.mrb[56].mxu1 %v14453_v38  ;;  %9389 = vmatmul.mubr.f32.gmra.mrb[58].mxu0 %v14455_v62 }
 0x591   : > { %9076 = vmatprep.mubr.f32.mxu1 %v14454_v42  ;;  %9391 = vmatprep.mubr.f32.mxu0 %v14456_v1 }
 0x594   : > { %9077 = vmatmul.mubr.f32.gmra.mrb[58].mxu1 %v14455_v62  ;;  %9392 = vmatmul.mubr.f32.gmra.mrb[60].mxu0 %v14457_v9 }
 0x595   : > { %9079 = vmatprep.mubr.f32.mxu1 %v14456_v1  ;;  %9394 = vmatprep.mubr.f32.mxu0 %v13011_v28 }
 0x598   : > { %9080 = vmatmul.mubr.f32.gmra.mrb[60].mxu1 %v14457_v9  ;;  %9395 = vmatmul.mubr.f32.gmra.mrb[62].mxu0 %v13036_v26 }
 0x599   : > { %9082 = vmatprep.mubr.f32.mxu1 %v13011_v28  ;;  %9397 = vmatprep.mubr.f32.mxu0 %v12995_v18 }
 0x59c   : > { %9083 = vmatmul.mubr.f32.gmra.mrb[62].mxu1 %v13036_v26  ;;  %9398 = vmatmul.mubr.f32.gmra.mrb[64].mxu0 %v14458_v46 }
 0x59d   : > { %9085 = vmatprep.mubr.f32.mxu1 %v12995_v18  ;;  %9400 = vmatprep.mubr.f32.mxu0 %v14459_v14 }
 0x5a0   : > { %9086 = vmatmul.mubr.f32.gmra.mrb[64].mxu1 %v14458_v46  ;;  %9401 = vmatmul.mubr.f32.gmra.mrb[66].mxu0 %v14460_v0 }
 0x5a1   : > { %9088 = vmatprep.mubr.f32.mxu1 %v14459_v14  ;;  %9403 = vmatprep.mubr.f32.mxu0 %v13043_v51 }
 0x5a4   : > { %9089 = vmatmul.mubr.f32.gmra.mrb[66].mxu1 %v14460_v0  ;;  %9404 = vmatmul.mubr.f32.gmra.mrb[68].mxu0 %v13053_v29 }
 0x5a5   : > { %9091 = vmatprep.mubr.f32.mxu1 %v13043_v51  ;;  %9406 = vmatprep.mubr.f32.mxu0 %v14461_v32 }
 0x5a8   : > { %9092 = vmatmul.mubr.f32.gmra.mrb[68].mxu1 %v13053_v29  ;;  %9407 = vmatmul.mubr.f32.gmra.mrb[70].mxu0 %v14462_v61 }
 0x5a9   : > { %9094 = vmatprep.mubr.f32.mxu1 %v14461_v32  ;;  %9409 = vmatprep.mubr.f32.mxu0 %v14463_v13 }
 0x5ac   : > { %9095 = vmatmul.mubr.f32.gmra.mrb[70].mxu1 %v14462_v61  ;;  %9410 = vmatmul.mubr.f32.gmra.mrb[72].mxu0 %v13095_v52 }
 0x5ad   : > { %9097 = vmatprep.mubr.f32.mxu1 %v14463_v13  ;;  %9412 = vmatprep.mubr.f32.mxu0 %v13098_v17 }
 0x5b0   : > { %9098 = vmatmul.mubr.f32.gmra.mrb[72].mxu1 %v13095_v52  ;;  %9413 = vmatmul.mubr.f32.gmra.mrb[74].mxu0 %v13110_v35 }
 0x5b1   : > { %9100 = vmatprep.mubr.f32.mxu1 %v13098_v17  ;;  %9415 = vmatprep.mubr.f32.mxu0 %v13116_v49  ;;  %v14464_v17 = vld [vmem:[#allocation87_spill] sm:$0xff] }
 0x5b4   : > { %9101 = vmatmul.mubr.f32.gmra.mrb[74].mxu1 %v13110_v35  ;;  %9416 = vmatmul.mubr.f32.gmra.mrb[76].mxu0 %v13124_v48  ;;  %v14465_v35 = vld [vmem:[#allocation8_spill] sm:$0xff] }
 0x5b5   : > { %9103 = vmatprep.mubr.f32.mxu1 %v13116_v49  ;;  %9418 = vmatprep.mubr.f32.mxu0 %v13131_v39  ;;  %v14466_v49 = vld [vmem:[#allocation10_spill] sm:$0xff] }
 0x5b8   : > { %9104 = vmatmul.mubr.f32.gmra.mrb[76].mxu1 %v13124_v48  ;;  %9419 = vmatmul.mubr.f32.gmra.mrb[78].mxu0 %v13138_v6  ;;  %v14467_v48 = vld [vmem:[#allocation2_spill] sm:$0xff] }
 0x5b9   : > { %9106 = vmatprep.mubr.f32.mxu1 %v13131_v39  ;;  %9429 = vmatprep.mubr.f32.mxu0 %v12540_v56  ;;  %v14468_v56 = vld [vmem:[#allocation65_spill] sm:$0xff] }
 0x5bc   : > { %9107 = vmatmul.mubr.f32.gmra.mrb[78].mxu1 %v13138_v6  ;;  %9430 = vmatmul.mubr.f32.vlgmr.msra.gmra.mrb[16].mxu0 %v12550_v47  ;;  %v14469_v47 = vld [vmem:[#allocation68_spill] sm:$0xff] }
 0x5bd   : > { %9117 = vmatprep.mubr.f32.mxu1 %v14464_v17  ;;  %9432 = vmatprep.mubr.f32.mxu0 %v12562_v8  ;;  %v14470_v8 = vld [vmem:[#allocation75_spill] sm:$0xff] }
 0x5be   : > { %v14492_v17 = vld [vmem:[#allocation67_spill] sm:$0xff] }
 0x5c0   : > { %9118 = vmatmul.mubr.f32.vlgmr.msra.gmra.mrb[16].mxu1 %v14465_v35  ;;  %9433 = vmatmul.mubr.f32.gmra.mrb[18].mxu0 %v12572_v25  ;;  %v14471_v25 = vld [vmem:[#allocation77_spill] sm:$0xff] }
 0x5c1   : > { %9120 = vmatprep.mubr.f32.mxu1 %v14466_v49  ;;  %9435 = vmatprep.mubr.f32.mxu0 %v12583_v33  ;;  %v14472_v33 = vld [vmem:[#allocation80_spill] sm:$0xff]  ;;  %v14491_v35 = vld [vmem:[#allocation57_spill] sm:$0xff]  ;;  %v14493_v49 = vld [vmem:[#allocation71_spill] sm:$0xff] }
 0x5c4   : > { %9121 = vmatmul.mubr.f32.gmra.mrb[18].mxu1 %v14467_v48  ;;  %9436 = vmatmul.mubr.f32.gmra.mrb[20].mxu0 %v12594_v3  ;;  %v14473_v3 = vld [vmem:[#allocation82_spill] sm:$0xff]  ;;  %v14494_v48 = vld [vmem:[#allocation20_spill] sm:$0xff] }
 0x5c5   : > { %9123 = vmatprep.mubr.f32.mxu1 %v14468_v56  ;;  %9438 = vmatprep.mubr.f32.mxu0 %v12604_v34  ;;  %v14474_v34 = vld [vmem:[#allocation91_spill] sm:$0xff] }
 0x5c6   : > { %v14530_v56 = vld [vmem:[#allocation95_spill] sm:$0xff] }
 0x5c8   : > { %9124 = vmatmul.mubr.f32.gmra.mrb[20].mxu1 %v14469_v47  ;;  %9439 = vmatmul.mubr.f32.gmra.mrb[22].mxu0 %v12614_v59  ;;  %v14475_v59 = vld [vmem:[#allocation3_spill] sm:$0xff]  ;;  %v14531_v47 = vld [vmem:[#allocation96_spill] sm:$0xff] }
 0x5c9   : > { %9126 = vmatprep.mubr.f32.mxu1 %v14470_v8  ;;  %9441 = vmatprep.mubr.f32.mxu0 %v12624_v36  ;;  %v14476_v36 = vld [vmem:[#allocation4_spill] sm:$0xff] }
 0x5cc   : > { %9127 = vmatmul.mubr.f32.gmra.mrb[22].mxu1 %v14471_v25  ;;  %9442 = vmatmul.mubr.f32.gmra.mrb[24].mxu0 %v12634_v41  ;;  %v14477_v41 = vld [vmem:[#allocation6_spill] sm:$0xff] }
 0x5cd   : > { %9129 = vmatprep.mubr.f32.mxu1 %v14472_v33  ;;  %9444 = vmatprep.mubr.f32.mxu0 %v12644_v63  ;;  %v14478_v63 = vld [vmem:[#allocation11_spill] sm:$0xff]  ;;  %v13423_v33 = vld [vmem:[%s13633_s6] ss:$0 sm:$0xff] }
 0x5d0   : > { %9130 = vmatmul.mubr.f32.gmra.mrb[24].mxu1 %v14473_v3  ;;  %9445 = vmatmul.mubr.f32.gmra.mrb[26].mxu0 %v12654_v23  ;;  %v14479_v23 = vld [vmem:[#allocation22_spill] sm:$0xff] }
 0x5d1   : > { %9132 = vmatprep.mubr.f32.mxu1 %v14474_v34  ;;  %9447 = vmatprep.mubr.f32.mxu0 %v12668_v5  ;;  %v14480_v5 = vld [vmem:[#allocation5_spill] sm:$0xff] }
 0x5d4   : > { %9133 = vmatmul.mubr.f32.gmra.mrb[26].mxu1 %v14475_v59  ;;  %9448 = vmatmul.mubr.f32.gmra.mrb[28].mxu0 %v12683_v44  ;;  %v14481_v44 = vld [vmem:[#allocation14_spill] sm:$0xff] }
 0x5d5   : > { %9135 = vmatprep.mubr.f32.mxu1 %v14476_v36  ;;  %9450 = vmatprep.mubr.f32.mxu0 %v12701_v4  ;;  %v14482_v4 = vld [vmem:[#allocation16_spill] sm:$0xff] }
 0x5d8   : > { %9136 = vmatmul.mubr.f32.gmra.mrb[28].mxu1 %v14477_v41  ;;  %9451 = vmatmul.mubr.f32.gmra.mrb[30].mxu0 %v12725_v30  ;;  %v14483_v30 = vld [vmem:[#allocation19_spill] sm:$0xff] }
 0x5d9   : > { %9138 = vmatprep.mubr.f32.mxu1 %v14478_v63  ;;  %9453 = vmatprep.mubr.f32.mxu0 %v12686_v11  ;;  %v14484_v11 = vld [vmem:[#allocation25_spill] sm:$0xff] }
 0x5dc   : > { %9139 = vmatmul.mubr.f32.gmra.mrb[30].mxu1 %v14479_v23  ;;  %9454 = vmatmul.mubr.f32.gmra.mrb[32].mxu0 %v12696_v20  ;;  %v14485_v20 = vld [vmem:[#allocation9_spill] sm:$0xff] }
 0x5dd   : > { %9141 = vmatprep.mubr.f32.mxu1 %v14480_v5  ;;  %9456 = vmatprep.mubr.f32.mxu0 %v12707_v27  ;;  %v14486_v27 = vld [vmem:[#allocation34_spill] sm:$0xff] }
 0x5e0   : > { %9142 = vmatmul.mubr.f32.gmra.mrb[32].mxu1 %v14481_v44  ;;  %9457 = vmatmul.mubr.f32.gmra.mrb[34].mxu0 %v12720_v15  ;;  %v14487_v15 = vld [vmem:[#allocation37_spill] sm:$0xff] }
 0x5e1   : > { %9144 = vmatprep.mubr.f32.mxu1 %v14482_v4  ;;  %9459 = vmatprep.mubr.f32.mxu0 %v12731_v24  ;;  %v14488_v24 = vld [vmem:[#allocation7_spill] sm:$0xff] }
 0x5e4   : > { %9145 = vmatmul.mubr.f32.gmra.mrb[34].mxu1 %v14483_v30  ;;  %9460 = vmatmul.mubr.f32.gmra.mrb[36].mxu0 %v12747_v37  ;;  %v14489_v37 = vld [vmem:[#allocation49_spill] sm:$0xff] }
 0x5e5   : > { %9147 = vmatprep.mubr.f32.mxu1 %v14484_v11  ;;  %9462 = vmatprep.mubr.f32.mxu0 %v12750_v55  ;;  %v14490_v55 = vld [vmem:[#allocation53_spill] sm:$0xff] }
 0x5e8   : > { %9148 = vmatmul.mubr.f32.gmra.mrb[36].mxu1 %v14485_v20  ;;  %9463 = vmatmul.mubr.f32.gmra.mrb[38].mxu0 %v14437_v31  ;;  %v14495_v31 = vld [vmem:[#allocation23_spill] sm:$0xff] }
 0x5e9   : > { %9150 = vmatprep.mubr.f32.mxu1 %v14486_v27  ;;  %9465 = vmatprep.mubr.f32.mxu0 %v14438_v2  ;;  %v14496_v2 = vld [vmem:[#allocation27_spill] sm:$0xff] }
 0x5ec   : > { %9151 = vmatmul.mubr.f32.gmra.mrb[38].mxu1 %v14487_v15  ;;  %9466 = vmatmul.mubr.f32.gmra.mrb[40].mxu0 %v14439_v57  ;;  %v14497_v57 = vld [vmem:[#allocation24_spill] sm:$0xff] }
 0x5ed   : > { %9153 = vmatprep.mubr.f32.mxu1 %v14488_v24  ;;  %9468 = vmatprep.mubr.f32.mxu0 %v14440_v50  ;;  %v14498_v50 = vld [vmem:[#allocation26_spill] sm:$0xff] }
 0x5f0   : > { %9154 = vmatmul.mubr.f32.gmra.mrb[40].mxu1 %v14489_v37  ;;  %9469 = vmatmul.mubr.f32.gmra.mrb[42].mxu0 %v14441_v53  ;;  %v14499_v53 = vld [vmem:[#allocation12_spill] sm:$0xff] }
 0x5f1   : > { %9156 = vmatprep.mubr.f32.mxu1 %v14490_v55  ;;  %9471 = vmatprep.mubr.f32.mxu0 %v14442_v58  ;;  %v14500_v58 = vld [vmem:[#allocation33_spill] sm:$0xff] }
 0x5f4   : > { %9157 = vmatmul.mubr.f32.gmra.mrb[42].mxu1 %v14491_v35  ;;  %9472 = vmatmul.mubr.f32.gmra.mrb[44].mxu0 %v14443_v21  ;;  %v14501_v21 = vld [vmem:[#allocation13_spill] sm:$0xff] }
 0x5f5   : > { %9159 = vmatprep.mubr.f32.mxu1 %v14492_v17  ;;  %9474 = vmatprep.mubr.f32.mxu0 %v14444_v10  ;;  %v14502_v10 = vld [vmem:[#allocation39_spill] sm:$0xff] }
 0x5f8   : > { %9160 = vmatmul.mubr.f32.gmra.mrb[44].mxu1 %v14493_v49  ;;  %9475 = vmatmul.mubr.f32.gmra.mrb[46].mxu0 %v14445_v54  ;;  %v14503_v54 = vld [vmem:[#allocation36_spill] sm:$0xff] }
 0x5f9   : > { %9162 = vmatprep.mubr.f32.mxu1 %v14494_v48  ;;  %9477 = vmatprep.mubr.f32.mxu0 %v14446_v22  ;;  %v14504_v22 = vld [vmem:[#allocation42_spill] sm:$0xff] }
 0x5fc   : > { %9163 = vmatmul.mubr.f32.gmra.mrb[46].mxu1 %v14495_v31  ;;  %9478 = vmatmul.mubr.f32.gmra.mrb[48].mxu0 %v14447_v40  ;;  %v14506_v40 = vld [vmem:[#allocation47_spill] sm:$0xff] }
 0x5fd   : > { %9165 = vmatprep.mubr.f32.mxu1 %v14496_v2  ;;  %9480 = vmatprep.mubr.f32.mxu0 %v14448_v43  ;;  %v14508_v43 = vld [vmem:[#allocation48_spill] sm:$0xff] }
 0x600   : > { %9166 = vmatmul.mubr.f32.gmra.mrb[48].mxu1 %v14497_v57  ;;  %9481 = vmatmul.mubr.f32.gmra.mrb[50].mxu0 %v14449_v19  ;;  %v14509_v19 = vld [vmem:[#allocation55_spill] sm:$0xff] }
 0x601   : > { %9168 = vmatprep.mubr.f32.mxu1 %v14498_v50  ;;  %9483 = vmatprep.mubr.f32.mxu0 %v14450_v7  ;;  %v14510_v7 = vld [vmem:[#allocation64_spill] sm:$0xff] }
 0x604   : > { %9169 = vmatmul.mubr.f32.gmra.mrb[50].mxu1 %v14499_v53  ;;  %9484 = vmatmul.mubr.f32.gmra.mrb[52].mxu0 %v12908_v45  ;;  %v14505_v45 = vld [vmem:[#allocation15_spill] sm:$0xff] }
 0x605   : > { %9171 = vmatprep.mubr.f32.mxu1 %v14500_v58  ;;  %9486 = vmatprep.mubr.f32.mxu0 %v14451_v12  ;;  %v14511_v12 = vld [vmem:[#allocation66_spill] sm:$0xff] }
 0x608   : > { %9172 = vmatmul.mubr.f32.gmra.mrb[52].mxu1 %v14501_v21  ;;  %9487 = vmatmul.mubr.f32.gmra.mrb[54].mxu0 %v12928_v16  ;;  %v14507_v16 = vld [vmem:[#allocation51_spill] sm:$0xff] }
 0x609   : > { %9174 = vmatprep.mubr.f32.mxu1 %v14502_v10  ;;  %9489 = vmatprep.mubr.f32.mxu0 %v14452_v60  ;;  %v14512_v60 = vld [vmem:[#allocation56_spill] sm:$0xff] }
 0x60c   : > { %9175 = vmatmul.mubr.f32.gmra.mrb[54].mxu1 %v14503_v54  ;;  %9490 = vmatmul.mubr.f32.gmra.mrb[56].mxu0 %v14453_v38  ;;  %v14513_v38 = vld [vmem:[#allocation63_spill] sm:$0xff] }
 0x60d   : > { %9177 = vmatprep.mubr.f32.mxu1 %v14504_v22  ;;  %9492 = vmatprep.mubr.f32.mxu0 %v14454_v42  ;;  %v14521_v42 = vld [vmem:[#allocation92_spill] sm:$0xff] }
 0x610   : > { %9178 = vmatmul.mubr.f32.gmra.mrb[56].mxu1 %v14505_v45  ;;  %9493 = vmatmul.mubr.f32.gmra.mrb[58].mxu0 %v14455_v62  ;;  %v14523_v62 = vld [vmem:[#allocation79_spill] sm:$0xff] }
 0x611   : > { %9180 = vmatprep.mubr.f32.mxu1 %v14506_v40  ;;  %9495 = vmatprep.mubr.f32.mxu0 %v14456_v1  ;;  %v14525_v1 = vld [vmem:[#allocation84_spill] sm:$0xff] }
 0x614   : > { %9181 = vmatmul.mubr.f32.gmra.mrb[58].mxu1 %v14507_v16  ;;  %9496 = vmatmul.mubr.f32.gmra.mrb[60].mxu0 %v14457_v9  ;;  %v14527_v9 = vld [vmem:[#allocation90_spill] sm:$0xff] }
 0x615   : > { %9183 = vmatprep.mubr.f32.mxu1 %v14508_v43  ;;  %9498 = vmatprep.mubr.f32.mxu0 %v13011_v28  ;;  %v14514_v28 = vld [vmem:[#allocation62_spill] sm:$0xff] }
 0x618   : > { %9184 = vmatmul.mubr.f32.gmra.mrb[60].mxu1 %v14509_v19  ;;  %9499 = vmatmul.mubr.f32.gmra.mrb[62].mxu0 %v13036_v26  ;;  %v14515_v26 = vld [vmem:[#allocation69_spill] sm:$0xff] }
 0x619   : > { %9186 = vmatprep.mubr.f32.mxu1 %v14510_v7  ;;  %9501 = vmatprep.mubr.f32.mxu0 %v12995_v18  ;;  %v14516_v18 = vld [vmem:[#allocation72_spill] sm:$0xff] }
 0x61c   : > { %9187 = vmatmul.mubr.f32.gmra.mrb[62].mxu1 %v14511_v12  ;;  %9502 = vmatmul.mubr.f32.gmra.mrb[64].mxu0 %v14458_v46  ;;  %v14517_v46 = vld [vmem:[#allocation74_spill] sm:$0xff] }
 0x61d   : > { %9189 = vmatprep.mubr.f32.mxu1 %v14512_v60  ;;  %9504 = vmatprep.mubr.f32.mxu0 %v14459_v14  ;;  %v14518_v14 = vld [vmem:[#allocation78_spill] sm:$0xff] }
 0x620   : > { %9190 = vmatmul.mubr.f32.gmra.mrb[64].mxu1 %v14513_v38  ;;  %9505 = vmatmul.mubr.f32.gmra.mrb[66].mxu0 %v14460_v0  ;;  %v14519_v0 = vld [vmem:[#allocation88_spill] sm:$0xff] }
 0x621   : > { %9192 = vmatprep.mubr.f32.mxu1 %v14514_v28  ;;  %9507 = vmatprep.mubr.f32.mxu0 %v13043_v51  ;;  %v14520_v51 = vld [vmem:[#allocation89_spill] sm:$0xff] }
 0x624   : > { %9193 = vmatmul.mubr.f32.gmra.mrb[66].mxu1 %v14515_v26  ;;  %9508 = vmatmul.mubr.f32.gmra.mrb[68].mxu0 %v13053_v29  ;;  %v14522_v29 = vld [vmem:[#allocation73_spill] sm:$0xff] }
 0x625   : > { %9195 = vmatprep.mubr.f32.mxu1 %v14516_v18  ;;  %9510 = vmatprep.mubr.f32.mxu0 %v14461_v32  ;;  %v14524_v32 = vld [vmem:[#allocation83_spill] sm:$0xff] }
 0x628   : > { %9196 = vmatmul.mubr.f32.gmra.mrb[68].mxu1 %v14517_v46  ;;  %9511 = vmatmul.mubr.f32.gmra.mrb[70].mxu0 %v14462_v61  ;;  %v14526_v61 = vld [vmem:[#allocation86_spill] sm:$0xff] }
 0x629   : > { %9198 = vmatprep.mubr.f32.mxu1 %v14518_v14  ;;  %9513 = vmatprep.mubr.f32.mxu0 %v14463_v13  ;;  %v14528_v13 = vld [vmem:[#allocation94_spill] sm:$0xff] }
 0x62c   : > { %9199 = vmatmul.mubr.f32.gmra.mrb[70].mxu1 %v14519_v0  ;;  %9514 = vmatmul.mubr.f32.gmra.mrb[72].mxu0 %v13095_v52  ;;  %v14529_v52 = vld [vmem:[#allocation93_spill] sm:$0xff] }
 0x62d   : > { %9201 = vmatprep.mubr.f32.mxu1 %v14520_v51  ;;  %9516 = vmatprep.mubr.f32.mxu0 %v14521_v42 }
 0x630   : > { %9202 = vmatmul.mubr.f32.gmra.mrb[72].mxu1 %v14522_v29  ;;  %9517 = vmatmul.mubr.f32.gmra.mrb[74].mxu0 %v14523_v62 }
 0x631   : > { %9204 = vmatprep.mubr.f32.mxu1 %v14524_v32  ;;  %9519 = vmatprep.mubr.f32.mxu0 %v14525_v1 }
 0x634   : > { %9205 = vmatmul.mubr.f32.gmra.mrb[74].mxu1 %v14526_v61  ;;  %9520 = vmatmul.mubr.f32.gmra.mrb[76].mxu0 %v14527_v9 }
 0x635   : > { %9207 = vmatprep.mubr.f32.mxu1 %v14528_v13  ;;  %9522 = vmatprep.mubr.f32.mxu0 %v13131_v39 }
 0x638   : > { %9208 = vmatmul.mubr.f32.gmra.mrb[76].mxu1 %v14529_v52  ;;  %9523 = vmatmul.mubr.f32.gmra.mrb[78].mxu0 %v13138_v6 }
 0x639   : > { %9210 = vmatprep.mubr.f32.mxu1 %v14530_v56 }
 0x63c   : > { %9211 = vmatmul.mubr.f32.gmra.mrb[78].mxu1 %v14531_v47 }
 0x68f   : > { %v9431_v8 = vpop.f32.mrb[16].mxu0 }
 0x690   : > { %v7499_v25 = vpop.f32.mrb[17].mxu0 }
 0x693   : > { %v9119_v3 = vpop.f32.mrb[16].mxu1  ;;  %v9434_v34 = vpop.f32.mrb[18].mxu0 }
 0x694   : > { %v10085_v59 = vadd.f32 %v9119_v3, %v13423_v33  ;;  %v5941_v39 = vpop.f32.mrb[17].mxu1  ;;  %v7511_v36 = vpop.f32.mrb[19].mxu0 }
 0x695   : > { %v10087_v6 = vadd.f32 %v13423_v33, %v5941_v39 }
 0x696   : > { %v10086_v41 = vadd.f32 %v10085_v59, %v9431_v8 }
 0x697   : > { %v10088_v63 = vadd.f32 %v10087_v6, %v7499_v25  ;;  %v9122_v23 = vpop.f32.mrb[18].mxu1  ;;  %v9437_v5 = vpop.f32.mrb[20].mxu0 }
 0x698   : > { %7882 = vst.msk [vmem:[%s13431_s11 + $0x8] sm:$0xff] %vm374_vm0, %v10086_v41  ;;  %v10089_v44 = vadd.f32 %v9122_v23, %v13423_v33  ;;  %v5955_v4 = vpop.f32.mrb[19].mxu1  ;;  %v7523_v30 = vpop.f32.mrb[21].mxu0 }
 0x699   : > { %7881 = vst.msk [vmem:[%s13431_s11] sm:$0xff] %vm374_vm0, %v10088_v63  ;;  %v10091_v11 = vadd.f32 %v13423_v33, %v5955_v4 }
 0x69a   : > { %v10090_v20 = vadd.f32 %v10089_v44, %v9434_v34 }
 0x69b   : > { %v10092_v27 = vadd.f32 %v10091_v11, %v7511_v36  ;;  %v9125_v15 = vpop.f32.mrb[20].mxu1  ;;  %v9440_v24 = vpop.f32.mrb[22].mxu0 }
 0x69c   : > { %7884 = vst.msk [vmem:[%s13431_s11 + $0x18] sm:$0xff] %vm374_vm0, %v10090_v20  ;;  %v10093_v37 = vadd.f32 %v9125_v15, %v13423_v33  ;;  %v5969_v55 = vpop.f32.mrb[21].mxu1  ;;  %v7535_v35 = vpop.f32.mrb[23].mxu0 }
 0x69d   : > { %7883 = vst.msk [vmem:[%s13431_s11 + $0x10] sm:$0xff] %vm374_vm0, %v10092_v27  ;;  %v10095_v17 = vadd.f32 %v13423_v33, %v5969_v55 }
 0x69e   : > { %v10094_v49 = vadd.f32 %v10093_v37, %v9437_v5 }
 0x69f   : > { %v10096_v48 = vadd.f32 %v10095_v17, %v7523_v30  ;;  %v9128_v31 = vpop.f32.mrb[22].mxu1  ;;  %v9443_v2 = vpop.f32.mrb[24].mxu0 }
 0x6a0   : > { %7886 = vst.msk [vmem:[%s13431_s11 + $0x28] sm:$0xff] %vm374_vm0, %v10094_v49  ;;  %v10097_v57 = vadd.f32 %v9128_v31, %v13423_v33  ;;  %v5983_v50 = vpop.f32.mrb[23].mxu1  ;;  %v7547_v53 = vpop.f32.mrb[25].mxu0 }
 0x6a1   : > { %7885 = vst.msk [vmem:[%s13431_s11 + $0x20] sm:$0xff] %vm374_vm0, %v10096_v48  ;;  %v10099_v58 = vadd.f32 %v13423_v33, %v5983_v50 }
 0x6a2   : > { %v10098_v21 = vadd.f32 %v10097_v57, %v9440_v24 }
 0x6a3   : > { %v10100_v10 = vadd.f32 %v10099_v58, %v7535_v35  ;;  %v9131_v54 = vpop.f32.mrb[24].mxu1  ;;  %v9446_v22 = vpop.f32.mrb[26].mxu0 }
 0x6a4   : > { %7888 = vst.msk [vmem:[%s13431_s11 + $0x38] sm:$0xff] %vm374_vm0, %v10098_v21  ;;  %v10101_v45 = vadd.f32 %v9131_v54, %v13423_v33  ;;  %v5997_v40 = vpop.f32.mrb[25].mxu1  ;;  %v7559_v16 = vpop.f32.mrb[27].mxu0 }
 0x6a5   : > { %7887 = vst.msk [vmem:[%s13431_s11 + $0x30] sm:$0xff] %vm374_vm0, %v10100_v10  ;;  %v10103_v43 = vadd.f32 %v13423_v33, %v5997_v40 }
 0x6a6   : > { %v10102_v19 = vadd.f32 %v10101_v45, %v9443_v2 }
 0x6a7   : > { %v10104_v7 = vadd.f32 %v10103_v43, %v7547_v53  ;;  %v9134_v12 = vpop.f32.mrb[26].mxu1  ;;  %v9449_v60 = vpop.f32.mrb[28].mxu0 }
 0x6a8   : > { %7890 = vst.msk [vmem:[%s13431_s11 + $0x48] sm:$0xff] %vm374_vm0, %v10102_v19  ;;  %v10105_v38 = vadd.f32 %v9134_v12, %v13423_v33  ;;  %v6011_v28 = vpop.f32.mrb[27].mxu1  ;;  %v7571_v26 = vpop.f32.mrb[29].mxu0 }
 0x6a9   : > { %7889 = vst.msk [vmem:[%s13431_s11 + $0x40] sm:$0xff] %vm374_vm0, %v10104_v7  ;;  %v10107_v18 = vadd.f32 %v13423_v33, %v6011_v28 }
 0x6aa   : > { %v10106_v46 = vadd.f32 %v10105_v38, %v9446_v22 }
 0x6ab   : > { %v10108_v14 = vadd.f32 %v10107_v18, %v7559_v16  ;;  %v9137_v0 = vpop.f32.mrb[28].mxu1  ;;  %v9452_v51 = vpop.f32.mrb[30].mxu0 }
 0x6ac   : > { %7892 = vst.msk [vmem:[%s13431_s11 + $0x58] sm:$0xff] %vm374_vm0, %v10106_v46  ;;  %v10109_v42 = vadd.f32 %v9137_v0, %v13423_v33  ;;  %v6025_v29 = vpop.f32.mrb[29].mxu1  ;;  %v7583_v62 = vpop.f32.mrb[31].mxu0 }
 0x6ad   : > { %7891 = vst.msk [vmem:[%s13431_s11 + $0x50] sm:$0xff] %vm374_vm0, %v10108_v14  ;;  %v10111_v32 = vadd.f32 %v13423_v33, %v6025_v29 }
 0x6ae   : > { %v10110_v1 = vadd.f32 %v10109_v42, %v9449_v60 }
 0x6af   : > { %v10112_v61 = vadd.f32 %v10111_v32, %v7571_v26  ;;  %v9140_v9 = vpop.f32.mrb[30].mxu1  ;;  %v9455_v13 = vpop.f32.mrb[32].mxu0 }
 0x6b0   : > { %7894 = vst.msk [vmem:[%s13431_s11 + $0x68] sm:$0xff] %vm374_vm0, %v10110_v1  ;;  %v10113_v52 = vadd.f32 %v9140_v9, %v13423_v33  ;;  %v6039_v56 = vpop.f32.mrb[31].mxu1  ;;  %v7595_v47 = vpop.f32.mrb[33].mxu0 }
 0x6b1   : > { %7893 = vst.msk [vmem:[%s13431_s11 + $0x60] sm:$0xff] %vm374_vm0, %v10112_v61  ;;  %v10115_v8 = vadd.f32 %v13423_v33, %v6039_v56 }
 0x6b2   : > { %v10114_v25 = vadd.f32 %v10113_v52, %v9452_v51 }
 0x6b3   : > { %v10116_v3 = vadd.f32 %v10115_v8, %v7583_v62  ;;  %v9143_v34 = vpop.f32.mrb[32].mxu1  ;;  %v9458_v59 = vpop.f32.mrb[34].mxu0 }
 0x6b4   : > { %7896 = vst.msk [vmem:[%s13431_s11 + $0x78] sm:$0xff] %vm374_vm0, %v10114_v25  ;;  %v10117_v39 = vadd.f32 %v9143_v34, %v13423_v33  ;;  %v6053_v36 = vpop.f32.mrb[33].mxu1  ;;  %v7607_v6 = vpop.f32.mrb[35].mxu0 }
 0x6b5   : > { %7895 = vst.msk [vmem:[%s13431_s11 + $0x70] sm:$0xff] %vm374_vm0, %v10116_v3  ;;  %v10119_v41 = vadd.f32 %v13423_v33, %v6053_v36 }
 0x6b6   : > { %v10118_v63 = vadd.f32 %v10117_v39, %v9455_v13 }
 0x6b7   : > { %v10120_v23 = vadd.f32 %v10119_v41, %v7595_v47  ;;  %v9146_v5 = vpop.f32.mrb[34].mxu1  ;;  %v9461_v44 = vpop.f32.mrb[36].mxu0 }
 0x6b8   : > { %7898 = vst.msk [vmem:[%s13431_s11 + $0x88] sm:$0xff] %vm374_vm0, %v10118_v63  ;;  %v10121_v4 = vadd.f32 %v9146_v5, %v13423_v33  ;;  %v6067_v30 = vpop.f32.mrb[35].mxu1  ;;  %v7619_v11 = vpop.f32.mrb[37].mxu0 }
 0x6b9   : > { %7897 = vst.msk [vmem:[%s13431_s11 + $0x80] sm:$0xff] %vm374_vm0, %v10120_v23  ;;  %v10123_v20 = vadd.f32 %v13423_v33, %v6067_v30 }
 0x6ba   : > { %v10122_v27 = vadd.f32 %v10121_v4, %v9458_v59 }
 0x6bb   : > { %v10124_v15 = vadd.f32 %v10123_v20, %v7607_v6  ;;  %v9149_v24 = vpop.f32.mrb[36].mxu1  ;;  %v9464_v37 = vpop.f32.mrb[38].mxu0 }
 0x6bc   : > { %7900 = vst.msk [vmem:[%s13431_s11 + $0x98] sm:$0xff] %vm374_vm0, %v10122_v27  ;;  %v10125_v55 = vadd.f32 %v9149_v24, %v13423_v33  ;;  %v6081_v35 = vpop.f32.mrb[37].mxu1  ;;  %v7631_v17 = vpop.f32.mrb[39].mxu0 }
 0x6bd   : > { %7899 = vst.msk [vmem:[%s13431_s11 + $0x90] sm:$0xff] %vm374_vm0, %v10124_v15  ;;  %v10127_v49 = vadd.f32 %v13423_v33, %v6081_v35 }
 0x6be   : > { %v10126_v48 = vadd.f32 %v10125_v55, %v9461_v44 }
 0x6bf   : > { %v10128_v31 = vadd.f32 %v10127_v49, %v7619_v11  ;;  %v9152_v2 = vpop.f32.mrb[38].mxu1  ;;  %v9467_v57 = vpop.f32.mrb[40].mxu0 }
 0x6c0   : > { %7902 = vst.msk [vmem:[%s13431_s11 + $0xa8] sm:$0xff] %vm374_vm0, %v10126_v48  ;;  %v10129_v50 = vadd.f32 %v9152_v2, %v13423_v33  ;;  %v6095_v53 = vpop.f32.mrb[39].mxu1  ;;  %v7643_v58 = vpop.f32.mrb[41].mxu0 }
 0x6c1   : > { %7901 = vst.msk [vmem:[%s13431_s11 + $0xa0] sm:$0xff] %vm374_vm0, %v10128_v31  ;;  %v10131_v21 = vadd.f32 %v13423_v33, %v6095_v53 }
 0x6c2   : > { %v10130_v10 = vadd.f32 %v10129_v50, %v9464_v37 }
 0x6c3   : > { %v10132_v54 = vadd.f32 %v10131_v21, %v7631_v17  ;;  %v9155_v22 = vpop.f32.mrb[40].mxu1  ;;  %v9470_v45 = vpop.f32.mrb[42].mxu0 }
 0x6c4   : > { %7904 = vst.msk [vmem:[%s13431_s11 + $0xb8] sm:$0xff] %vm374_vm0, %v10130_v10  ;;  %v10133_v40 = vadd.f32 %v9155_v22, %v13423_v33  ;;  %v6109_v16 = vpop.f32.mrb[41].mxu1  ;;  %v7655_v43 = vpop.f32.mrb[43].mxu0 }
 0x6c5   : > { %7903 = vst.msk [vmem:[%s13431_s11 + $0xb0] sm:$0xff] %vm374_vm0, %v10132_v54  ;;  %v10135_v19 = vadd.f32 %v13423_v33, %v6109_v16 }
 0x6c6   : > { %v10134_v7 = vadd.f32 %v10133_v40, %v9467_v57 }
 0x6c7   : > { %v10136_v12 = vadd.f32 %v10135_v19, %v7643_v58  ;;  %v9158_v60 = vpop.f32.mrb[42].mxu1  ;;  %v9473_v38 = vpop.f32.mrb[44].mxu0 }
 0x6c8   : > { %7906 = vst.msk [vmem:[%s13431_s11 + $0xc8] sm:$0xff] %vm374_vm0, %v10134_v7  ;;  %v10137_v28 = vadd.f32 %v9158_v60, %v13423_v33  ;;  %v6123_v26 = vpop.f32.mrb[43].mxu1  ;;  %v7667_v18 = vpop.f32.mrb[45].mxu0 }
 0x6c9   : > { %7905 = vst.msk [vmem:[%s13431_s11 + $0xc0] sm:$0xff] %vm374_vm0, %v10136_v12  ;;  %v10139_v46 = vadd.f32 %v13423_v33, %v6123_v26 }
 0x6ca   : > { %v10138_v14 = vadd.f32 %v10137_v28, %v9470_v45 }
 0x6cb   : > { %v10140_v0 = vadd.f32 %v10139_v46, %v7655_v43  ;;  %v9161_v51 = vpop.f32.mrb[44].mxu1  ;;  %v9476_v42 = vpop.f32.mrb[46].mxu0 }
 0x6cc   : > { %7908 = vst.msk [vmem:[%s13431_s11 + $0xd8] sm:$0xff] %vm374_vm0, %v10138_v14  ;;  %v10141_v29 = vadd.f32 %v9161_v51, %v13423_v33  ;;  %v6137_v62 = vpop.f32.mrb[45].mxu1  ;;  %v7679_v32 = vpop.f32.mrb[47].mxu0 }
 0x6cd   : > { %7907 = vst.msk [vmem:[%s13431_s11 + $0xd0] sm:$0xff] %vm374_vm0, %v10140_v0  ;;  %v10143_v1 = vadd.f32 %v13423_v33, %v6137_v62 }
 0x6ce   : > { %v10142_v61 = vadd.f32 %v10141_v29, %v9473_v38 }
 0x6cf   : > { %v10144_v9 = vadd.f32 %v10143_v1, %v7667_v18  ;;  %v9164_v13 = vpop.f32.mrb[46].mxu1  ;;  %v9479_v52 = vpop.f32.mrb[48].mxu0 }
 0x6d0   : > { %7910 = vst.msk [vmem:[%s13431_s11 + $0xe8] sm:$0xff] %vm374_vm0, %v10142_v61  ;;  %v10145_v56 = vadd.f32 %v9164_v13, %v13423_v33  ;;  %v6151_v47 = vpop.f32.mrb[47].mxu1  ;;  %v7691_v8 = vpop.f32.mrb[49].mxu0 }
 0x6d1   : > { %7909 = vst.msk [vmem:[%s13431_s11 + $0xe0] sm:$0xff] %vm374_vm0, %v10144_v9  ;;  %v10147_v25 = vadd.f32 %v13423_v33, %v6151_v47 }
 0x6d2   : > { %v10146_v3 = vadd.f32 %v10145_v56, %v9476_v42 }
 0x6d3   : > { %v10148_v34 = vadd.f32 %v10147_v25, %v7679_v32  ;;  %v9167_v59 = vpop.f32.mrb[48].mxu1  ;;  %v9482_v39 = vpop.f32.mrb[50].mxu0 }
 0x6d4   : > { %7912 = vst.msk [vmem:[%s13431_s11 + $0xf8] sm:$0xff] %vm374_vm0, %v10146_v3  ;;  %v10149_v36 = vadd.f32 %v9167_v59, %v13423_v33  ;;  %v6165_v6 = vpop.f32.mrb[49].mxu1  ;;  %v7703_v41 = vpop.f32.mrb[51].mxu0 }
 0x6d5   : > { %7911 = vst.msk [vmem:[%s13431_s11 + $0xf0] sm:$0xff] %vm374_vm0, %v10148_v34  ;;  %v10151_v63 = vadd.f32 %v13423_v33, %v6165_v6 }
 0x6d6   : > { %v10150_v23 = vadd.f32 %v10149_v36, %v9479_v52 }
 0x6d7   : > { %v10152_v5 = vadd.f32 %v10151_v63, %v7691_v8  ;;  %v9170_v44 = vpop.f32.mrb[50].mxu1  ;;  %v9485_v4 = vpop.f32.mrb[52].mxu0 }
 0x6d8   : > { %7914 = vst.msk [vmem:[%s13431_s11 + $0x108] sm:$0xff] %vm374_vm0, %v10150_v23  ;;  %v10153_v30 = vadd.f32 %v9170_v44, %v13423_v33  ;;  %v6179_v11 = vpop.f32.mrb[51].mxu1  ;;  %v7715_v20 = vpop.f32.mrb[53].mxu0 }
 0x6d9   : > { %7913 = vst.msk [vmem:[%s13431_s11 + $0x100] sm:$0xff] %vm374_vm0, %v10152_v5  ;;  %v10155_v27 = vadd.f32 %v13423_v33, %v6179_v11 }
 0x6da   : > { %v10154_v15 = vadd.f32 %v10153_v30, %v9482_v39 }
 0x6db   : > { %v10156_v24 = vadd.f32 %v10155_v27, %v7703_v41  ;;  %v9173_v37 = vpop.f32.mrb[52].mxu1  ;;  %v9488_v55 = vpop.f32.mrb[54].mxu0 }
 0x6dc   : > { %7916 = vst.msk [vmem:[%s13431_s11 + $0x118] sm:$0xff] %vm374_vm0, %v10154_v15  ;;  %v10157_v35 = vadd.f32 %v9173_v37, %v13423_v33  ;;  %v6193_v17 = vpop.f32.mrb[53].mxu1  ;;  %v7727_v49 = vpop.f32.mrb[55].mxu0 }
 0x6dd   : > { %7915 = vst.msk [vmem:[%s13431_s11 + $0x110] sm:$0xff] %vm374_vm0, %v10156_v24  ;;  %v10159_v48 = vadd.f32 %v13423_v33, %v6193_v17 }
 0x6de   : > { %v10158_v31 = vadd.f32 %v10157_v35, %v9485_v4 }
 0x6df   : > { %v10160_v2 = vadd.f32 %v10159_v48, %v7715_v20  ;;  %v9176_v57 = vpop.f32.mrb[54].mxu1  ;;  %v9491_v50 = vpop.f32.mrb[56].mxu0 }
 0x6e0   : > { %7918 = vst.msk [vmem:[%s13431_s11 + $0x128] sm:$0xff] %vm374_vm0, %v10158_v31  ;;  %v10161_v53 = vadd.f32 %v9176_v57, %v13423_v33  ;;  %v6207_v58 = vpop.f32.mrb[55].mxu1  ;;  %v7739_v21 = vpop.f32.mrb[57].mxu0 }
 0x6e1   : > { %7917 = vst.msk [vmem:[%s13431_s11 + $0x120] sm:$0xff] %vm374_vm0, %v10160_v2  ;;  %v10163_v10 = vadd.f32 %v13423_v33, %v6207_v58 }
 0x6e2   : > { %v10162_v54 = vadd.f32 %v10161_v53, %v9488_v55 }
 0x6e3   : > { %v10164_v22 = vadd.f32 %v10163_v10, %v7727_v49  ;;  %v9179_v45 = vpop.f32.mrb[56].mxu1  ;;  %v9494_v40 = vpop.f32.mrb[58].mxu0 }
 0x6e4   : > { %7920 = vst.msk [vmem:[%s13431_s11 + $0x138] sm:$0xff] %vm374_vm0, %v10162_v54  ;;  %v10165_v16 = vadd.f32 %v9179_v45, %v13423_v33  ;;  %v6221_v43 = vpop.f32.mrb[57].mxu1  ;;  %v7751_v19 = vpop.f32.mrb[59].mxu0 }
 0x6e5   : > { %7919 = vst.msk [vmem:[%s13431_s11 + $0x130] sm:$0xff] %vm374_vm0, %v10164_v22  ;;  %v10167_v7 = vadd.f32 %v13423_v33, %v6221_v43 }
 0x6e6   : > { %v10166_v12 = vadd.f32 %v10165_v16, %v9491_v50 }
 0x6e7   : > { %v10168_v60 = vadd.f32 %v10167_v7, %v7739_v21  ;;  %v9182_v38 = vpop.f32.mrb[58].mxu1  ;;  %v9497_v28 = vpop.f32.mrb[60].mxu0 }
 0x6e8   : > { %7922 = vst.msk [vmem:[%s13431_s11 + $0x148] sm:$0xff] %vm374_vm0, %v10166_v12  ;;  %v10169_v26 = vadd.f32 %v9182_v38, %v13423_v33  ;;  %v6235_v18 = vpop.f32.mrb[59].mxu1  ;;  %v7763_v46 = vpop.f32.mrb[61].mxu0 }
 0x6e9   : > { %7921 = vst.msk [vmem:[%s13431_s11 + $0x140] sm:$0xff] %vm374_vm0, %v10168_v60  ;;  %v10171_v14 = vadd.f32 %v13423_v33, %v6235_v18 }
 0x6ea   : > { %v10170_v0 = vadd.f32 %v10169_v26, %v9494_v40 }
 0x6eb   : > { %v10172_v51 = vadd.f32 %v10171_v14, %v7751_v19  ;;  %v9185_v42 = vpop.f32.mrb[60].mxu1  ;;  %v9500_v29 = vpop.f32.mrb[62].mxu0 }
 0x6ec   : > { %7924 = vst.msk [vmem:[%s13431_s11 + $0x158] sm:$0xff] %vm374_vm0, %v10170_v0  ;;  %v10173_v62 = vadd.f32 %v9185_v42, %v13423_v33  ;;  %v6249_v32 = vpop.f32.mrb[61].mxu1  ;;  %v7775_v1 = vpop.f32.mrb[63].mxu0 }
 0x6ed   : > { %7923 = vst.msk [vmem:[%s13431_s11 + $0x150] sm:$0xff] %vm374_vm0, %v10172_v51  ;;  %v10175_v61 = vadd.f32 %v13423_v33, %v6249_v32 }
 0x6ee   : > { %v10174_v9 = vadd.f32 %v10173_v62, %v9497_v28 }
 0x6ef   : > { %v10176_v13 = vadd.f32 %v10175_v61, %v7763_v46  ;;  %v9188_v52 = vpop.f32.mrb[62].mxu1  ;;  %v9503_v56 = vpop.f32.mrb[64].mxu0 }
 0x6f0   : > { %7926 = vst.msk [vmem:[%s13431_s11 + $0x168] sm:$0xff] %vm374_vm0, %v10174_v9  ;;  %v10177_v47 = vadd.f32 %v9188_v52, %v13423_v33  ;;  %v6263_v8 = vpop.f32.mrb[63].mxu1  ;;  %v7787_v25 = vpop.f32.mrb[65].mxu0 }
 0x6f1   : > { %7925 = vst.msk [vmem:[%s13431_s11 + $0x160] sm:$0xff] %vm374_vm0, %v10176_v13  ;;  %v10179_v3 = vadd.f32 %v13423_v33, %v6263_v8 }
 0x6f2   : > { %v10178_v34 = vadd.f32 %v10177_v47, %v9500_v29 }
 0x6f3   : > { %v10180_v59 = vadd.f32 %v10179_v3, %v7775_v1  ;;  %v9191_v39 = vpop.f32.mrb[64].mxu1  ;;  %v9506_v36 = vpop.f32.mrb[66].mxu0 }
 0x6f4   : > { %7928 = vst.msk [vmem:[%s13431_s11 + $0x178] sm:$0xff] %vm374_vm0, %v10178_v34  ;;  %v10181_v6 = vadd.f32 %v9191_v39, %v13423_v33  ;;  %v6277_v41 = vpop.f32.mrb[65].mxu1  ;;  %v7799_v63 = vpop.f32.mrb[67].mxu0 }
 0x6f5   : > { %7927 = vst.msk [vmem:[%s13431_s11 + $0x170] sm:$0xff] %vm374_vm0, %v10180_v59  ;;  %v10183_v23 = vadd.f32 %v13423_v33, %v6277_v41 }
 0x6f6   : > { %v10182_v5 = vadd.f32 %v10181_v6, %v9503_v56 }
 0x6f7   : > { %v10184_v44 = vadd.f32 %v10183_v23, %v7787_v25  ;;  %v9194_v4 = vpop.f32.mrb[66].mxu1  ;;  %v9509_v30 = vpop.f32.mrb[68].mxu0 }
 0x6f8   : > { %7930 = vst.msk [vmem:[%s13431_s11 + $0x188] sm:$0xff] %vm374_vm0, %v10182_v5  ;;  %v10185_v11 = vadd.f32 %v9194_v4, %v13423_v33  ;;  %v6291_v20 = vpop.f32.mrb[67].mxu1  ;;  %v7811_v27 = vpop.f32.mrb[69].mxu0 }
 0x6f9   : > { %7929 = vst.msk [vmem:[%s13431_s11 + $0x180] sm:$0xff] %vm374_vm0, %v10184_v44  ;;  %v10187_v15 = vadd.f32 %v13423_v33, %v6291_v20 }
 0x6fa   : > { %v10186_v24 = vadd.f32 %v10185_v11, %v9506_v36 }
 0x6fb   : > { %v10188_v37 = vadd.f32 %v10187_v15, %v7799_v63  ;;  %v9197_v55 = vpop.f32.mrb[68].mxu1  ;;  %v9512_v35 = vpop.f32.mrb[70].mxu0 }
 0x6fc   : > { %7932 = vst.msk [vmem:[%s13431_s11 + $0x198] sm:$0xff] %vm374_vm0, %v10186_v24  ;;  %v10189_v17 = vadd.f32 %v9197_v55, %v13423_v33  ;;  %v6305_v49 = vpop.f32.mrb[69].mxu1  ;;  %v7823_v48 = vpop.f32.mrb[71].mxu0 }
 0x6fd   : > { %7931 = vst.msk [vmem:[%s13431_s11 + $0x190] sm:$0xff] %vm374_vm0, %v10188_v37  ;;  %v10191_v31 = vadd.f32 %v13423_v33, %v6305_v49 }
 0x6fe   : > { %v10190_v2 = vadd.f32 %v10189_v17, %v9509_v30 }
 0x6ff   : > { %v10192_v57 = vadd.f32 %v10191_v31, %v7811_v27  ;;  %v9200_v50 = vpop.f32.mrb[70].mxu1  ;;  %v9515_v53 = vpop.f32.mrb[72].mxu0 }
 0x700   : > { %7934 = vst.msk [vmem:[%s13431_s11 + $0x1a8] sm:$0xff] %vm374_vm0, %v10190_v2  ;;  %v10193_v58 = vadd.f32 %v9200_v50, %v13423_v33  ;;  %v6319_v21 = vpop.f32.mrb[71].mxu1  ;;  %v7835_v10 = vpop.f32.mrb[73].mxu0 }
 0x701   : > { %7933 = vst.msk [vmem:[%s13431_s11 + $0x1a0] sm:$0xff] %vm374_vm0, %v10192_v57  ;;  %v10195_v54 = vadd.f32 %v13423_v33, %v6319_v21 }
 0x702   : > { %v10194_v22 = vadd.f32 %v10193_v58, %v9512_v35 }
 0x703   : > { %v10196_v45 = vadd.f32 %v10195_v54, %v7823_v48  ;;  %v9203_v40 = vpop.f32.mrb[72].mxu1  ;;  %v9518_v16 = vpop.f32.mrb[74].mxu0 }
 0x704   : > { %7936 = vst.msk [vmem:[%s13431_s11 + $0x1b8] sm:$0xff] %vm374_vm0, %v10194_v22  ;;  %v10197_v43 = vadd.f32 %v9203_v40, %v13423_v33  ;;  %v6333_v19 = vpop.f32.mrb[73].mxu1  ;;  %v7847_v7 = vpop.f32.mrb[75].mxu0 }
 0x705   : > { %7935 = vst.msk [vmem:[%s13431_s11 + $0x1b0] sm:$0xff] %vm374_vm0, %v10196_v45  ;;  %v10199_v12 = vadd.f32 %v13423_v33, %v6333_v19 }
 0x706   : > { %v10198_v60 = vadd.f32 %v10197_v43, %v9515_v53 }
 0x707   : > { %v10200_v38 = vadd.f32 %v10199_v12, %v7835_v10  ;;  %v9206_v28 = vpop.f32.mrb[74].mxu1  ;;  %v9521_v26 = vpop.f32.mrb[76].mxu0 }
 0x708   : > { %7938 = vst.msk [vmem:[%s13431_s11 + $0x1c8] sm:$0xff] %vm374_vm0, %v10198_v60  ;;  %v10201_v18 = vadd.f32 %v9206_v28, %v13423_v33  ;;  %v6347_v46 = vpop.f32.mrb[75].mxu1  ;;  %v7859_v14 = vpop.f32.mrb[77].mxu0 }
 0x709   : > { %7937 = vst.msk [vmem:[%s13431_s11 + $0x1c0] sm:$0xff] %vm374_vm0, %v10200_v38  ;;  %v10203_v0 = vadd.f32 %v13423_v33, %v6347_v46 }
 0x70a   : > { %v10202_v51 = vadd.f32 %v10201_v18, %v9518_v16 }
 0x70b   : > { %v10204_v42 = vadd.f32 %v10203_v0, %v7847_v7  ;;  %v9209_v29 = vpop.f32.mrb[76].mxu1  ;;  %v9524_v62 = vpop.f32.mrb[78].mxu0 }
 0x70c   : > { %7940 = vst.msk [vmem:[%s13431_s11 + $0x1d8] sm:$0xff] %vm374_vm0, %v10202_v51  ;;  %v10205_v32 = vadd.f32 %v9209_v29, %v13423_v33  ;;  %v6361_v1 = vpop.f32.mrb[77].mxu1  ;;  %v7871_v61 = vpop.f32.mrb[79].mxu0 }
 0x70d   : > { %7939 = vst.msk [vmem:[%s13431_s11 + $0x1d0] sm:$0xff] %vm374_vm0, %v10204_v42  ;;  %v10207_v9 = vadd.f32 %v13423_v33, %v6361_v1 }
 0x70e   : > { %v10206_v13 = vadd.f32 %v10205_v32, %v9521_v26 }
 0x70f   : > { %v10208_v52 = vadd.f32 %v10207_v9, %v7859_v14  ;;  %v9212_v56 = vpop.f32.mrb[78].mxu1 }
 0x710   : > { %7942 = vst.msk [vmem:[%s13431_s11 + $0x1e8] sm:$0xff] %vm374_vm0, %v10206_v13  ;;  %v10209_v47 = vadd.f32 %v9212_v56, %v13423_v33  ;;  %v6375_v8 = vpop.f32.mrb[79].mxu1 }
 0x711   : > { %7941 = vst.msk [vmem:[%s13431_s11 + $0x1e0] sm:$0xff] %vm374_vm0, %v10208_v52  ;;  %v10211_v25 = vadd.f32 %v13423_v33, %v6375_v8 }
 0x712   : > { %v10210_v3 = vadd.f32 %v10209_v47, %v9524_v62 }
 0x713   : > { %v10212_v34 = vadd.f32 %v10211_v25, %v7871_v61 }
 0x714   : > { %7944 = vst.msk [vmem:[%s13431_s11 + $0x1f8] sm:$0xff] %vm374_vm0, %v10210_v3 }
 0x715   : > { %7943 = vst.msk [vmem:[%s13431_s11 + $0x1f0] sm:$0xff] %vm374_vm0, %v10212_v34 }
 0x716 PF: > { %s17_s24 = sadd.s32 1, %s10775_s24  }
 0x717   : > { %p14_p4 = scmp.ge.s32.totalorder %s17_s24, 6  }
 0x719   :  { %16 = sbr.rel (!%p14_p4) target bundleno = 1 (0x1), region = 78 }

</bundles_post_ra>
